<compile_context>
chip_gen: v7x
topology: tpu7x:2x2x1
jax: 0.10.0
libtpu: 0.0.40
codegen_flags: <defaults>
</compile_context>

<pallas_src>
import functools

import jax
import jax.numpy as jnp
from jax.experimental import pallas as pl
from jax.experimental.pallas import tpu as pltpu


def _encoder_kernel(src_ref, wl_ref, bl_ref, wih0_ref, wihr_ref, whh_ref,
                    brz_ref, bni_ref, bnh_ref, out_ref, gi0_scr, *,
                    seq_len, batch, num_layers, hid_dim, gate_pad):
    """Single-invocation encoder forward.

    src_ref : (T*B, 2)                  flattened input
    wl_ref  : (2, 256)                  Linear weight (transposed)
    bl_ref  : (1, 256)                  Linear bias
    wih0_ref: (256, 3G)                 layer-0 input weights (gate-padded)
    wihr_ref: (max(L-1,1), G, 3G)       layer>0 input weights (padded)
    whh_ref : (L, G, 3G)                hidden weights (padded)
    brz_ref : (L, 1, 2G)                folded b_ih+b_hh for r/z gates
    bni_ref : (L, 1, G)                 b_ih for n gate
    bnh_ref : (L, 1, G)                 b_hh for n gate
    out_ref : (1, B, H)                 final hidden state of last layer
    gi0_scr : VMEM (T*B, 3G)            precomputed layer-0 input gates
    """
    T, B, L, H, G = seq_len, batch, num_layers, hid_dim, gate_pad

    # ---- Prologue: everything independent of the hidden state is batched over
    #      all T time steps as two large matmuls (off the serial path). ----
    x = jnp.dot(src_ref[...], wl_ref[...],
                preferred_element_type=jnp.float32) + bl_ref[...]
    x = jnp.maximum(x, 0.0)                                     # (T*B, 256) ReLU
    gi0_scr[...] = jnp.dot(x, wih0_ref[...],
                           preferred_element_type=jnp.float32)  # (T*B, 3G)

    # ---- Serial GRU recurrence (fully unrolled straight-line code). ----
    h = [jnp.zeros((B, G), jnp.float32) for _ in range(L)]
    for t in range(T):
        x_t = None
        for l in range(L):
            if l == 0:
                # Static, sublane-aligned slice of the precomputed gates.
                gi = gi0_scr[t * B:(t + 1) * B, :]
            else:
                gi = jnp.dot(x_t, wihr_ref[l - 1],
                             preferred_element_type=jnp.float32)
            gh = jnp.dot(h[l], whh_ref[l],
                         preferred_element_type=jnp.float32)    # (B, 3G)

            # Gates padded to 128 lanes each -> all slices are tile aligned.
            rz = jax.nn.sigmoid(gi[:, :2 * G] + gh[:, :2 * G] + brz_ref[l])
            r = rz[:, :G]
            z = rz[:, G:]
            n = jnp.tanh(gi[:, 2 * G:] + bni_ref[l]
                         + r * (gh[:, 2 * G:] + bnh_ref[l]))
            h[l] = (1.0 - z) * n + z * h[l]
            x_t = h[l]

    # Single output write after the recurrence finishes.
    out_ref[0] = h[L - 1][:, :H]


def _pad_gate_cols(w, H, G):
    """(..., 3H) -> (..., 3G): place each gate's H columns at offset g*G."""
    parts = []
    for g in range(3):
        wg = w[..., g * H:(g + 1) * H]
        pad = [(0, 0)] * (w.ndim - 1) + [(0, G - H)]
        parts.append(jnp.pad(wg, pad))
    return jnp.concatenate(parts, axis=-1)


def encoder_forward(src, params, *, hid_dim, num_layers):
    """src: (seq_len, batch, 2) float32 -> hidden (1, batch, hid_dim)."""
    seq_len, batch, in_dim = src.shape
    assert in_dim == 2
    H, L = hid_dim, num_layers
    G = ((H + 127) // 128) * 128          # per-gate lane width, tile aligned

    # --- Host-side layout plumbing (one-time): pad gate columns to 128-lane
    #     groups, zero-pad the recurrent input dim H -> G, fold r/z biases. ---
    wih0 = _pad_gate_cols(params["wih0"], H, G)                  # (256, 3G)
    wihr = _pad_gate_cols(params["wihr"], H, G)                  # (max(L-1,1), H, 3G)
    wihr = jnp.pad(wihr, ((0, 0), (0, G - H), (0, 0)))           # (., G, 3G)
    whh = _pad_gate_cols(params["whh"], H, G)
    whh = jnp.pad(whh, ((0, 0), (0, G - H), (0, 0)))             # (L, G, 3G)
    bih = _pad_gate_cols(params["bih"][:, None, :], H, G)        # (L, 1, 3G)
    bhh = _pad_gate_cols(params["bhh"][:, None, :], H, G)        # (L, 1, 3G)
    brz = bih[:, :, :2 * G] + bhh[:, :, :2 * G]                  # (L, 1, 2G)
    bni = bih[:, :, 2 * G:]                                      # (L, 1, G)
    bnh = bhh[:, :, 2 * G:]                                      # (L, 1, G)

    src2 = src.reshape(seq_len * batch, in_dim)                  # (T*B, 2)

    kernel = functools.partial(
        _encoder_kernel, seq_len=seq_len, batch=batch,
        num_layers=num_layers, hid_dim=hid_dim, gate_pad=G)

    full = lambda shape: pl.BlockSpec(shape, lambda i: tuple(0 for _ in shape))

    return pl.pallas_call(
        kernel,
        out_shape=jax.ShapeDtypeStruct((1, batch, H), jnp.float32),
        grid=(1,),
        in_specs=[
            full((seq_len * batch, 2)),        # src (flattened over time)
            full((2, 256)),                    # wl
            full((1, 256)),                    # bl
            full((256, 3 * G)),                # wih0 (gate padded)
            full((max(L - 1, 1), G, 3 * G)),   # wih layers > 0 (padded)
            full((L, G, 3 * G)),               # whh (padded)
            full((L, 1, 2 * G)),               # folded r/z bias
            full((L, 1, G)),                   # b_in (n gate, input side)
            full((L, 1, G)),                   # b_hn (n gate, hidden side)
        ],
        out_specs=pl.BlockSpec((1, batch, H), lambda i: (0, 0, 0)),
        scratch_shapes=[pltpu.VMEM((seq_len * batch, 3 * G), jnp.float32)],
        compiler_params=pltpu.CompilerParams(
            dimension_semantics=("arbitrary",)),
    )(src2, params["wl"], params["bl"], wih0, wihr, whh, brz, bni, bnh)


def ref_forward(src, params, *, hid_dim, num_layers):
    """Pure-JAX reference of the same forward pass (unpadded params)."""
    H = hid_dim
    T, B, _ = src.shape
    x = jnp.maximum(src @ params["wl"] + params["bl"][0], 0.0)   # (T, B, 256)
    h = jnp.zeros((num_layers, B, H), jnp.float32)
    for t in range(T):
        inp = x[t]
        for l in range(num_layers):
            wih = params["wih0"] if l == 0 else params["wihr"][l - 1]
            gi = inp @ wih + params["bih"][l]
            gh = h[l] @ params["whh"][l] + params["bhh"][l]
            r = jax.nn.sigmoid(gi[:, :H] + gh[:, :H])
            z = jax.nn.sigmoid(gi[:, H:2 * H] + gh[:, H:2 * H])
            n = jnp.tanh(gi[:, 2 * H:] + r * gh[:, 2 * H:])
            h_new = (1.0 - z) * n + z * h[l]
            h = h.at[l].set(h_new)
            inp = h_new
    return h[-1][None]


def init_params(key, *, hid_dim, num_layers):
    """Deterministic synthetic parameters (PyTorch-style uniform init)."""
    H = hid_dim
    ks = jax.random.split(key, 8)
    u = lambda k, shape, bound: jax.random.uniform(
        k, shape, jnp.float32, minval=-bound, maxval=bound)
    s_lin = 1.0 / jnp.sqrt(2.0)
    s_gru = 1.0 / jnp.sqrt(float(H))
    return {
        "wl":   u(ks[0], (2, 256), s_lin),                            # Linear(2,256).weight.T
        "bl":   u(ks[1], (1, 256), s_lin),                            # Linear bias
        "wih0": u(ks[2], (256, 3 * H), s_gru),                        # weight_ih_l0.T
        "wihr": u(ks[3], (max(num_layers - 1, 1), H, 3 * H), s_gru),  # weight_ih_l{>0}.T
        "whh":  u(ks[4], (num_layers, H, 3 * H), s_gru),              # weight_hh_l*.T
        "bih":  u(ks[5], (num_layers, 3 * H), s_gru),
        "bhh":  u(ks[6], (num_layers, 3 * H), s_gru),
    }


if __name__ == "__main__":
    SEQ_LEN, BATCH, HID_DIM, NUM_LAYERS = 8, 8, 32, 2

    key = jax.random.PRNGKey(0)
    k_src, k_par = jax.random.split(key)
    src = jax.random.normal(k_src, (SEQ_LEN, BATCH, 2), jnp.float32)
    params = init_params(k_par, hid_dim=HID_DIM, num_layers=NUM_LAYERS)

    hidden = encoder_forward(src, params, hid_dim=HID_DIM, num_layers=NUM_LAYERS)
    hidden = jax.block_until_ready(hidden)

    expected = ref_forward(src, params, hid_dim=HID_DIM, num_layers=NUM_LAYERS)
    assert hidden.shape == (1, BATCH, HID_DIM)
    assert jnp.allclose(hidden, expected, atol=1e-5, rtol=1e-5), (
        f"max abs diff = {jnp.max(jnp.abs(hidden - expected))}")

    print("KERNEL_OK")
</pallas_src>

<mosaic_0001>
module attributes {stable_mosaic.version = 11 : i64} {
  func.func @_encoder_kernel(%arg0: i32, %arg1: memref<64x2xf32, #tpu.memory_space<vmem>>, %arg2: memref<2x256xf32, #tpu.memory_space<vmem>>, %arg3: memref<1x256xf32, #tpu.memory_space<vmem>>, %arg4: memref<256x384xf32, #tpu.memory_space<vmem>>, %arg5: memref<1x128x384xf32, #tpu.memory_space<vmem>>, %arg6: memref<2x128x384xf32, #tpu.memory_space<vmem>>, %arg7: memref<2x1x256xf32, #tpu.memory_space<vmem>>, %arg8: memref<2x1x128xf32, #tpu.memory_space<vmem>>, %arg9: memref<2x1x128xf32, #tpu.memory_space<vmem>>, %arg10: memref<1x8x32xf32, #tpu.memory_space<vmem>>, %arg11: memref<64x384xf32, #tpu.memory_space<vmem>>) attributes {dimension_semantics = [#tpu.dimension_semantics<arbitrary>], iteration_bounds = array<i64: 1>, scalar_prefetch = 0 : i64, scratch_operands = 1 : i64, tpu.core_type = #tpu.core_type<tc>, window_params = [{pipeline_mode = #tpu.pipeline_mode<synchronous>, transform_indices = @transform_0, window_bounds = array<i64: 64, 2>}, {pipeline_mode = #tpu.pipeline_mode<synchronous>, transform_indices = @transform_1, window_bounds = array<i64: 2, 256>}, {pipeline_mode = #tpu.pipeline_mode<synchronous>, transform_indices = @transform_2, window_bounds = array<i64: 1, 256>}, {pipeline_mode = #tpu.pipeline_mode<synchronous>, transform_indices = @transform_3, window_bounds = array<i64: 256, 384>}, {pipeline_mode = #tpu.pipeline_mode<synchronous>, transform_indices = @transform_4, window_bounds = array<i64: 1, 128, 384>}, {pipeline_mode = #tpu.pipeline_mode<synchronous>, transform_indices = @transform_5, window_bounds = array<i64: 2, 128, 384>}, {pipeline_mode = #tpu.pipeline_mode<synchronous>, transform_indices = @transform_6, window_bounds = array<i64: 2, 1, 256>}, {pipeline_mode = #tpu.pipeline_mode<synchronous>, transform_indices = @transform_7, window_bounds = array<i64: 2, 1, 128>}, {pipeline_mode = #tpu.pipeline_mode<synchronous>, transform_indices = @transform_8, window_bounds = array<i64: 2, 1, 128>}, {pipeline_mode = #tpu.pipeline_mode<synchronous>, transform_indices = @transform_9, window_bounds = array<i64: 1, 8, 32>}]} {
    %c0 = arith.constant 0 : index
    %c0_0 = arith.constant 0 : index
    %0 = vector.load %arg1[%c0, %c0_0] : memref<64x2xf32, #tpu.memory_space<vmem>>, vector<64x2xf32>
    %c0_1 = arith.constant 0 : index
    %c0_2 = arith.constant 0 : index
    %1 = vector.load %arg2[%c0_1, %c0_2] : memref<2x256xf32, #tpu.memory_space<vmem>>, vector<2x256xf32>
    %cst = arith.constant dense<0.000000e+00> : vector<64x256xf32>
    %2 = tpu.matmul %0, %1, %cst {dimension_numbers = #tpu.dot_dimension_numbers<[1], [0], [0], [1], [0, 0, 1, 1], [], []>} : vector<64x2xf32>, vector<2x256xf32>, vector<64x256xf32> -> vector<64x256xf32>
    %c0_3 = arith.constant 0 : index
    %c0_4 = arith.constant 0 : index
    %3 = vector.load %arg3[%c0_3, %c0_4] : memref<1x256xf32, #tpu.memory_space<vmem>>, vector<1x256xf32>
    %4 = vector.broadcast %3 : vector<1x256xf32> to vector<64x256xf32>
    %5 = arith.addf %2, %4 : vector<64x256xf32>
    %cst_5 = arith.constant 0.000000e+00 : f32
    %6 = vector.broadcast %cst_5 : f32 to vector<64x256xf32>
    %7 = arith.maximumf %5, %6 : vector<64x256xf32>
    %c0_6 = arith.constant 0 : index
    %c0_7 = arith.constant 0 : index
    %8 = vector.load %arg4[%c0_6, %c0_7] : memref<256x384xf32, #tpu.memory_space<vmem>>, vector<256x384xf32>
    %cst_8 = arith.constant dense<0.000000e+00> : vector<64x384xf32>
    %9 = tpu.matmul %7, %8, %cst_8 {dimension_numbers = #tpu.dot_dimension_numbers<[1], [0], [0], [1], [0, 0, 1, 1], [], []>} : vector<64x256xf32>, vector<256x384xf32>, vector<64x384xf32> -> vector<64x384xf32>
    %c0_9 = arith.constant 0 : index
    %c0_10 = arith.constant 0 : index
    %10 = vector.load %arg11[%c0_9, %c0_10] : memref<64x384xf32, #tpu.memory_space<vmem>>, vector<64x384xf32>
    tpu.vector_store %arg11[%c0_9, %c0_10], %9 {strides = array<i32>} : memref<64x384xf32, #tpu.memory_space<vmem>>, vector<64x384xf32>,
    %cst_11 = arith.constant 0.000000e+00 : f32
    %11 = vector.broadcast %cst_11 : f32 to vector<8x128xf32>
    %cst_12 = arith.constant 0.000000e+00 : f32
    %12 = vector.broadcast %cst_12 : f32 to vector<8x128xf32>
    %c0_13 = arith.constant 0 : index
    %c0_14 = arith.constant 0 : index
    %13 = vector.load %arg11[%c0_13, %c0_14] : memref<64x384xf32, #tpu.memory_space<vmem>>, vector<8x384xf32>
    %c0_15 = arith.constant 0 : index
    %c0_16 = arith.constant 0 : index
    %c0_17 = arith.constant 0 : index
    %14 = vector.load %arg6[%c0_15, %c0_16, %c0_17] : memref<2x128x384xf32, #tpu.memory_space<vmem>>, vector<1x128x384xf32>
    %15 = vector.shape_cast %14 : vector<1x128x384xf32> to vector<128x384xf32>
    %cst_18 = arith.constant dense<0.000000e+00> : vector<8x384xf32>
    %16 = tpu.matmul %11, %15, %cst_18 {dimension_numbers = #tpu.dot_dimension_numbers<[1], [0], [0], [1], [0, 0, 1, 1], [], []>} : vector<8x128xf32>, vector<128x384xf32>, vector<8x384xf32> -> vector<8x384xf32>
    %17 = vector.extract_strided_slice %13 {offsets = [0, 0], sizes = [8, 256], strides = [1, 1]} : vector<8x384xf32> to vector<8x256xf32>
    %18 = vector.extract_strided_slice %16 {offsets = [0, 0], sizes = [8, 256], strides = [1, 1]} : vector<8x384xf32> to vector<8x256xf32>
    %19 = arith.addf %17, %18 : vector<8x256xf32>
    %c0_19 = arith.constant 0 : index
    %c0_20 = arith.constant 0 : index
    %c0_21 = arith.constant 0 : index
    %20 = vector.load %arg7[%c0_19, %c0_20, %c0_21] : memref<2x1x256xf32, #tpu.memory_space<vmem>>, vector<1x1x256xf32>
    %21 = vector.shape_cast %20 : vector<1x1x256xf32> to vector<1x256xf32>
    %22 = vector.broadcast %21 : vector<1x256xf32> to vector<8x256xf32>
    %23 = arith.addf %19, %22 : vector<8x256xf32>
    %24 = arith.negf %23 : vector<8x256xf32>
    %25 = math.exp %24 : vector<8x256xf32>
    %cst_22 = arith.constant 1.000000e+00 : f32
    %26 = vector.broadcast %cst_22 : f32 to vector<8x256xf32>
    %27 = arith.addf %26, %25 : vector<8x256xf32>
    %28 = arith.divf %26, %27 : vector<8x256xf32>
    %29 = vector.extract_strided_slice %28 {offsets = [0, 0], sizes = [8, 128], strides = [1, 1]} : vector<8x256xf32> to vector<8x128xf32>
    %30 = vector.extract_strided_slice %28 {offsets = [0, 128], sizes = [8, 128], strides = [1, 1]} : vector<8x256xf32> to vector<8x128xf32>
    %31 = vector.extract_strided_slice %13 {offsets = [0, 256], sizes = [8, 128], strides = [1, 1]} : vector<8x384xf32> to vector<8x128xf32>
    %c0_23 = arith.constant 0 : index
    %c0_24 = arith.constant 0 : index
    %c0_25 = arith.constant 0 : index
    %32 = vector.load %arg8[%c0_23, %c0_24, %c0_25] : memref<2x1x128xf32, #tpu.memory_space<vmem>>, vector<1x1x128xf32>
    %33 = vector.shape_cast %32 : vector<1x1x128xf32> to vector<1x128xf32>
    %34 = vector.broadcast %33 : vector<1x128xf32> to vector<8x128xf32>
    %35 = arith.addf %31, %34 : vector<8x128xf32>
    %36 = vector.extract_strided_slice %16 {offsets = [0, 256], sizes = [8, 128], strides = [1, 1]} : vector<8x384xf32> to vector<8x128xf32>
    %c0_26 = arith.constant 0 : index
    %c0_27 = arith.constant 0 : index
    %c0_28 = arith.constant 0 : index
    %37 = vector.load %arg9[%c0_26, %c0_27, %c0_28] : memref<2x1x128xf32, #tpu.memory_space<vmem>>, vector<1x1x128xf32>
    %38 = vector.shape_cast %37 : vector<1x1x128xf32> to vector<1x128xf32>
    %39 = vector.broadcast %38 : vector<1x128xf32> to vector<8x128xf32>
    %40 = arith.addf %36, %39 : vector<8x128xf32>
    %41 = arith.mulf %29, %40 : vector<8x128xf32>
    %42 = arith.addf %35, %41 : vector<8x128xf32>
    %43 = math.tanh %42 : vector<8x128xf32>
    %cst_29 = arith.constant 1.000000e+00 : f32
    %44 = vector.broadcast %cst_29 : f32 to vector<8x128xf32>
    %45 = arith.subf %44, %30 : vector<8x128xf32>
    %46 = arith.mulf %45, %43 : vector<8x128xf32>
    %47 = arith.mulf %30, %11 : vector<8x128xf32>
    %48 = arith.addf %46, %47 : vector<8x128xf32>
    %c0_30 = arith.constant 0 : index
    %c0_31 = arith.constant 0 : index
    %c0_32 = arith.constant 0 : index
    %49 = vector.load %arg5[%c0_30, %c0_31, %c0_32] : memref<1x128x384xf32, #tpu.memory_space<vmem>>, vector<1x128x384xf32>
    %50 = vector.shape_cast %49 : vector<1x128x384xf32> to vector<128x384xf32>
    %cst_33 = arith.constant dense<0.000000e+00> : vector<8x384xf32>
    %51 = tpu.matmul %48, %50, %cst_33 {dimension_numbers = #tpu.dot_dimension_numbers<[1], [0], [0], [1], [0, 0, 1, 1], [], []>} : vector<8x128xf32>, vector<128x384xf32>, vector<8x384xf32> -> vector<8x384xf32>
    %c1 = arith.constant 1 : index
    %c0_34 = arith.constant 0 : index
    %c0_35 = arith.constant 0 : index
    %52 = vector.load %arg6[%c1, %c0_34, %c0_35] : memref<2x128x384xf32, #tpu.memory_space<vmem>>, vector<1x128x384xf32>
    %53 = vector.shape_cast %52 : vector<1x128x384xf32> to vector<128x384xf32>
    %cst_36 = arith.constant dense<0.000000e+00> : vector<8x384xf32>
    %54 = tpu.matmul %12, %53, %cst_36 {dimension_numbers = #tpu.dot_dimension_numbers<[1], [0], [0], [1], [0, 0, 1, 1], [], []>} : vector<8x128xf32>, vector<128x384xf32>, vector<8x384xf32> -> vector<8x384xf32>
    %55 = vector.extract_strided_slice %51 {offsets = [0, 0], sizes = [8, 256], strides = [1, 1]} : vector<8x384xf32> to vector<8x256xf32>
    %56 = vector.extract_strided_slice %54 {offsets = [0, 0], sizes = [8, 256], strides = [1, 1]} : vector<8x384xf32> to vector<8x256xf32>
    %57 = arith.addf %55, %56 : vector<8x256xf32>
    %c1_37 = arith.constant 1 : index
    %c0_38 = arith.constant 0 : index
    %c0_39 = arith.constant 0 : index
    %58 = vector.load %arg7[%c1_37, %c0_38, %c0_39] : memref<2x1x256xf32, #tpu.memory_space<vmem>>, vector<1x1x256xf32>
    %59 = vector.shape_cast %58 : vector<1x1x256xf32> to vector<1x256xf32>
    %60 = vector.broadcast %59 : vector<1x256xf32> to vector<8x256xf32>
    %61 = arith.addf %57, %60 : vector<8x256xf32>
    %62 = arith.negf %61 : vector<8x256xf32>
    %63 = math.exp %62 : vector<8x256xf32>
    %cst_40 = arith.constant 1.000000e+00 : f32
    %64 = vector.broadcast %cst_40 : f32 to vector<8x256xf32>
    %65 = arith.addf %64, %63 : vector<8x256xf32>
    %66 = arith.divf %64, %65 : vector<8x256xf32>
    %67 = vector.extract_strided_slice %66 {offsets = [0, 0], sizes = [8, 128], strides = [1, 1]} : vector<8x256xf32> to vector<8x128xf32>
    %68 = vector.extract_strided_slice %66 {offsets = [0, 128], sizes = [8, 128], strides = [1, 1]} : vector<8x256xf32> to vector<8x128xf32>
    %69 = vector.extract_strided_slice %51 {offsets = [0, 256], sizes = [8, 128], strides = [1, 1]} : vector<8x384xf32> to vector<8x128xf32>
    %c1_41 = arith.constant 1 : index
    %c0_42 = arith.constant 0 : index
    %c0_43 = arith.constant 0 : index
    %70 = vector.load %arg8[%c1_41, %c0_42, %c0_43] : memref<2x1x128xf32, #tpu.memory_space<vmem>>, vector<1x1x128xf32>
    %71 = vector.shape_cast %70 : vector<1x1x128xf32> to vector<1x128xf32>
    %72 = vector.broadcast %71 : vector<1x128xf32> to vector<8x128xf32>
    %73 = arith.addf %69, %72 : vector<8x128xf32>
    %74 = vector.extract_strided_slice %54 {offsets = [0, 256], sizes = [8, 128], strides = [1, 1]} : vector<8x384xf32> to vector<8x128xf32>
    %c1_44 = arith.constant 1 : index
    %c0_45 = arith.constant 0 : index
    %c0_46 = arith.constant 0 : index
    %75 = vector.load %arg9[%c1_44, %c0_45, %c0_46] : memref<2x1x128xf32, #tpu.memory_space<vmem>>, vector<1x1x128xf32>
    %76 = vector.shape_cast %75 : vector<1x1x128xf32> to vector<1x128xf32>
    %77 = vector.broadcast %76 : vector<1x128xf32> to vector<8x128xf32>
    %78 = arith.addf %74, %77 : vector<8x128xf32>
    %79 = arith.mulf %67, %78 : vector<8x128xf32>
    %80 = arith.addf %73, %79 : vector<8x128xf32>
    %81 = math.tanh %80 : vector<8x128xf32>
    %cst_47 = arith.constant 1.000000e+00 : f32
    %82 = vector.broadcast %cst_47 : f32 to vector<8x128xf32>
    %83 = arith.subf %82, %68 : vector<8x128xf32>
    %84 = arith.mulf %83, %81 : vector<8x128xf32>
    %85 = arith.mulf %68, %12 : vector<8x128xf32>
    %86 = arith.addf %84, %85 : vector<8x128xf32>
    %c8 = arith.constant 8 : index
    %c0_48 = arith.constant 0 : index
    %87 = vector.load %arg11[%c8, %c0_48] : memref<64x384xf32, #tpu.memory_space<vmem>>, vector<8x384xf32>
    %c0_49 = arith.constant 0 : index
    %c0_50 = arith.constant 0 : index
    %c0_51 = arith.constant 0 : index
    %88 = vector.load %arg6[%c0_49, %c0_50, %c0_51] : memref<2x128x384xf32, #tpu.memory_space<vmem>>, vector<1x128x384xf32>
    %89 = vector.shape_cast %88 : vector<1x128x384xf32> to vector<128x384xf32>
    %cst_52 = arith.constant dense<0.000000e+00> : vector<8x384xf32>
    %90 = tpu.matmul %48, %89, %cst_52 {dimension_numbers = #tpu.dot_dimension_numbers<[1], [0], [0], [1], [0, 0, 1, 1], [], []>} : vector<8x128xf32>, vector<128x384xf32>, vector<8x384xf32> -> vector<8x384xf32>
    %91 = vector.extract_strided_slice %87 {offsets = [0, 0], sizes = [8, 256], strides = [1, 1]} : vector<8x384xf32> to vector<8x256xf32>
    %92 = vector.extract_strided_slice %90 {offsets = [0, 0], sizes = [8, 256], strides = [1, 1]} : vector<8x384xf32> to vector<8x256xf32>
    %93 = arith.addf %91, %92 : vector<8x256xf32>
    %c0_53 = arith.constant 0 : index
    %c0_54 = arith.constant 0 : index
    %c0_55 = arith.constant 0 : index
    %94 = vector.load %arg7[%c0_53, %c0_54, %c0_55] : memref<2x1x256xf32, #tpu.memory_space<vmem>>, vector<1x1x256xf32>
    %95 = vector.shape_cast %94 : vector<1x1x256xf32> to vector<1x256xf32>
    %96 = vector.broadcast %95 : vector<1x256xf32> to vector<8x256xf32>
    %97 = arith.addf %93, %96 : vector<8x256xf32>
    %98 = arith.negf %97 : vector<8x256xf32>
    %99 = math.exp %98 : vector<8x256xf32>
    %cst_56 = arith.constant 1.000000e+00 : f32
    %100 = vector.broadcast %cst_56 : f32 to vector<8x256xf32>
    %101 = arith.addf %100, %99 : vector<8x256xf32>
    %102 = arith.divf %100, %101 : vector<8x256xf32>
    %103 = vector.extract_strided_slice %102 {offsets = [0, 0], sizes = [8, 128], strides = [1, 1]} : vector<8x256xf32> to vector<8x128xf32>
    %104 = vector.extract_strided_slice %102 {offsets = [0, 128], sizes = [8, 128], strides = [1, 1]} : vector<8x256xf32> to vector<8x128xf32>
    %105 = vector.extract_strided_slice %87 {offsets = [0, 256], sizes = [8, 128], strides = [1, 1]} : vector<8x384xf32> to vector<8x128xf32>
    %c0_57 = arith.constant 0 : index
    %c0_58 = arith.constant 0 : index
    %c0_59 = arith.constant 0 : index
    %106 = vector.load %arg8[%c0_57, %c0_58, %c0_59] : memref<2x1x128xf32, #tpu.memory_space<vmem>>, vector<1x1x128xf32>
    %107 = vector.shape_cast %106 : vector<1x1x128xf32> to vector<1x128xf32>
    %108 = vector.broadcast %107 : vector<1x128xf32> to vector<8x128xf32>
    %109 = arith.addf %105, %108 : vector<8x128xf32>
    %110 = vector.extract_strided_slice %90 {offsets = [0, 256], sizes = [8, 128], strides = [1, 1]} : vector<8x384xf32> to vector<8x128xf32>
    %c0_60 = arith.constant 0 : index
    %c0_61 = arith.constant 0 : index
    %c0_62 = arith.constant 0 : index
    %111 = vector.load %arg9[%c0_60, %c0_61, %c0_62] : memref<2x1x128xf32, #tpu.memory_space<vmem>>, vector<1x1x128xf32>
    %112 = vector.shape_cast %111 : vector<1x1x128xf32> to vector<1x128xf32>
    %113 = vector.broadcast %112 : vector<1x128xf32> to vector<8x128xf32>
    %114 = arith.addf %110, %113 : vector<8x128xf32>
    %115 = arith.mulf %103, %114 : vector<8x128xf32>
    %116 = arith.addf %109, %115 : vector<8x128xf32>
    %117 = math.tanh %116 : vector<8x128xf32>
    %cst_63 = arith.constant 1.000000e+00 : f32
    %118 = vector.broadcast %cst_63 : f32 to vector<8x128xf32>
    %119 = arith.subf %118, %104 : vector<8x128xf32>
    %120 = arith.mulf %119, %117 : vector<8x128xf32>
    %121 = arith.mulf %104, %48 : vector<8x128xf32>
    %122 = arith.addf %120, %121 : vector<8x128xf32>
    %c0_64 = arith.constant 0 : index
    %c0_65 = arith.constant 0 : index
    %c0_66 = arith.constant 0 : index
    %123 = vector.load %arg5[%c0_64, %c0_65, %c0_66] : memref<1x128x384xf32, #tpu.memory_space<vmem>>, vector<1x128x384xf32>
    %124 = vector.shape_cast %123 : vector<1x128x384xf32> to vector<128x384xf32>
    %cst_67 = arith.constant dense<0.000000e+00> : vector<8x384xf32>
    %125 = tpu.matmul %122, %124, %cst_67 {dimension_numbers = #tpu.dot_dimension_numbers<[1], [0], [0], [1], [0, 0, 1, 1], [], []>} : vector<8x128xf32>, vector<128x384xf32>, vector<8x384xf32> -> vector<8x384xf32>
    %c1_68 = arith.constant 1 : index
    %c0_69 = arith.constant 0 : index
    %c0_70 = arith.constant 0 : index
    %126 = vector.load %arg6[%c1_68, %c0_69, %c0_70] : memref<2x128x384xf32, #tpu.memory_space<vmem>>, vector<1x128x384xf32>
    %127 = vector.shape_cast %126 : vector<1x128x384xf32> to vector<128x384xf32>
    %cst_71 = arith.constant dense<0.000000e+00> : vector<8x384xf32>
    %128 = tpu.matmul %86, %127, %cst_71 {dimension_numbers = #tpu.dot_dimension_numbers<[1], [0], [0], [1], [0, 0, 1, 1], [], []>} : vector<8x128xf32>, vector<128x384xf32>, vector<8x384xf32> -> vector<8x384xf32>
    %129 = vector.extract_strided_slice %125 {offsets = [0, 0], sizes = [8, 256], strides = [1, 1]} : vector<8x384xf32> to vector<8x256xf32>
    %130 = vector.extract_strided_slice %128 {offsets = [0, 0], sizes = [8, 256], strides = [1, 1]} : vector<8x384xf32> to vector<8x256xf32>
    %131 = arith.addf %129, %130 : vector<8x256xf32>
    %c1_72 = arith.constant 1 : index
    %c0_73 = arith.constant 0 : index
    %c0_74 = arith.constant 0 : index
    %132 = vector.load %arg7[%c1_72, %c0_73, %c0_74] : memref<2x1x256xf32, #tpu.memory_space<vmem>>, vector<1x1x256xf32>
    %133 = vector.shape_cast %132 : vector<1x1x256xf32> to vector<1x256xf32>
    %134 = vector.broadcast %133 : vector<1x256xf32> to vector<8x256xf32>
    %135 = arith.addf %131, %134 : vector<8x256xf32>
    %136 = arith.negf %135 : vector<8x256xf32>
    %137 = math.exp %136 : vector<8x256xf32>
    %cst_75 = arith.constant 1.000000e+00 : f32
    %138 = vector.broadcast %cst_75 : f32 to vector<8x256xf32>
    %139 = arith.addf %138, %137 : vector<8x256xf32>
    %140 = arith.divf %138, %139 : vector<8x256xf32>
    %141 = vector.extract_strided_slice %140 {offsets = [0, 0], sizes = [8, 128], strides = [1, 1]} : vector<8x256xf32> to vector<8x128xf32>
    %142 = vector.extract_strided_slice %140 {offsets = [0, 128], sizes = [8, 128], strides = [1, 1]} : vector<8x256xf32> to vector<8x128xf32>
    %143 = vector.extract_strided_slice %125 {offsets = [0, 256], sizes = [8, 128], strides = [1, 1]} : vector<8x384xf32> to vector<8x128xf32>
    %c1_76 = arith.constant 1 : index
    %c0_77 = arith.constant 0 : index
    %c0_78 = arith.constant 0 : index
    %144 = vector.load %arg8[%c1_76, %c0_77, %c0_78] : memref<2x1x128xf32, #tpu.memory_space<vmem>>, vector<1x1x128xf32>
    %145 = vector.shape_cast %144 : vector<1x1x128xf32> to vector<1x128xf32>
    %146 = vector.broadcast %145 : vector<1x128xf32> to vector<8x128xf32>
    %147 = arith.addf %143, %146 : vector<8x128xf32>
    %148 = vector.extract_strided_slice %128 {offsets = [0, 256], sizes = [8, 128], strides = [1, 1]} : vector<8x384xf32> to vector<8x128xf32>
    %c1_79 = arith.constant 1 : index
    %c0_80 = arith.constant 0 : index
    %c0_81 = arith.constant 0 : index
    %149 = vector.load %arg9[%c1_79, %c0_80, %c0_81] : memref<2x1x128xf32, #tpu.memory_space<vmem>>, vector<1x1x128xf32>
    %150 = vector.shape_cast %149 : vector<1x1x128xf32> to vector<1x128xf32>
    %151 = vector.broadcast %150 : vector<1x128xf32> to vector<8x128xf32>
    %152 = arith.addf %148, %151 : vector<8x128xf32>
    %153 = arith.mulf %141, %152 : vector<8x128xf32>
    %154 = arith.addf %147, %153 : vector<8x128xf32>
    %155 = math.tanh %154 : vector<8x128xf32>
    %cst_82 = arith.constant 1.000000e+00 : f32
    %156 = vector.broadcast %cst_82 : f32 to vector<8x128xf32>
    %157 = arith.subf %156, %142 : vector<8x128xf32>
    %158 = arith.mulf %157, %155 : vector<8x128xf32>
    %159 = arith.mulf %142, %86 : vector<8x128xf32>
    %160 = arith.addf %158, %159 : vector<8x128xf32>
    %c16 = arith.constant 16 : index
    %c0_83 = arith.constant 0 : index
    %161 = vector.load %arg11[%c16, %c0_83] : memref<64x384xf32, #tpu.memory_space<vmem>>, vector<8x384xf32>
    %c0_84 = arith.constant 0 : index
    %c0_85 = arith.constant 0 : index
    %c0_86 = arith.constant 0 : index
    %162 = vector.load %arg6[%c0_84, %c0_85, %c0_86] : memref<2x128x384xf32, #tpu.memory_space<vmem>>, vector<1x128x384xf32>
    %163 = vector.shape_cast %162 : vector<1x128x384xf32> to vector<128x384xf32>
    %cst_87 = arith.constant dense<0.000000e+00> : vector<8x384xf32>
    %164 = tpu.matmul %122, %163, %cst_87 {dimension_numbers = #tpu.dot_dimension_numbers<[1], [0], [0], [1], [0, 0, 1, 1], [], []>} : vector<8x128xf32>, vector<128x384xf32>, vector<8x384xf32> -> vector<8x384xf32>
    %165 = vector.extract_strided_slice %161 {offsets = [0, 0], sizes = [8, 256], strides = [1, 1]} : vector<8x384xf32> to vector<8x256xf32>
    %166 = vector.extract_strided_slice %164 {offsets = [0, 0], sizes = [8, 256], strides = [1, 1]} : vector<8x384xf32> to vector<8x256xf32>
    %167 = arith.addf %165, %166 : vector<8x256xf32>
    %c0_88 = arith.constant 0 : index
    %c0_89 = arith.constant 0 : index
    %c0_90 = arith.constant 0 : index
    %168 = vector.load %arg7[%c0_88, %c0_89, %c0_90] : memref<2x1x256xf32, #tpu.memory_space<vmem>>, vector<1x1x256xf32>
    %169 = vector.shape_cast %168 : vector<1x1x256xf32> to vector<1x256xf32>
    %170 = vector.broadcast %169 : vector<1x256xf32> to vector<8x256xf32>
    %171 = arith.addf %167, %170 : vector<8x256xf32>
    %172 = arith.negf %171 : vector<8x256xf32>
    %173 = math.exp %172 : vector<8x256xf32>
    %cst_91 = arith.constant 1.000000e+00 : f32
    %174 = vector.broadcast %cst_91 : f32 to vector<8x256xf32>
    %175 = arith.addf %174, %173 : vector<8x256xf32>
    %176 = arith.divf %174, %175 : vector<8x256xf32>
    %177 = vector.extract_strided_slice %176 {offsets = [0, 0], sizes = [8, 128], strides = [1, 1]} : vector<8x256xf32> to vector<8x128xf32>
    %178 = vector.extract_strided_slice %176 {offsets = [0, 128], sizes = [8, 128], strides = [1, 1]} : vector<8x256xf32> to vector<8x128xf32>
    %179 = vector.extract_strided_slice %161 {offsets = [0, 256], sizes = [8, 128], strides = [1, 1]} : vector<8x384xf32> to vector<8x128xf32>
    %c0_92 = arith.constant 0 : index
    %c0_93 = arith.constant 0 : index
    %c0_94 = arith.constant 0 : index
    %180 = vector.load %arg8[%c0_92, %c0_93, %c0_94] : memref<2x1x128xf32, #tpu.memory_space<vmem>>, vector<1x1x128xf32>
    %181 = vector.shape_cast %180 : vector<1x1x128xf32> to vector<1x128xf32>
    %182 = vector.broadcast %181 : vector<1x128xf32> to vector<8x128xf32>
    %183 = arith.addf %179, %182 : vector<8x128xf32>
    %184 = vector.extract_strided_slice %164 {offsets = [0, 256], sizes = [8, 128], strides = [1, 1]} : vector<8x384xf32> to vector<8x128xf32>
    %c0_95 = arith.constant 0 : index
    %c0_96 = arith.constant 0 : index
    %c0_97 = arith.constant 0 : index
    %185 = vector.load %arg9[%c0_95, %c0_96, %c0_97] : memref<2x1x128xf32, #tpu.memory_space<vmem>>, vector<1x1x128xf32>
    %186 = vector.shape_cast %185 : vector<1x1x128xf32> to vector<1x128xf32>
    %187 = vector.broadcast %186 : vector<1x128xf32> to vector<8x128xf32>
    %188 = arith.addf %184, %187 : vector<8x128xf32>
    %189 = arith.mulf %177, %188 : vector<8x128xf32>
    %190 = arith.addf %183, %189 : vector<8x128xf32>
    %191 = math.tanh %190 : vector<8x128xf32>
    %cst_98 = arith.constant 1.000000e+00 : f32
    %192 = vector.broadcast %cst_98 : f32 to vector<8x128xf32>
    %193 = arith.subf %192, %178 : vector<8x128xf32>
    %194 = arith.mulf %193, %191 : vector<8x128xf32>
    %195 = arith.mulf %178, %122 : vector<8x128xf32>
    %196 = arith.addf %194, %195 : vector<8x128xf32>
    %c0_99 = arith.constant 0 : index
    %c0_100 = arith.constant 0 : index
    %c0_101 = arith.constant 0 : index
    %197 = vector.load %arg5[%c0_99, %c0_100, %c0_101] : memref<1x128x384xf32, #tpu.memory_space<vmem>>, vector<1x128x384xf32>
    %198 = vector.shape_cast %197 : vector<1x128x384xf32> to vector<128x384xf32>
    %cst_102 = arith.constant dense<0.000000e+00> : vector<8x384xf32>
    %199 = tpu.matmul %196, %198, %cst_102 {dimension_numbers = #tpu.dot_dimension_numbers<[1], [0], [0], [1], [0, 0, 1, 1], [], []>} : vector<8x128xf32>, vector<128x384xf32>, vector<8x384xf32> -> vector<8x384xf32>
    %c1_103 = arith.constant 1 : index
    %c0_104 = arith.constant 0 : index
    %c0_105 = arith.constant 0 : index
    %200 = vector.load %arg6[%c1_103, %c0_104, %c0_105] : memref<2x128x384xf32, #tpu.memory_space<vmem>>, vector<1x128x384xf32>
    %201 = vector.shape_cast %200 : vector<1x128x384xf32> to vector<128x384xf32>
    %cst_106 = arith.constant dense<0.000000e+00> : vector<8x384xf32>
    %202 = tpu.matmul %160, %201, %cst_106 {dimension_numbers = #tpu.dot_dimension_numbers<[1], [0], [0], [1], [0, 0, 1, 1], [], []>} : vector<8x128xf32>, vector<128x384xf32>, vector<8x384xf32> -> vector<8x384xf32>
    %203 = vector.extract_strided_slice %199 {offsets = [0, 0], sizes = [8, 256], strides = [1, 1]} : vector<8x384xf32> to vector<8x256xf32>
    %204 = vector.extract_strided_slice %202 {offsets = [0, 0], sizes = [8, 256], strides = [1, 1]} : vector<8x384xf32> to vector<8x256xf32>
    %205 = arith.addf %203, %204 : vector<8x256xf32>
    %c1_107 = arith.constant 1 : index
    %c0_108 = arith.constant 0 : index
    %c0_109 = arith.constant 0 : index
    %206 = vector.load %arg7[%c1_107, %c0_108, %c0_109] : memref<2x1x256xf32, #tpu.memory_space<vmem>>, vector<1x1x256xf32>
    %207 = vector.shape_cast %206 : vector<1x1x256xf32> to vector<1x256xf32>
    %208 = vector.broadcast %207 : vector<1x256xf32> to vector<8x256xf32>
    %209 = arith.addf %205, %208 : vector<8x256xf32>
    %210 = arith.negf %209 : vector<8x256xf32>
    %211 = math.exp %210 : vector<8x256xf32>
    %cst_110 = arith.constant 1.000000e+00 : f32
    %212 = vector.broadcast %cst_110 : f32 to vector<8x256xf32>
    %213 = arith.addf %212, %211 : vector<8x256xf32>
    %214 = arith.divf %212, %213 : vector<8x256xf32>
    %215 = vector.extract_strided_slice %214 {offsets = [0, 0], sizes = [8, 128], strides = [1, 1]} : vector<8x256xf32> to vector<8x128xf32>
    %216 = vector.extract_strided_slice %214 {offsets = [0, 128], sizes = [8, 128], strides = [1, 1]} : vector<8x256xf32> to vector<8x128xf32>
    %217 = vector.extract_strided_slice %199 {offsets = [0, 256], sizes = [8, 128], strides = [1, 1]} : vector<8x384xf32> to vector<8x128xf32>
    %c1_111 = arith.constant 1 : index
    %c0_112 = arith.constant 0 : index
    %c0_113 = arith.constant 0 : index
    %218 = vector.load %arg8[%c1_111, %c0_112, %c0_113] : memref<2x1x128xf32, #tpu.memory_space<vmem>>, vector<1x1x128xf32>
    %219 = vector.shape_cast %218 : vector<1x1x128xf32> to vector<1x128xf32>
    %220 = vector.broadcast %219 : vector<1x128xf32> to vector<8x128xf32>
    %221 = arith.addf %217, %220 : vector<8x128xf32>
    %222 = vector.extract_strided_slice %202 {offsets = [0, 256], sizes = [8, 128], strides = [1, 1]} : vector<8x384xf32> to vector<8x128xf32>
    %c1_114 = arith.constant 1 : index
    %c0_115 = arith.constant 0 : index
    %c0_116 = arith.constant 0 : index
    %223 = vector.load %arg9[%c1_114, %c0_115, %c0_116] : memref<2x1x128xf32, #tpu.memory_space<vmem>>, vector<1x1x128xf32>
    %224 = vector.shape_cast %223 : vector<1x1x128xf32> to vector<1x128xf32>
    %225 = vector.broadcast %224 : vector<1x128xf32> to vector<8x128xf32>
    %226 = arith.addf %222, %225 : vector<8x128xf32>
    %227 = arith.mulf %215, %226 : vector<8x128xf32>
    %228 = arith.addf %221, %227 : vector<8x128xf32>
    %229 = math.tanh %228 : vector<8x128xf32>
    %cst_117 = arith.constant 1.000000e+00 : f32
    %230 = vector.broadcast %cst_117 : f32 to vector<8x128xf32>
    %231 = arith.subf %230, %216 : vector<8x128xf32>
    %232 = arith.mulf %231, %229 : vector<8x128xf32>
    %233 = arith.mulf %216, %160 : vector<8x128xf32>
    %234 = arith.addf %232, %233 : vector<8x128xf32>
    %c24 = arith.constant 24 : index
    %c0_118 = arith.constant 0 : index
    %235 = vector.load %arg11[%c24, %c0_118] : memref<64x384xf32, #tpu.memory_space<vmem>>, vector<8x384xf32>
    %c0_119 = arith.constant 0 : index
    %c0_120 = arith.constant 0 : index
    %c0_121 = arith.constant 0 : index
    %236 = vector.load %arg6[%c0_119, %c0_120, %c0_121] : memref<2x128x384xf32, #tpu.memory_space<vmem>>, vector<1x128x384xf32>
    %237 = vector.shape_cast %236 : vector<1x128x384xf32> to vector<128x384xf32>
    %cst_122 = arith.constant dense<0.000000e+00> : vector<8x384xf32>
    %238 = tpu.matmul %196, %237, %cst_122 {dimension_numbers = #tpu.dot_dimension_numbers<[1], [0], [0], [1], [0, 0, 1, 1], [], []>} : vector<8x128xf32>, vector<128x384xf32>, vector<8x384xf32> -> vector<8x384xf32>
    %239 = vector.extract_strided_slice %235 {offsets = [0, 0], sizes = [8, 256], strides = [1, 1]} : vector<8x384xf32> to vector<8x256xf32>
    %240 = vector.extract_strided_slice %238 {offsets = [0, 0], sizes = [8, 256], strides = [1, 1]} : vector<8x384xf32> to vector<8x256xf32>
    %241 = arith.addf %239, %240 : vector<8x256xf32>
    %c0_123 = arith.constant 0 : index
    %c0_124 = arith.constant 0 : index
    %c0_125 = arith.constant 0 : index
    %242 = vector.load %arg7[%c0_123, %c0_124, %c0_125] : memref<2x1x256xf32, #tpu.memory_space<vmem>>, vector<1x1x256xf32>
    %243 = vector.shape_cast %242 : vector<1x1x256xf32> to vector<1x256xf32>
    %244 = vector.broadcast %243 : vector<1x256xf32> to vector<8x256xf32>
    %245 = arith.addf %241, %244 : vector<8x256xf32>
    %246 = arith.negf %245 : vector<8x256xf32>
    %247 = math.exp %246 : vector<8x256xf32>
    %cst_126 = arith.constant 1.000000e+00 : f32
    %248 = vector.broadcast %cst_126 : f32 to vector<8x256xf32>
    %249 = arith.addf %248, %247 : vector<8x256xf32>
    %250 = arith.divf %248, %249 : vector<8x256xf32>
    %251 = vector.extract_strided_slice %250 {offsets = [0, 0], sizes = [8, 128], strides = [1, 1]} : vector<8x256xf32> to vector<8x128xf32>
    %252 = vector.extract_strided_slice %250 {offsets = [0, 128], sizes = [8, 128], strides = [1, 1]} : vector<8x256xf32> to vector<8x128xf32>
    %253 = vector.extract_strided_slice %235 {offsets = [0, 256], sizes = [8, 128], strides = [1, 1]} : vector<8x384xf32> to vector<8x128xf32>
    %c0_127 = arith.constant 0 : index
    %c0_128 = arith.constant 0 : index
    %c0_129 = arith.constant 0 : index
    %254 = vector.load %arg8[%c0_127, %c0_128, %c0_129] : memref<2x1x128xf32, #tpu.memory_space<vmem>>, vector<1x1x128xf32>
    %255 = vector.shape_cast %254 : vector<1x1x128xf32> to vector<1x128xf32>
    %256 = vector.broadcast %255 : vector<1x128xf32> to vector<8x128xf32>
    %257 = arith.addf %253, %256 : vector<8x128xf32>
    %258 = vector.extract_strided_slice %238 {offsets = [0, 256], sizes = [8, 128], strides = [1, 1]} : vector<8x384xf32> to vector<8x128xf32>
    %c0_130 = arith.constant 0 : index
    %c0_131 = arith.constant 0 : index
    %c0_132 = arith.constant 0 : index
    %259 = vector.load %arg9[%c0_130, %c0_131, %c0_132] : memref<2x1x128xf32, #tpu.memory_space<vmem>>, vector<1x1x128xf32>
    %260 = vector.shape_cast %259 : vector<1x1x128xf32> to vector<1x128xf32>
    %261 = vector.broadcast %260 : vector<1x128xf32> to vector<8x128xf32>
    %262 = arith.addf %258, %261 : vector<8x128xf32>
    %263 = arith.mulf %251, %262 : vector<8x128xf32>
    %264 = arith.addf %257, %263 : vector<8x128xf32>
    %265 = math.tanh %264 : vector<8x128xf32>
    %cst_133 = arith.constant 1.000000e+00 : f32
    %266 = vector.broadcast %cst_133 : f32 to vector<8x128xf32>
    %267 = arith.subf %266, %252 : vector<8x128xf32>
    %268 = arith.mulf %267, %265 : vector<8x128xf32>
    %269 = arith.mulf %252, %196 : vector<8x128xf32>
    %270 = arith.addf %268, %269 : vector<8x128xf32>
    %c0_134 = arith.constant 0 : index
    %c0_135 = arith.constant 0 : index
    %c0_136 = arith.constant 0 : index
    %271 = vector.load %arg5[%c0_134, %c0_135, %c0_136] : memref<1x128x384xf32, #tpu.memory_space<vmem>>, vector<1x128x384xf32>
    %272 = vector.shape_cast %271 : vector<1x128x384xf32> to vector<128x384xf32>
    %cst_137 = arith.constant dense<0.000000e+00> : vector<8x384xf32>
    %273 = tpu.matmul %270, %272, %cst_137 {dimension_numbers = #tpu.dot_dimension_numbers<[1], [0], [0], [1], [0, 0, 1, 1], [], []>} : vector<8x128xf32>, vector<128x384xf32>, vector<8x384xf32> -> vector<8x384xf32>
    %c1_138 = arith.constant 1 : index
    %c0_139 = arith.constant 0 : index
    %c0_140 = arith.constant 0 : index
    %274 = vector.load %arg6[%c1_138, %c0_139, %c0_140] : memref<2x128x384xf32, #tpu.memory_space<vmem>>, vector<1x128x384xf32>
    %275 = vector.shape_cast %274 : vector<1x128x384xf32> to vector<128x384xf32>
    %cst_141 = arith.constant dense<0.000000e+00> : vector<8x384xf32>
    %276 = tpu.matmul %234, %275, %cst_141 {dimension_numbers = #tpu.dot_dimension_numbers<[1], [0], [0], [1], [0, 0, 1, 1], [], []>} : vector<8x128xf32>, vector<128x384xf32>, vector<8x384xf32> -> vector<8x384xf32>
    %277 = vector.extract_strided_slice %273 {offsets = [0, 0], sizes = [8, 256], strides = [1, 1]} : vector<8x384xf32> to vector<8x256xf32>
    %278 = vector.extract_strided_slice %276 {offsets = [0, 0], sizes = [8, 256], strides = [1, 1]} : vector<8x384xf32> to vector<8x256xf32>
    %279 = arith.addf %277, %278 : vector<8x256xf32>
    %c1_142 = arith.constant 1 : index
    %c0_143 = arith.constant 0 : index
    %c0_144 = arith.constant 0 : index
    %280 = vector.load %arg7[%c1_142, %c0_143, %c0_144] : memref<2x1x256xf32, #tpu.memory_space<vmem>>, vector<1x1x256xf32>
    %281 = vector.shape_cast %280 : vector<1x1x256xf32> to vector<1x256xf32>
    %282 = vector.broadcast %281 : vector<1x256xf32> to vector<8x256xf32>
    %283 = arith.addf %279, %282 : vector<8x256xf32>
    %284 = arith.negf %283 : vector<8x256xf32>
    %285 = math.exp %284 : vector<8x256xf32>
    %cst_145 = arith.constant 1.000000e+00 : f32
    %286 = vector.broadcast %cst_145 : f32 to vector<8x256xf32>
    %287 = arith.addf %286, %285 : vector<8x256xf32>
    %288 = arith.divf %286, %287 : vector<8x256xf32>
    %289 = vector.extract_strided_slice %288 {offsets = [0, 0], sizes = [8, 128], strides = [1, 1]} : vector<8x256xf32> to vector<8x128xf32>
    %290 = vector.extract_strided_slice %288 {offsets = [0, 128], sizes = [8, 128], strides = [1, 1]} : vector<8x256xf32> to vector<8x128xf32>
    %291 = vector.extract_strided_slice %273 {offsets = [0, 256], sizes = [8, 128], strides = [1, 1]} : vector<8x384xf32> to vector<8x128xf32>
    %c1_146 = arith.constant 1 : index
    %c0_147 = arith.constant 0 : index
    %c0_148 = arith.constant 0 : index
    %292 = vector.load %arg8[%c1_146, %c0_147, %c0_148] : memref<2x1x128xf32, #tpu.memory_space<vmem>>, vector<1x1x128xf32>
    %293 = vector.shape_cast %292 : vector<1x1x128xf32> to vector<1x128xf32>
    %294 = vector.broadcast %293 : vector<1x128xf32> to vector<8x128xf32>
    %295 = arith.addf %291, %294 : vector<8x128xf32>
    %296 = vector.extract_strided_slice %276 {offsets = [0, 256], sizes = [8, 128], strides = [1, 1]} : vector<8x384xf32> to vector<8x128xf32>
    %c1_149 = arith.constant 1 : index
    %c0_150 = arith.constant 0 : index
    %c0_151 = arith.constant 0 : index
    %297 = vector.load %arg9[%c1_149, %c0_150, %c0_151] : memref<2x1x128xf32, #tpu.memory_space<vmem>>, vector<1x1x128xf32>
    %298 = vector.shape_cast %297 : vector<1x1x128xf32> to vector<1x128xf32>
    %299 = vector.broadcast %298 : vector<1x128xf32> to vector<8x128xf32>
    %300 = arith.addf %296, %299 : vector<8x128xf32>
    %301 = arith.mulf %289, %300 : vector<8x128xf32>
    %302 = arith.addf %295, %301 : vector<8x128xf32>
    %303 = math.tanh %302 : vector<8x128xf32>
    %cst_152 = arith.constant 1.000000e+00 : f32
    %304 = vector.broadcast %cst_152 : f32 to vector<8x128xf32>
    %305 = arith.subf %304, %290 : vector<8x128xf32>
    %306 = arith.mulf %305, %303 : vector<8x128xf32>
    %307 = arith.mulf %290, %234 : vector<8x128xf32>
    %308 = arith.addf %306, %307 : vector<8x128xf32>
    %c32 = arith.constant 32 : index
    %c0_153 = arith.constant 0 : index
    %309 = vector.load %arg11[%c32, %c0_153] : memref<64x384xf32, #tpu.memory_space<vmem>>, vector<8x384xf32>
    %c0_154 = arith.constant 0 : index
    %c0_155 = arith.constant 0 : index
    %c0_156 = arith.constant 0 : index
    %310 = vector.load %arg6[%c0_154, %c0_155, %c0_156] : memref<2x128x384xf32, #tpu.memory_space<vmem>>, vector<1x128x384xf32>
    %311 = vector.shape_cast %310 : vector<1x128x384xf32> to vector<128x384xf32>
    %cst_157 = arith.constant dense<0.000000e+00> : vector<8x384xf32>
    %312 = tpu.matmul %270, %311, %cst_157 {dimension_numbers = #tpu.dot_dimension_numbers<[1], [0], [0], [1], [0, 0, 1, 1], [], []>} : vector<8x128xf32>, vector<128x384xf32>, vector<8x384xf32> -> vector<8x384xf32>
    %313 = vector.extract_strided_slice %309 {offsets = [0, 0], sizes = [8, 256], strides = [1, 1]} : vector<8x384xf32> to vector<8x256xf32>
    %314 = vector.extract_strided_slice %312 {offsets = [0, 0], sizes = [8, 256], strides = [1, 1]} : vector<8x384xf32> to vector<8x256xf32>
    %315 = arith.addf %313, %314 : vector<8x256xf32>
    %c0_158 = arith.constant 0 : index
    %c0_159 = arith.constant 0 : index
    %c0_160 = arith.constant 0 : index
    %316 = vector.load %arg7[%c0_158, %c0_159, %c0_160] : memref<2x1x256xf32, #tpu.memory_space<vmem>>, vector<1x1x256xf32>
    %317 = vector.shape_cast %316 : vector<1x1x256xf32> to vector<1x256xf32>
    %318 = vector.broadcast %317 : vector<1x256xf32> to vector<8x256xf32>
    %319 = arith.addf %315, %318 : vector<8x256xf32>
    %320 = arith.negf %319 : vector<8x256xf32>
    %321 = math.exp %320 : vector<8x256xf32>
    %cst_161 = arith.constant 1.000000e+00 : f32
    %322 = vector.broadcast %cst_161 : f32 to vector<8x256xf32>
    %323 = arith.addf %322, %321 : vector<8x256xf32>
    %324 = arith.divf %322, %323 : vector<8x256xf32>
    %325 = vector.extract_strided_slice %324 {offsets = [0, 0], sizes = [8, 128], strides = [1, 1]} : vector<8x256xf32> to vector<8x128xf32>
    %326 = vector.extract_strided_slice %324 {offsets = [0, 128], sizes = [8, 128], strides = [1, 1]} : vector<8x256xf32> to vector<8x128xf32>
    %327 = vector.extract_strided_slice %309 {offsets = [0, 256], sizes = [8, 128], strides = [1, 1]} : vector<8x384xf32> to vector<8x128xf32>
    %c0_162 = arith.constant 0 : index
    %c0_163 = arith.constant 0 : index
    %c0_164 = arith.constant 0 : index
    %328 = vector.load %arg8[%c0_162, %c0_163, %c0_164] : memref<2x1x128xf32, #tpu.memory_space<vmem>>, vector<1x1x128xf32>
    %329 = vector.shape_cast %328 : vector<1x1x128xf32> to vector<1x128xf32>
    %330 = vector.broadcast %329 : vector<1x128xf32> to vector<8x128xf32>
    %331 = arith.addf %327, %330 : vector<8x128xf32>
    %332 = vector.extract_strided_slice %312 {offsets = [0, 256], sizes = [8, 128], strides = [1, 1]} : vector<8x384xf32> to vector<8x128xf32>
    %c0_165 = arith.constant 0 : index
    %c0_166 = arith.constant 0 : index
    %c0_167 = arith.constant 0 : index
    %333 = vector.load %arg9[%c0_165, %c0_166, %c0_167] : memref<2x1x128xf32, #tpu.memory_space<vmem>>, vector<1x1x128xf32>
    %334 = vector.shape_cast %333 : vector<1x1x128xf32> to vector<1x128xf32>
    %335 = vector.broadcast %334 : vector<1x128xf32> to vector<8x128xf32>
    %336 = arith.addf %332, %335 : vector<8x128xf32>
    %337 = arith.mulf %325, %336 : vector<8x128xf32>
    %338 = arith.addf %331, %337 : vector<8x128xf32>
    %339 = math.tanh %338 : vector<8x128xf32>
    %cst_168 = arith.constant 1.000000e+00 : f32
    %340 = vector.broadcast %cst_168 : f32 to vector<8x128xf32>
    %341 = arith.subf %340, %326 : vector<8x128xf32>
    %342 = arith.mulf %341, %339 : vector<8x128xf32>
    %343 = arith.mulf %326, %270 : vector<8x128xf32>
    %344 = arith.addf %342, %343 : vector<8x128xf32>
    %c0_169 = arith.constant 0 : index
    %c0_170 = arith.constant 0 : index
    %c0_171 = arith.constant 0 : index
    %345 = vector.load %arg5[%c0_169, %c0_170, %c0_171] : memref<1x128x384xf32, #tpu.memory_space<vmem>>, vector<1x128x384xf32>
    %346 = vector.shape_cast %345 : vector<1x128x384xf32> to vector<128x384xf32>
    %cst_172 = arith.constant dense<0.000000e+00> : vector<8x384xf32>
    %347 = tpu.matmul %344, %346, %cst_172 {dimension_numbers = #tpu.dot_dimension_numbers<[1], [0], [0], [1], [0, 0, 1, 1], [], []>} : vector<8x128xf32>, vector<128x384xf32>, vector<8x384xf32> -> vector<8x384xf32>
    %c1_173 = arith.constant 1 : index
    %c0_174 = arith.constant 0 : index
    %c0_175 = arith.constant 0 : index
    %348 = vector.load %arg6[%c1_173, %c0_174, %c0_175] : memref<2x128x384xf32, #tpu.memory_space<vmem>>, vector<1x128x384xf32>
    %349 = vector.shape_cast %348 : vector<1x128x384xf32> to vector<128x384xf32>
    %cst_176 = arith.constant dense<0.000000e+00> : vector<8x384xf32>
    %350 = tpu.matmul %308, %349, %cst_176 {dimension_numbers = #tpu.dot_dimension_numbers<[1], [0], [0], [1], [0, 0, 1, 1], [], []>} : vector<8x128xf32>, vector<128x384xf32>, vector<8x384xf32> -> vector<8x384xf32>
    %351 = vector.extract_strided_slice %347 {offsets = [0, 0], sizes = [8, 256], strides = [1, 1]} : vector<8x384xf32> to vector<8x256xf32>
    %352 = vector.extract_strided_slice %350 {offsets = [0, 0], sizes = [8, 256], strides = [1, 1]} : vector<8x384xf32> to vector<8x256xf32>
    %353 = arith.addf %351, %352 : vector<8x256xf32>
    %c1_177 = arith.constant 1 : index
    %c0_178 = arith.constant 0 : index
    %c0_179 = arith.constant 0 : index
    %354 = vector.load %arg7[%c1_177, %c0_178, %c0_179] : memref<2x1x256xf32, #tpu.memory_space<vmem>>, vector<1x1x256xf32>
    %355 = vector.shape_cast %354 : vector<1x1x256xf32> to vector<1x256xf32>
    %356 = vector.broadcast %355 : vector<1x256xf32> to vector<8x256xf32>
    %357 = arith.addf %353, %356 : vector<8x256xf32>
    %358 = arith.negf %357 : vector<8x256xf32>
    %359 = math.exp %358 : vector<8x256xf32>
    %cst_180 = arith.constant 1.000000e+00 : f32
    %360 = vector.broadcast %cst_180 : f32 to vector<8x256xf32>
    %361 = arith.addf %360, %359 : vector<8x256xf32>
    %362 = arith.divf %360, %361 : vector<8x256xf32>
    %363 = vector.extract_strided_slice %362 {offsets = [0, 0], sizes = [8, 128], strides = [1, 1]} : vector<8x256xf32> to vector<8x128xf32>
    %364 = vector.extract_strided_slice %362 {offsets = [0, 128], sizes = [8, 128], strides = [1, 1]} : vector<8x256xf32> to vector<8x128xf32>
    %365 = vector.extract_strided_slice %347 {offsets = [0, 256], sizes = [8, 128], strides = [1, 1]} : vector<8x384xf32> to vector<8x128xf32>
    %c1_181 = arith.constant 1 : index
    %c0_182 = arith.constant 0 : index
    %c0_183 = arith.constant 0 : index
    %366 = vector.load %arg8[%c1_181, %c0_182, %c0_183] : memref<2x1x128xf32, #tpu.memory_space<vmem>>, vector<1x1x128xf32>
    %367 = vector.shape_cast %366 : vector<1x1x128xf32> to vector<1x128xf32>
    %368 = vector.broadcast %367 : vector<1x128xf32> to vector<8x128xf32>
    %369 = arith.addf %365, %368 : vector<8x128xf32>
    %370 = vector.extract_strided_slice %350 {offsets = [0, 256], sizes = [8, 128], strides = [1, 1]} : vector<8x384xf32> to vector<8x128xf32>
    %c1_184 = arith.constant 1 : index
    %c0_185 = arith.constant 0 : index
    %c0_186 = arith.constant 0 : index
    %371 = vector.load %arg9[%c1_184, %c0_185, %c0_186] : memref<2x1x128xf32, #tpu.memory_space<vmem>>, vector<1x1x128xf32>
    %372 = vector.shape_cast %371 : vector<1x1x128xf32> to vector<1x128xf32>
    %373 = vector.broadcast %372 : vector<1x128xf32> to vector<8x128xf32>
    %374 = arith.addf %370, %373 : vector<8x128xf32>
    %375 = arith.mulf %363, %374 : vector<8x128xf32>
    %376 = arith.addf %369, %375 : vector<8x128xf32>
    %377 = math.tanh %376 : vector<8x128xf32>
    %cst_187 = arith.constant 1.000000e+00 : f32
    %378 = vector.broadcast %cst_187 : f32 to vector<8x128xf32>
    %379 = arith.subf %378, %364 : vector<8x128xf32>
    %380 = arith.mulf %379, %377 : vector<8x128xf32>
    %381 = arith.mulf %364, %308 : vector<8x128xf32>
    %382 = arith.addf %380, %381 : vector<8x128xf32>
    %c40 = arith.constant 40 : index
    %c0_188 = arith.constant 0 : index
    %383 = vector.load %arg11[%c40, %c0_188] : memref<64x384xf32, #tpu.memory_space<vmem>>, vector<8x384xf32>
    %c0_189 = arith.constant 0 : index
    %c0_190 = arith.constant 0 : index
    %c0_191 = arith.constant 0 : index
    %384 = vector.load %arg6[%c0_189, %c0_190, %c0_191] : memref<2x128x384xf32, #tpu.memory_space<vmem>>, vector<1x128x384xf32>
    %385 = vector.shape_cast %384 : vector<1x128x384xf32> to vector<128x384xf32>
    %cst_192 = arith.constant dense<0.000000e+00> : vector<8x384xf32>
    %386 = tpu.matmul %344, %385, %cst_192 {dimension_numbers = #tpu.dot_dimension_numbers<[1], [0], [0], [1], [0, 0, 1, 1], [], []>} : vector<8x128xf32>, vector<128x384xf32>, vector<8x384xf32> -> vector<8x384xf32>
    %387 = vector.extract_strided_slice %383 {offsets = [0, 0], sizes = [8, 256], strides = [1, 1]} : vector<8x384xf32> to vector<8x256xf32>
    %388 = vector.extract_strided_slice %386 {offsets = [0, 0], sizes = [8, 256], strides = [1, 1]} : vector<8x384xf32> to vector<8x256xf32>
    %389 = arith.addf %387, %388 : vector<8x256xf32>
    %c0_193 = arith.constant 0 : index
    %c0_194 = arith.constant 0 : index
    %c0_195 = arith.constant 0 : index
    %390 = vector.load %arg7[%c0_193, %c0_194, %c0_195] : memref<2x1x256xf32, #tpu.memory_space<vmem>>, vector<1x1x256xf32>
    %391 = vector.shape_cast %390 : vector<1x1x256xf32> to vector<1x256xf32>
    %392 = vector.broadcast %391 : vector<1x256xf32> to vector<8x256xf32>
    %393 = arith.addf %389, %392 : vector<8x256xf32>
    %394 = arith.negf %393 : vector<8x256xf32>
    %395 = math.exp %394 : vector<8x256xf32>
    %cst_196 = arith.constant 1.000000e+00 : f32
    %396 = vector.broadcast %cst_196 : f32 to vector<8x256xf32>
    %397 = arith.addf %396, %395 : vector<8x256xf32>
    %398 = arith.divf %396, %397 : vector<8x256xf32>
    %399 = vector.extract_strided_slice %398 {offsets = [0, 0], sizes = [8, 128], strides = [1, 1]} : vector<8x256xf32> to vector<8x128xf32>
    %400 = vector.extract_strided_slice %398 {offsets = [0, 128], sizes = [8, 128], strides = [1, 1]} : vector<8x256xf32> to vector<8x128xf32>
    %401 = vector.extract_strided_slice %383 {offsets = [0, 256], sizes = [8, 128], strides = [1, 1]} : vector<8x384xf32> to vector<8x128xf32>
    %c0_197 = arith.constant 0 : index
    %c0_198 = arith.constant 0 : index
    %c0_199 = arith.constant 0 : index
    %402 = vector.load %arg8[%c0_197, %c0_198, %c0_199] : memref<2x1x128xf32, #tpu.memory_space<vmem>>, vector<1x1x128xf32>
    %403 = vector.shape_cast %402 : vector<1x1x128xf32> to vector<1x128xf32>
    %404 = vector.broadcast %403 : vector<1x128xf32> to vector<8x128xf32>
    %405 = arith.addf %401, %404 : vector<8x128xf32>
    %406 = vector.extract_strided_slice %386 {offsets = [0, 256], sizes = [8, 128], strides = [1, 1]} : vector<8x384xf32> to vector<8x128xf32>
    %c0_200 = arith.constant 0 : index
    %c0_201 = arith.constant 0 : index
    %c0_202 = arith.constant 0 : index
    %407 = vector.load %arg9[%c0_200, %c0_201, %c0_202] : memref<2x1x128xf32, #tpu.memory_space<vmem>>, vector<1x1x128xf32>
    %408 = vector.shape_cast %407 : vector<1x1x128xf32> to vector<1x128xf32>
    %409 = vector.broadcast %408 : vector<1x128xf32> to vector<8x128xf32>
    %410 = arith.addf %406, %409 : vector<8x128xf32>
    %411 = arith.mulf %399, %410 : vector<8x128xf32>
    %412 = arith.addf %405, %411 : vector<8x128xf32>
    %413 = math.tanh %412 : vector<8x128xf32>
    %cst_203 = arith.constant 1.000000e+00 : f32
    %414 = vector.broadcast %cst_203 : f32 to vector<8x128xf32>
    %415 = arith.subf %414, %400 : vector<8x128xf32>
    %416 = arith.mulf %415, %413 : vector<8x128xf32>
    %417 = arith.mulf %400, %344 : vector<8x128xf32>
    %418 = arith.addf %416, %417 : vector<8x128xf32>
    %c0_204 = arith.constant 0 : index
    %c0_205 = arith.constant 0 : index
    %c0_206 = arith.constant 0 : index
    %419 = vector.load %arg5[%c0_204, %c0_205, %c0_206] : memref<1x128x384xf32, #tpu.memory_space<vmem>>, vector<1x128x384xf32>
    %420 = vector.shape_cast %419 : vector<1x128x384xf32> to vector<128x384xf32>
    %cst_207 = arith.constant dense<0.000000e+00> : vector<8x384xf32>
    %421 = tpu.matmul %418, %420, %cst_207 {dimension_numbers = #tpu.dot_dimension_numbers<[1], [0], [0], [1], [0, 0, 1, 1], [], []>} : vector<8x128xf32>, vector<128x384xf32>, vector<8x384xf32> -> vector<8x384xf32>
    %c1_208 = arith.constant 1 : index
    %c0_209 = arith.constant 0 : index
    %c0_210 = arith.constant 0 : index
    %422 = vector.load %arg6[%c1_208, %c0_209, %c0_210] : memref<2x128x384xf32, #tpu.memory_space<vmem>>, vector<1x128x384xf32>
    %423 = vector.shape_cast %422 : vector<1x128x384xf32> to vector<128x384xf32>
    %cst_211 = arith.constant dense<0.000000e+00> : vector<8x384xf32>
    %424 = tpu.matmul %382, %423, %cst_211 {dimension_numbers = #tpu.dot_dimension_numbers<[1], [0], [0], [1], [0, 0, 1, 1], [], []>} : vector<8x128xf32>, vector<128x384xf32>, vector<8x384xf32> -> vector<8x384xf32>
    %425 = vector.extract_strided_slice %421 {offsets = [0, 0], sizes = [8, 256], strides = [1, 1]} : vector<8x384xf32> to vector<8x256xf32>
    %426 = vector.extract_strided_slice %424 {offsets = [0, 0], sizes = [8, 256], strides = [1, 1]} : vector<8x384xf32> to vector<8x256xf32>
    %427 = arith.addf %425, %426 : vector<8x256xf32>
    %c1_212 = arith.constant 1 : index
    %c0_213 = arith.constant 0 : index
    %c0_214 = arith.constant 0 : index
    %428 = vector.load %arg7[%c1_212, %c0_213, %c0_214] : memref<2x1x256xf32, #tpu.memory_space<vmem>>, vector<1x1x256xf32>
    %429 = vector.shape_cast %428 : vector<1x1x256xf32> to vector<1x256xf32>
    %430 = vector.broadcast %429 : vector<1x256xf32> to vector<8x256xf32>
    %431 = arith.addf %427, %430 : vector<8x256xf32>
    %432 = arith.negf %431 : vector<8x256xf32>
    %433 = math.exp %432 : vector<8x256xf32>
    %cst_215 = arith.constant 1.000000e+00 : f32
    %434 = vector.broadcast %cst_215 : f32 to vector<8x256xf32>
    %435 = arith.addf %434, %433 : vector<8x256xf32>
    %436 = arith.divf %434, %435 : vector<8x256xf32>
    %437 = vector.extract_strided_slice %436 {offsets = [0, 0], sizes = [8, 128], strides = [1, 1]} : vector<8x256xf32> to vector<8x128xf32>
    %438 = vector.extract_strided_slice %436 {offsets = [0, 128], sizes = [8, 128], strides = [1, 1]} : vector<8x256xf32> to vector<8x128xf32>
    %439 = vector.extract_strided_slice %421 {offsets = [0, 256], sizes = [8, 128], strides = [1, 1]} : vector<8x384xf32> to vector<8x128xf32>
    %c1_216 = arith.constant 1 : index
    %c0_217 = arith.constant 0 : index
    %c0_218 = arith.constant 0 : index
    %440 = vector.load %arg8[%c1_216, %c0_217, %c0_218] : memref<2x1x128xf32, #tpu.memory_space<vmem>>, vector<1x1x128xf32>
    %441 = vector.shape_cast %440 : vector<1x1x128xf32> to vector<1x128xf32>
    %442 = vector.broadcast %441 : vector<1x128xf32> to vector<8x128xf32>
    %443 = arith.addf %439, %442 : vector<8x128xf32>
    %444 = vector.extract_strided_slice %424 {offsets = [0, 256], sizes = [8, 128], strides = [1, 1]} : vector<8x384xf32> to vector<8x128xf32>
    %c1_219 = arith.constant 1 : index
    %c0_220 = arith.constant 0 : index
    %c0_221 = arith.constant 0 : index
    %445 = vector.load %arg9[%c1_219, %c0_220, %c0_221] : memref<2x1x128xf32, #tpu.memory_space<vmem>>, vector<1x1x128xf32>
    %446 = vector.shape_cast %445 : vector<1x1x128xf32> to vector<1x128xf32>
    %447 = vector.broadcast %446 : vector<1x128xf32> to vector<8x128xf32>
    %448 = arith.addf %444, %447 : vector<8x128xf32>
    %449 = arith.mulf %437, %448 : vector<8x128xf32>
    %450 = arith.addf %443, %449 : vector<8x128xf32>
    %451 = math.tanh %450 : vector<8x128xf32>
    %cst_222 = arith.constant 1.000000e+00 : f32
    %452 = vector.broadcast %cst_222 : f32 to vector<8x128xf32>
    %453 = arith.subf %452, %438 : vector<8x128xf32>
    %454 = arith.mulf %453, %451 : vector<8x128xf32>
    %455 = arith.mulf %438, %382 : vector<8x128xf32>
    %456 = arith.addf %454, %455 : vector<8x128xf32>
    %c48 = arith.constant 48 : index
    %c0_223 = arith.constant 0 : index
    %457 = vector.load %arg11[%c48, %c0_223] : memref<64x384xf32, #tpu.memory_space<vmem>>, vector<8x384xf32>
    %c0_224 = arith.constant 0 : index
    %c0_225 = arith.constant 0 : index
    %c0_226 = arith.constant 0 : index
    %458 = vector.load %arg6[%c0_224, %c0_225, %c0_226] : memref<2x128x384xf32, #tpu.memory_space<vmem>>, vector<1x128x384xf32>
    %459 = vector.shape_cast %458 : vector<1x128x384xf32> to vector<128x384xf32>
    %cst_227 = arith.constant dense<0.000000e+00> : vector<8x384xf32>
    %460 = tpu.matmul %418, %459, %cst_227 {dimension_numbers = #tpu.dot_dimension_numbers<[1], [0], [0], [1], [0, 0, 1, 1], [], []>} : vector<8x128xf32>, vector<128x384xf32>, vector<8x384xf32> -> vector<8x384xf32>
    %461 = vector.extract_strided_slice %457 {offsets = [0, 0], sizes = [8, 256], strides = [1, 1]} : vector<8x384xf32> to vector<8x256xf32>
    %462 = vector.extract_strided_slice %460 {offsets = [0, 0], sizes = [8, 256], strides = [1, 1]} : vector<8x384xf32> to vector<8x256xf32>
    %463 = arith.addf %461, %462 : vector<8x256xf32>
    %c0_228 = arith.constant 0 : index
    %c0_229 = arith.constant 0 : index
    %c0_230 = arith.constant 0 : index
    %464 = vector.load %arg7[%c0_228, %c0_229, %c0_230] : memref<2x1x256xf32, #tpu.memory_space<vmem>>, vector<1x1x256xf32>
    %465 = vector.shape_cast %464 : vector<1x1x256xf32> to vector<1x256xf32>
    %466 = vector.broadcast %465 : vector<1x256xf32> to vector<8x256xf32>
    %467 = arith.addf %463, %466 : vector<8x256xf32>
    %468 = arith.negf %467 : vector<8x256xf32>
    %469 = math.exp %468 : vector<8x256xf32>
    %cst_231 = arith.constant 1.000000e+00 : f32
    %470 = vector.broadcast %cst_231 : f32 to vector<8x256xf32>
    %471 = arith.addf %470, %469 : vector<8x256xf32>
    %472 = arith.divf %470, %471 : vector<8x256xf32>
    %473 = vector.extract_strided_slice %472 {offsets = [0, 0], sizes = [8, 128], strides = [1, 1]} : vector<8x256xf32> to vector<8x128xf32>
    %474 = vector.extract_strided_slice %472 {offsets = [0, 128], sizes = [8, 128], strides = [1, 1]} : vector<8x256xf32> to vector<8x128xf32>
    %475 = vector.extract_strided_slice %457 {offsets = [0, 256], sizes = [8, 128], strides = [1, 1]} : vector<8x384xf32> to vector<8x128xf32>
    %c0_232 = arith.constant 0 : index
    %c0_233 = arith.constant 0 : index
    %c0_234 = arith.constant 0 : index
    %476 = vector.load %arg8[%c0_232, %c0_233, %c0_234] : memref<2x1x128xf32, #tpu.memory_space<vmem>>, vector<1x1x128xf32>
    %477 = vector.shape_cast %476 : vector<1x1x128xf32> to vector<1x128xf32>
    %478 = vector.broadcast %477 : vector<1x128xf32> to vector<8x128xf32>
    %479 = arith.addf %475, %478 : vector<8x128xf32>
    %480 = vector.extract_strided_slice %460 {offsets = [0, 256], sizes = [8, 128], strides = [1, 1]} : vector<8x384xf32> to vector<8x128xf32>
    %c0_235 = arith.constant 0 : index
    %c0_236 = arith.constant 0 : index
    %c0_237 = arith.constant 0 : index
    %481 = vector.load %arg9[%c0_235, %c0_236, %c0_237] : memref<2x1x128xf32, #tpu.memory_space<vmem>>, vector<1x1x128xf32>
    %482 = vector.shape_cast %481 : vector<1x1x128xf32> to vector<1x128xf32>
    %483 = vector.broadcast %482 : vector<1x128xf32> to vector<8x128xf32>
    %484 = arith.addf %480, %483 : vector<8x128xf32>
    %485 = arith.mulf %473, %484 : vector<8x128xf32>
    %486 = arith.addf %479, %485 : vector<8x128xf32>
    %487 = math.tanh %486 : vector<8x128xf32>
    %cst_238 = arith.constant 1.000000e+00 : f32
    %488 = vector.broadcast %cst_238 : f32 to vector<8x128xf32>
    %489 = arith.subf %488, %474 : vector<8x128xf32>
    %490 = arith.mulf %489, %487 : vector<8x128xf32>
    %491 = arith.mulf %474, %418 : vector<8x128xf32>
    %492 = arith.addf %490, %491 : vector<8x128xf32>
    %c0_239 = arith.constant 0 : index
    %c0_240 = arith.constant 0 : index
    %c0_241 = arith.constant 0 : index
    %493 = vector.load %arg5[%c0_239, %c0_240, %c0_241] : memref<1x128x384xf32, #tpu.memory_space<vmem>>, vector<1x128x384xf32>
    %494 = vector.shape_cast %493 : vector<1x128x384xf32> to vector<128x384xf32>
    %cst_242 = arith.constant dense<0.000000e+00> : vector<8x384xf32>
    %495 = tpu.matmul %492, %494, %cst_242 {dimension_numbers = #tpu.dot_dimension_numbers<[1], [0], [0], [1], [0, 0, 1, 1], [], []>} : vector<8x128xf32>, vector<128x384xf32>, vector<8x384xf32> -> vector<8x384xf32>
    %c1_243 = arith.constant 1 : index
    %c0_244 = arith.constant 0 : index
    %c0_245 = arith.constant 0 : index
    %496 = vector.load %arg6[%c1_243, %c0_244, %c0_245] : memref<2x128x384xf32, #tpu.memory_space<vmem>>, vector<1x128x384xf32>
    %497 = vector.shape_cast %496 : vector<1x128x384xf32> to vector<128x384xf32>
    %cst_246 = arith.constant dense<0.000000e+00> : vector<8x384xf32>
    %498 = tpu.matmul %456, %497, %cst_246 {dimension_numbers = #tpu.dot_dimension_numbers<[1], [0], [0], [1], [0, 0, 1, 1], [], []>} : vector<8x128xf32>, vector<128x384xf32>, vector<8x384xf32> -> vector<8x384xf32>
    %499 = vector.extract_strided_slice %495 {offsets = [0, 0], sizes = [8, 256], strides = [1, 1]} : vector<8x384xf32> to vector<8x256xf32>
    %500 = vector.extract_strided_slice %498 {offsets = [0, 0], sizes = [8, 256], strides = [1, 1]} : vector<8x384xf32> to vector<8x256xf32>
    %501 = arith.addf %499, %500 : vector<8x256xf32>
    %c1_247 = arith.constant 1 : index
    %c0_248 = arith.constant 0 : index
    %c0_249 = arith.constant 0 : index
    %502 = vector.load %arg7[%c1_247, %c0_248, %c0_249] : memref<2x1x256xf32, #tpu.memory_space<vmem>>, vector<1x1x256xf32>
    %503 = vector.shape_cast %502 : vector<1x1x256xf32> to vector<1x256xf32>
    %504 = vector.broadcast %503 : vector<1x256xf32> to vector<8x256xf32>
    %505 = arith.addf %501, %504 : vector<8x256xf32>
    %506 = arith.negf %505 : vector<8x256xf32>
    %507 = math.exp %506 : vector<8x256xf32>
    %cst_250 = arith.constant 1.000000e+00 : f32
    %508 = vector.broadcast %cst_250 : f32 to vector<8x256xf32>
    %509 = arith.addf %508, %507 : vector<8x256xf32>
    %510 = arith.divf %508, %509 : vector<8x256xf32>
    %511 = vector.extract_strided_slice %510 {offsets = [0, 0], sizes = [8, 128], strides = [1, 1]} : vector<8x256xf32> to vector<8x128xf32>
    %512 = vector.extract_strided_slice %510 {offsets = [0, 128], sizes = [8, 128], strides = [1, 1]} : vector<8x256xf32> to vector<8x128xf32>
    %513 = vector.extract_strided_slice %495 {offsets = [0, 256], sizes = [8, 128], strides = [1, 1]} : vector<8x384xf32> to vector<8x128xf32>
    %c1_251 = arith.constant 1 : index
    %c0_252 = arith.constant 0 : index
    %c0_253 = arith.constant 0 : index
    %514 = vector.load %arg8[%c1_251, %c0_252, %c0_253] : memref<2x1x128xf32, #tpu.memory_space<vmem>>, vector<1x1x128xf32>
    %515 = vector.shape_cast %514 : vector<1x1x128xf32> to vector<1x128xf32>
    %516 = vector.broadcast %515 : vector<1x128xf32> to vector<8x128xf32>
    %517 = arith.addf %513, %516 : vector<8x128xf32>
    %518 = vector.extract_strided_slice %498 {offsets = [0, 256], sizes = [8, 128], strides = [1, 1]} : vector<8x384xf32> to vector<8x128xf32>
    %c1_254 = arith.constant 1 : index
    %c0_255 = arith.constant 0 : index
    %c0_256 = arith.constant 0 : index
    %519 = vector.load %arg9[%c1_254, %c0_255, %c0_256] : memref<2x1x128xf32, #tpu.memory_space<vmem>>, vector<1x1x128xf32>
    %520 = vector.shape_cast %519 : vector<1x1x128xf32> to vector<1x128xf32>
    %521 = vector.broadcast %520 : vector<1x128xf32> to vector<8x128xf32>
    %522 = arith.addf %518, %521 : vector<8x128xf32>
    %523 = arith.mulf %511, %522 : vector<8x128xf32>
    %524 = arith.addf %517, %523 : vector<8x128xf32>
    %525 = math.tanh %524 : vector<8x128xf32>
    %cst_257 = arith.constant 1.000000e+00 : f32
    %526 = vector.broadcast %cst_257 : f32 to vector<8x128xf32>
    %527 = arith.subf %526, %512 : vector<8x128xf32>
    %528 = arith.mulf %527, %525 : vector<8x128xf32>
    %529 = arith.mulf %512, %456 : vector<8x128xf32>
    %530 = arith.addf %528, %529 : vector<8x128xf32>
    %c56 = arith.constant 56 : index
    %c0_258 = arith.constant 0 : index
    %531 = vector.load %arg11[%c56, %c0_258] : memref<64x384xf32, #tpu.memory_space<vmem>>, vector<8x384xf32>
    %c0_259 = arith.constant 0 : index
    %c0_260 = arith.constant 0 : index
    %c0_261 = arith.constant 0 : index
    %532 = vector.load %arg6[%c0_259, %c0_260, %c0_261] : memref<2x128x384xf32, #tpu.memory_space<vmem>>, vector<1x128x384xf32>
    %533 = vector.shape_cast %532 : vector<1x128x384xf32> to vector<128x384xf32>
    %cst_262 = arith.constant dense<0.000000e+00> : vector<8x384xf32>
    %534 = tpu.matmul %492, %533, %cst_262 {dimension_numbers = #tpu.dot_dimension_numbers<[1], [0], [0], [1], [0, 0, 1, 1], [], []>} : vector<8x128xf32>, vector<128x384xf32>, vector<8x384xf32> -> vector<8x384xf32>
    %535 = vector.extract_strided_slice %531 {offsets = [0, 0], sizes = [8, 256], strides = [1, 1]} : vector<8x384xf32> to vector<8x256xf32>
    %536 = vector.extract_strided_slice %534 {offsets = [0, 0], sizes = [8, 256], strides = [1, 1]} : vector<8x384xf32> to vector<8x256xf32>
    %537 = arith.addf %535, %536 : vector<8x256xf32>
    %c0_263 = arith.constant 0 : index
    %c0_264 = arith.constant 0 : index
    %c0_265 = arith.constant 0 : index
    %538 = vector.load %arg7[%c0_263, %c0_264, %c0_265] : memref<2x1x256xf32, #tpu.memory_space<vmem>>, vector<1x1x256xf32>
    %539 = vector.shape_cast %538 : vector<1x1x256xf32> to vector<1x256xf32>
    %540 = vector.broadcast %539 : vector<1x256xf32> to vector<8x256xf32>
    %541 = arith.addf %537, %540 : vector<8x256xf32>
    %542 = arith.negf %541 : vector<8x256xf32>
    %543 = math.exp %542 : vector<8x256xf32>
    %cst_266 = arith.constant 1.000000e+00 : f32
    %544 = vector.broadcast %cst_266 : f32 to vector<8x256xf32>
    %545 = arith.addf %544, %543 : vector<8x256xf32>
    %546 = arith.divf %544, %545 : vector<8x256xf32>
    %547 = vector.extract_strided_slice %546 {offsets = [0, 0], sizes = [8, 128], strides = [1, 1]} : vector<8x256xf32> to vector<8x128xf32>
    %548 = vector.extract_strided_slice %546 {offsets = [0, 128], sizes = [8, 128], strides = [1, 1]} : vector<8x256xf32> to vector<8x128xf32>
    %549 = vector.extract_strided_slice %531 {offsets = [0, 256], sizes = [8, 128], strides = [1, 1]} : vector<8x384xf32> to vector<8x128xf32>
    %c0_267 = arith.constant 0 : index
    %c0_268 = arith.constant 0 : index
    %c0_269 = arith.constant 0 : index
    %550 = vector.load %arg8[%c0_267, %c0_268, %c0_269] : memref<2x1x128xf32, #tpu.memory_space<vmem>>, vector<1x1x128xf32>
    %551 = vector.shape_cast %550 : vector<1x1x128xf32> to vector<1x128xf32>
    %552 = vector.broadcast %551 : vector<1x128xf32> to vector<8x128xf32>
    %553 = arith.addf %549, %552 : vector<8x128xf32>
    %554 = vector.extract_strided_slice %534 {offsets = [0, 256], sizes = [8, 128], strides = [1, 1]} : vector<8x384xf32> to vector<8x128xf32>
    %c0_270 = arith.constant 0 : index
    %c0_271 = arith.constant 0 : index
    %c0_272 = arith.constant 0 : index
    %555 = vector.load %arg9[%c0_270, %c0_271, %c0_272] : memref<2x1x128xf32, #tpu.memory_space<vmem>>, vector<1x1x128xf32>
    %556 = vector.shape_cast %555 : vector<1x1x128xf32> to vector<1x128xf32>
    %557 = vector.broadcast %556 : vector<1x128xf32> to vector<8x128xf32>
    %558 = arith.addf %554, %557 : vector<8x128xf32>
    %559 = arith.mulf %547, %558 : vector<8x128xf32>
    %560 = arith.addf %553, %559 : vector<8x128xf32>
    %561 = math.tanh %560 : vector<8x128xf32>
    %cst_273 = arith.constant 1.000000e+00 : f32
    %562 = vector.broadcast %cst_273 : f32 to vector<8x128xf32>
    %563 = arith.subf %562, %548 : vector<8x128xf32>
    %564 = arith.mulf %563, %561 : vector<8x128xf32>
    %565 = arith.mulf %548, %492 : vector<8x128xf32>
    %566 = arith.addf %564, %565 : vector<8x128xf32>
    %c0_274 = arith.constant 0 : index
    %c0_275 = arith.constant 0 : index
    %c0_276 = arith.constant 0 : index
    %567 = vector.load %arg5[%c0_274, %c0_275, %c0_276] : memref<1x128x384xf32, #tpu.memory_space<vmem>>, vector<1x128x384xf32>
    %568 = vector.shape_cast %567 : vector<1x128x384xf32> to vector<128x384xf32>
    %cst_277 = arith.constant dense<0.000000e+00> : vector<8x384xf32>
    %569 = tpu.matmul %566, %568, %cst_277 {dimension_numbers = #tpu.dot_dimension_numbers<[1], [0], [0], [1], [0, 0, 1, 1], [], []>} : vector<8x128xf32>, vector<128x384xf32>, vector<8x384xf32> -> vector<8x384xf32>
    %c1_278 = arith.constant 1 : index
    %c0_279 = arith.constant 0 : index
    %c0_280 = arith.constant 0 : index
    %570 = vector.load %arg6[%c1_278, %c0_279, %c0_280] : memref<2x128x384xf32, #tpu.memory_space<vmem>>, vector<1x128x384xf32>
    %571 = vector.shape_cast %570 : vector<1x128x384xf32> to vector<128x384xf32>
    %cst_281 = arith.constant dense<0.000000e+00> : vector<8x384xf32>
    %572 = tpu.matmul %530, %571, %cst_281 {dimension_numbers = #tpu.dot_dimension_numbers<[1], [0], [0], [1], [0, 0, 1, 1], [], []>} : vector<8x128xf32>, vector<128x384xf32>, vector<8x384xf32> -> vector<8x384xf32>
    %573 = vector.extract_strided_slice %569 {offsets = [0, 0], sizes = [8, 256], strides = [1, 1]} : vector<8x384xf32> to vector<8x256xf32>
    %574 = vector.extract_strided_slice %572 {offsets = [0, 0], sizes = [8, 256], strides = [1, 1]} : vector<8x384xf32> to vector<8x256xf32>
    %575 = arith.addf %573, %574 : vector<8x256xf32>
    %c1_282 = arith.constant 1 : index
    %c0_283 = arith.constant 0 : index
    %c0_284 = arith.constant 0 : index
    %576 = vector.load %arg7[%c1_282, %c0_283, %c0_284] : memref<2x1x256xf32, #tpu.memory_space<vmem>>, vector<1x1x256xf32>
    %577 = vector.shape_cast %576 : vector<1x1x256xf32> to vector<1x256xf32>
    %578 = vector.broadcast %577 : vector<1x256xf32> to vector<8x256xf32>
    %579 = arith.addf %575, %578 : vector<8x256xf32>
    %580 = arith.negf %579 : vector<8x256xf32>
    %581 = math.exp %580 : vector<8x256xf32>
    %cst_285 = arith.constant 1.000000e+00 : f32
    %582 = vector.broadcast %cst_285 : f32 to vector<8x256xf32>
    %583 = arith.addf %582, %581 : vector<8x256xf32>
    %584 = arith.divf %582, %583 : vector<8x256xf32>
    %585 = vector.extract_strided_slice %584 {offsets = [0, 0], sizes = [8, 128], strides = [1, 1]} : vector<8x256xf32> to vector<8x128xf32>
    %586 = vector.extract_strided_slice %584 {offsets = [0, 128], sizes = [8, 128], strides = [1, 1]} : vector<8x256xf32> to vector<8x128xf32>
    %587 = vector.extract_strided_slice %569 {offsets = [0, 256], sizes = [8, 128], strides = [1, 1]} : vector<8x384xf32> to vector<8x128xf32>
    %c1_286 = arith.constant 1 : index
    %c0_287 = arith.constant 0 : index
    %c0_288 = arith.constant 0 : index
    %588 = vector.load %arg8[%c1_286, %c0_287, %c0_288] : memref<2x1x128xf32, #tpu.memory_space<vmem>>, vector<1x1x128xf32>
    %589 = vector.shape_cast %588 : vector<1x1x128xf32> to vector<1x128xf32>
    %590 = vector.broadcast %589 : vector<1x128xf32> to vector<8x128xf32>
    %591 = arith.addf %587, %590 : vector<8x128xf32>
    %592 = vector.extract_strided_slice %572 {offsets = [0, 256], sizes = [8, 128], strides = [1, 1]} : vector<8x384xf32> to vector<8x128xf32>
    %c1_289 = arith.constant 1 : index
    %c0_290 = arith.constant 0 : index
    %c0_291 = arith.constant 0 : index
    %593 = vector.load %arg9[%c1_289, %c0_290, %c0_291] : memref<2x1x128xf32, #tpu.memory_space<vmem>>, vector<1x1x128xf32>
    %594 = vector.shape_cast %593 : vector<1x1x128xf32> to vector<1x128xf32>
    %595 = vector.broadcast %594 : vector<1x128xf32> to vector<8x128xf32>
    %596 = arith.addf %592, %595 : vector<8x128xf32>
    %597 = arith.mulf %585, %596 : vector<8x128xf32>
    %598 = arith.addf %591, %597 : vector<8x128xf32>
    %599 = math.tanh %598 : vector<8x128xf32>
    %cst_292 = arith.constant 1.000000e+00 : f32
    %600 = vector.broadcast %cst_292 : f32 to vector<8x128xf32>
    %601 = arith.subf %600, %586 : vector<8x128xf32>
    %602 = arith.mulf %601, %599 : vector<8x128xf32>
    %603 = arith.mulf %586, %530 : vector<8x128xf32>
    %604 = arith.addf %602, %603 : vector<8x128xf32>
    %605 = vector.extract_strided_slice %604 {offsets = [0, 0], sizes = [8, 32], strides = [1, 1]} : vector<8x128xf32> to vector<8x32xf32>
    %c0_293 = arith.constant 0 : index
    %c0_294 = arith.constant 0 : index
    %c0_295 = arith.constant 0 : index
    %606 = vector.load %arg10[%c0_293, %c0_294, %c0_295] : memref<1x8x32xf32, #tpu.memory_space<vmem>>, vector<1x8x32xf32>
    %607 = vector.shape_cast %606 : vector<1x8x32xf32> to vector<8x32xf32>
    %608 = vector.shape_cast %605 : vector<8x32xf32> to vector<1x8x32xf32>
    tpu.vector_store %arg10[%c0_293, %c0_294, %c0_295], %608 {strides = array<i32>} : memref<1x8x32xf32, #tpu.memory_space<vmem>>, vector<1x8x32xf32>,
    return
  }
  func.func @transform_0(%arg0: i32) -> (i32, i32) {
    %c0_i32 = arith.constant 0 : i32
    %c0_i32_0 = arith.constant 0 : i32
    %c0_i32_1 = arith.constant 0 : i32
    return %c0_i32, %c0_i32_0 : i32, i32
  }
  func.func @transform_1(%arg0: i32) -> (i32, i32) {
    %c0_i32 = arith.constant 0 : i32
    %c0_i32_0 = arith.constant 0 : i32
    %c0_i32_1 = arith.constant 0 : i32
    return %c0_i32, %c0_i32_0 : i32, i32
  }
  func.func @transform_2(%arg0: i32) -> (i32, i32) {
    %c0_i32 = arith.constant 0 : i32
    %c0_i32_0 = arith.constant 0 : i32
    %c0_i32_1 = arith.constant 0 : i32
    return %c0_i32, %c0_i32_0 : i32, i32
  }
  func.func @transform_3(%arg0: i32) -> (i32, i32) {
    %c0_i32 = arith.constant 0 : i32
    %c0_i32_0 = arith.constant 0 : i32
    %c0_i32_1 = arith.constant 0 : i32
    return %c0_i32, %c0_i32_0 : i32, i32
  }
  func.func @transform_4(%arg0: i32) -> (i32, i32, i32) {
    %c0_i32 = arith.constant 0 : i32
    %c0_i32_0 = arith.constant 0 : i32
    %c0_i32_1 = arith.constant 0 : i32
    %c0_i32_2 = arith.constant 0 : i32
    return %c0_i32, %c0_i32_0, %c0_i32_1 : i32, i32, i32
  }
  func.func @transform_5(%arg0: i32) -> (i32, i32, i32) {
    %c0_i32 = arith.constant 0 : i32
    %c0_i32_0 = arith.constant 0 : i32
    %c0_i32_1 = arith.constant 0 : i32
    %c0_i32_2 = arith.constant 0 : i32
    return %c0_i32, %c0_i32_0, %c0_i32_1 : i32, i32, i32
  }
  func.func @transform_6(%arg0: i32) -> (i32, i32, i32) {
    %c0_i32 = arith.constant 0 : i32
    %c0_i32_0 = arith.constant 0 : i32
    %c0_i32_1 = arith.constant 0 : i32
    %c0_i32_2 = arith.constant 0 : i32
    return %c0_i32, %c0_i32_0, %c0_i32_1 : i32, i32, i32
  }
  func.func @transform_7(%arg0: i32) -> (i32, i32, i32) {
    %c0_i32 = arith.constant 0 : i32
    %c0_i32_0 = arith.constant 0 : i32
    %c0_i32_1 = arith.constant 0 : i32
    %c0_i32_2 = arith.constant 0 : i32
    return %c0_i32, %c0_i32_0, %c0_i32_1 : i32, i32, i32
  }
  func.func @transform_8(%arg0: i32) -> (i32, i32, i32) {
    %c0_i32 = arith.constant 0 : i32
    %c0_i32_0 = arith.constant 0 : i32
    %c0_i32_1 = arith.constant 0 : i32
    %c0_i32_2 = arith.constant 0 : i32
    return %c0_i32, %c0_i32_0, %c0_i32_1 : i32, i32, i32
  }
  func.func @transform_9(%arg0: i32) -> (i32, i32, i32) {
    %c0_i32 = arith.constant 0 : i32
    %c0_i32_0 = arith.constant 0 : i32
    %c0_i32_1 = arith.constant 0 : i32
    %c0_i32_2 = arith.constant 0 : i32
    return %c0_i32, %c0_i32_0, %c0_i32_1 : i32, i32, i32
  }
}

</mosaic_0001>

<bundles_post_ra>
// kernel: tpu_custom_call.1
= control target key start
LH: loop header
LB: loop body
LE: loop exit
PB: predicated region body
PF: predicated region fallthrough
CT: control target
= control target key end

     0   :  { %14 = vsyncpa [#allocation4], 0  ;;  %s9117_s0 = inlined_call_operand.vmem [shape: f32[64,2], index: 0, kind: input, shape index: {}]   ;;  %s9118_s1 = inlined_call_operand.vmem [shape: f32[2,256], index: 1, kind: input, shape index: {}]   ;;  %s9119_s2 = inlined_call_operand.vmem [shape: f32[1,256], index: 2, kind: input, shape index: {}]   ;;  %s9120_s3 = inlined_call_operand.hbm [shape: f32[256,384], index: 3, kind: input, shape index: {}]   ;;  %s9121_s4 = inlined_call_operand.hbm [shape: f32[1,128,384], index: 4, kind: input, shape index: {}]   ;;  %s9122_s5 = inlined_call_operand.hbm [shape: f32[2,128,384], index: 5, kind: input, shape index: {}]   ;;  %s9123_s6 = inlined_call_operand.vmem [shape: f32[2,1,256], index: 6, kind: input, shape index: {}]   ;;  %s9124_s7 = inlined_call_operand.vmem [shape: f32[2,1,128], index: 7, kind: input, shape index: {}]   ;;  %s9125_s8 = inlined_call_operand.vmem [shape: f32[2,1,128], index: 8, kind: input, shape index: {}]   ;;  %s9126_s9 = inlined_call_operand.hbm [shape: f32[1,8,32], index: 9, kind: output, shape index: {}]  }
   0x1   :  { %15 = vsyncpa [#allocation7], 0 }
   0x2   :  { %16 = vsyncpa [#allocation5], 0  ;;  %s7720_s30 = smov [#allocation6]   ;;  %s7721_s11 = smov [#allocation3]  }
   0x3   :  { %s40_s10 = sshll.u32 %s7720_s30, 4  ;;  %s28_s12 = sshll.u32 %s7721_s11, 4  ;;  %s41_s10 = int_to_ptr.vmem [resolvable:$true] %s40_s10  ;;  %s7779_s12 = int_to_ptr.vmem [resolvable:$true] %s28_s12 }
   0x4   :  { %s7626_s15 = scalar_lea.hbm %s9121_s4, 6144 }
   0x5   :  { %p7627_p0 = scmp.ne.s32.totalorder %s9121_s4, %s7626_s15  ;;  %p7630_p1 = scmp.lt.u32.totalorder %s7626_s15, %s9121_s4 }
   0x7   :  { %p7632_p2 = pnand %p7630_p1, %p7627_p0 }
   0x9   :  { %7635 = shalt.err (!%p7632_p2)
}
   0xa   :  { %s7636_s20 = scalar_lea.vmem %s41_s10, 6144  ;;  %p7641_p4 = scmp.lt.s32.totalorder %s41_s10, %s41_s10 }
   0xb   :  { %p7637_p3 = scmp.ne.s32.totalorder %s41_s10, %s7636_s20  ;;  %p7642_p5 = scmp.lt.s32.totalorder %s7636_s20, %s7636_s20 }
   0xd   :  { %p7643_p6 = por %p7642_p5, %p7641_p4 }
   0xf   :  { %p7644_p7 = pnand %p7643_p6, %p7637_p3 }
  0x11   :  { %7647 = shalt.err (!%p7644_p7)
}
  0x12   :  { %s7722_s21 = smov 384   ;;  %s7723_s22 = smov 24  }
  0x13   :  { %46 = dma.hbm_to_vmem [thread:$0]  %s9121_s4, 6144, %s41_s10, [#allocation7], %s7722_s21, %s7722_s21, %s7723_s22  }
  0x14   :  { %s7648_s27 = scalar_lea.hbm %s9120_s3, 12288 }
  0x15   :  { %p7649_p8 = scmp.ne.s32.totalorder %s9120_s3, %s7648_s27  ;;  %p7652_p9 = scmp.lt.u32.totalorder %s7648_s27, %s9120_s3 }
  0x17   :  { %p7654_p10 = pnand %p7652_p9, %p7649_p8 }
  0x19   :  { %7657 = shalt.err (!%p7654_p10)
}
  0x1a   :  { %s7658_s13 = scalar_lea.vmem %s7779_s12, 12288  ;;  %p7663_p12 = scmp.lt.s32.totalorder %s7779_s12, %s7779_s12 }
  0x1b   :  { %p7659_p11 = scmp.ne.s32.totalorder %s7779_s12, %s7658_s13  ;;  %p7664_p13 = scmp.lt.s32.totalorder %s7658_s13, %s7658_s13 }
  0x1d   :  { %p7665_p0 = por %p7664_p13, %p7663_p12 }
  0x1f   :  { %p7666_p1 = pnand %p7665_p0, %p7659_p11 }
  0x21   :  { %7669 = shalt.err (!%p7666_p1)
}
  0x22   :  { %34 = dma.hbm_to_vmem [thread:$0]  %s9120_s3, 12288, %s7779_s12, [#allocation4], %s7722_s21, %s7722_s21, %s7723_s22  }
  0x23   :  { %s7724_s14 = smov [#allocation8]   ;;  %s7670_s18 = scalar_lea.hbm %s9122_s5, 12288 }
  0x24   :  { %s52_s15 = sshll.u32 %s7724_s14, 4  ;;  %p7671_p2 = scmp.ne.s32.totalorder %s9122_s5, %s7670_s18  ;;  %s53_s15 = int_to_ptr.vmem [resolvable:$true] %s52_s15 }
  0x25   :  { %p7674_p3 = scmp.lt.u32.totalorder %s7670_s18, %s9122_s5 }
  0x27   :  { %p7676_p4 = pnand %p7674_p3, %p7671_p2 }
  0x29   :  { %7679 = shalt.err (!%p7676_p4)
}
  0x2a   :  { %s7680_s25 = scalar_lea.vmem %s53_s15, 12288  ;;  %p7685_p6 = scmp.lt.s32.totalorder %s53_s15, %s53_s15 }
  0x2b   :  { %p7681_p5 = scmp.ne.s32.totalorder %s53_s15, %s7680_s25  ;;  %p7686_p7 = scmp.lt.s32.totalorder %s7680_s25, %s7680_s25 }
  0x2d   :  { %p7687_p8 = por %p7686_p7, %p7685_p6 }
  0x2f   :  { %p7688_p9 = pnand %p7687_p8, %p7681_p5 }
  0x31   :  { %7691 = shalt.err (!%p7688_p9)
}
  0x32   :  { %58 = dma.hbm_to_vmem [thread:$0]  %s9122_s5, 12288, %s53_s15, [#allocation7], %s7722_s21, %s7722_s21, %s7723_s22  }
  0x33   :  { %7714 = dma.done.wait [#allocation4], 12288  }
  0x34   :  { %7715 = vsyncadd [#allocation4], 4294955008 }
  0x35   :  { %7716 = dma.done.wait [#allocation7], 18432  }
  0x36   :  { %7717 = vsyncadd [#allocation7], 4294948864  ;;  %v9127_v0 = vmov 0.0   ;;  %vm129_vm0 = vcmask 1041408   ;;  %v74_v3 = vld [vmem:[%s9117_s0] sm:$0xff]  ;;  %vm104_vm1 = vcmask 15360  }
  0x37   :  { %198 = vmatprep.mubr.f32.mxu0 %v9127_v0  ;;  %v4627_v1 = vld.sshfl [vmem:[%s9118_s1] sm:$0x33 pattern:$0x76325410]  ;;  %v264_v4 = vld [vmem:[#allocation3 + $0x8] sm:$0xff]  ;;  %v267_v5 = vld [vmem:[#allocation3 + $0x20] sm:$0xff] }
  0x38   :  { %v103_v2 = vcombine.high %v4627_v1, %v4627_v1  ;;  %v263_v6 = vld [vmem:[#allocation3] sm:$0xff]  ;;  %v5981_v7 = vpack.c.bf16 %v267_v5, %v264_v4  ;;  %v266_v8 = vld [vmem:[#allocation3 + $0x18] sm:$0xff]  ;;  %v273_v10 = vld [vmem:[#allocation3 + $0x50] sm:$0xff]  ;;  %vm7727_vm2 = vmmov 0   ;;  %vm4609_vm3 = vcmask 261120  }
  0x39   :  { %v270_v9 = vld [vmem:[#allocation3 + $0x38] sm:$0xff]  ;;  %v5983_v11 = vpack.c.bf16 %v266_v8, %v263_v6  ;;  %v269_v13 = vld [vmem:[#allocation3 + $0x30] sm:$0xff]  ;;  %v272_v14 = vld [vmem:[#allocation3 + $0x48] sm:$0xff] }
  0x3a   :  { %4628 = vmatprep.subr.msk.mxu0 %vm129_vm0, %v103_v2  ;;  %v5985_v12 = vpack.c.bf16 %v273_v10, %v270_v9  ;;  %v276_v15 = vld [vmem:[#allocation3 + $0x68] sm:$0xff]  ;;  %v75_v16 = vld [vmem:[%s9117_s0 + $0x8] sm:$0xff]  ;;  %5982 = vmatprep.subr.bf16.mxu1 %v5981_v7  ;;  %v5987_v18 = vpack.c.bf16 %v272_v14, %v269_v13  ;;  %v278_v21 = vld [vmem:[#allocation3 + $0x78] sm:$0xff] }
  0x3b   :  { %4629 = vmatpush1.msk.msra.mxu0 %vm129_vm0, %v4627_v1  ;;  %v279_v17 = vld [vmem:[#allocation3 + $0x80] sm:$0xff]  ;;  %5984 = vmatpush1.bf16.msra.mxu1 %v5983_v11  ;;  %v282_v22 = vld [vmem:[#allocation3 + $0x98] sm:$0xff]  ;;  %v285_v23 = vld [vmem:[#allocation3 + $0xb0] sm:$0xff] }
  0x3c   :  { %4630 = vmatmul.mubr.msk.f32.vlgmr.msra.gmra.mrb[0].mxu0 %vm104_vm1, %v74_v3  ;;  %5986 = vmatprep.subr.bf16.mxu1 %v5985_v12  ;;  %v5989_v19 = vpack.c.bf16 %v279_v17, %v276_v15  ;;  %v275_v20 = vld [vmem:[#allocation3 + $0x60] sm:$0xff]  ;;  %v76_v24 = vld [vmem:[%s9117_s0 + $0x10] sm:$0xff]  ;;  %v5993_v26 = vpack.c.bf16 %v285_v23, %v282_v22  ;;  %v281_v27 = vld [vmem:[#allocation3 + $0x90] sm:$0xff] }
  0x3d   :  { %204 = vmatprep.mubr.f32.mxu0 %v9127_v0  ;;  %v5991_v25 = vpack.c.bf16 %v278_v21, %v275_v20  ;;  %v284_v28 = vld [vmem:[#allocation3 + $0xa8] sm:$0xff]  ;;  %v291_v30 = vld [vmem:[#allocation3 + $0xe0] sm:$0xff]  ;;  %v77_v31 = vld [vmem:[%s9117_s0 + $0x18] sm:$0xff] }
  0x3e   :  { %v288_v29 = vld [vmem:[#allocation3 + $0xc8] sm:$0xff]  ;;  %v5995_v32 = vpack.c.bf16 %v284_v28, %v281_v27  ;;  %v313_v33 = vld [vmem:[#allocation3 + $0x190] sm:$0xff]  ;;  %v78_v36 = vld [vmem:[%s9117_s0 + $0x20] sm:$0xff] }
  0x3f   :  { %5988 = vmatpush1.bf16.msra.mxu1 %v5987_v18  ;;  %v316_v34 = vld [vmem:[#allocation3 + $0x1a8] sm:$0xff]  ;;  %v265_v35 = vld [vmem:[#allocation3 + $0x10] sm:$0xff]  ;;  %v5997_v37 = vpack.c.bf16 %v291_v30, %v288_v29  ;;  %v287_v38 = vld [vmem:[#allocation3 + $0xc0] sm:$0xff] }
  0x40   :  { %4631 = vmatmul.mubr.msk.f32.gmra.mrb[2].mxu0 %vm104_vm1, %v75_v16  ;;  %5990 = vmatprep.subr.bf16.mxu1 %v5989_v19  ;;  %v290_v39 = vld [vmem:[#allocation3 + $0xd8] sm:$0xff]  ;;  %v6045_v40 = vpack.c.bf16 %v316_v34, %v313_v33  ;;  %v268_v41 = vld [vmem:[#allocation3 + $0x28] sm:$0xff]  ;;  %v297_v43 = vld [vmem:[#allocation3 + $0x110] sm:$0xff] }
  0x41   :  { %210 = vmatprep.mubr.f32.mxu0 %v9127_v0  ;;  %v294_v42 = vld [vmem:[#allocation3 + $0xf8] sm:$0xff]  ;;  %v6047_v44 = vpack.c.bf16 %v268_v41, %v265_v35  ;;  %v319_v45 = vld [vmem:[#allocation3 + $0x1c0] sm:$0xff]  ;;  %v5999_v49 = vpack.c.bf16 %v290_v39, %v287_v38  ;;  %v293_v50 = vld [vmem:[#allocation3 + $0xf0] sm:$0xff] }
  0x42   :  { %6046 = vmatprep.subr.bf16.mxu0 %v6045_v40  ;;  %v322_v46 = vld [vmem:[#allocation3 + $0x1d8] sm:$0xff]  ;;  %v271_v47 = vld [vmem:[#allocation3 + $0x40] sm:$0xff]  ;;  %v296_v51 = vld [vmem:[#allocation3 + $0x108] sm:$0xff]  ;;  %v6001_v54 = vpack.c.bf16 %v297_v43, %v294_v42 }
  0x43   :  { %5992 = vmatpush1.bf16.msra.mxu1 %v5991_v25  ;;  %v274_v48 = vld [vmem:[#allocation3 + $0x58] sm:$0xff]  ;;  %6048 = vmatpush3.bf16.msra.mxu0 %v6047_v44  ;;  %v6049_v52 = vpack.c.bf16 %v322_v46, %v319_v45  ;;  %v300_v55 = vld [vmem:[#allocation3 + $0x128] sm:$0xff]  ;;  %v325_v56 = vld [vmem:[#allocation3 + $0x1f0] sm:$0xff]  ;;  %v6003_v63 = vpack.c.bf16 %v296_v51, %v293_v50 }
  0x44   :  { %4632 = vmatmul.mubr.msk.f32.gmra.mrb[4].mxu0 %vm104_vm1, %v76_v24  ;;  %5994 = vmatprep.subr.bf16.mxu1 %v5993_v26  ;;  %v6051_v53 = vpack.c.bf16 %v274_v48, %v271_v47  ;;  %v328_v57 = vld [vmem:[#allocation3 + $0x208] sm:$0xff]  ;;  %v303_v58 = vld [vmem:[#allocation3 + $0x140] sm:$0xff]  ;;  %v277_v60 = vld [vmem:[#allocation3 + $0x70] sm:$0xff] }
  0x45   :  { %216 = vmatprep.mubr.f32.mxu0 %v9127_v0  ;;  %6050 = vmatprep.subr.bf16.mxu0 %v6049_v52  ;;  %v6053_v59 = vpack.c.bf16 %v328_v57, %v325_v56  ;;  %v280_v61 = vld [vmem:[#allocation3 + $0x88] sm:$0xff]  ;;  %v79_v62 = vld [vmem:[%s9117_s0 + $0x28] sm:$0xff]  ;;  %v334_v4 = vld [vmem:[#allocation3 + $0x238] sm:$0xff]  ;;  %v6005_v5 = vpack.c.bf16 %v303_v58, %v300_v55 }
  0x46   :  { %v299_v1 = vld [vmem:[#allocation3 + $0x120] sm:$0xff]  ;;  %v6055_v2 = vpack.c.bf16 %v280_v61, %v277_v60  ;;  %v302_v6 = vld [vmem:[#allocation3 + $0x138] sm:$0xff]  ;;  %v309_v11 = vld [vmem:[#allocation3 + $0x170] sm:$0xff] }
  0x47   :  { %5996 = vmatpush1.bf16.msra.mxu1 %v5995_v32  ;;  %6052 = vmatpush3.bf16.msra.mxu0 %v6051_v53  ;;  %v331_v3 = vld [vmem:[#allocation3 + $0x220] sm:$0xff]  ;;  %v286_v9 = vld [vmem:[#allocation3 + $0xb8] sm:$0xff]  ;;  %v337_v12 = vld [vmem:[#allocation3 + $0x250] sm:$0xff]  ;;  %v6007_v15 = vpack.c.bf16 %v302_v6, %v299_v1 }
  0x48   :  { %4633 = vmatmul.mubr.msk.f32.gmra.mrb[6].mxu0 %vm104_vm1, %v77_v31  ;;  %5998 = vmatprep.subr.bf16.mxu1 %v5997_v37  ;;  %v6057_v7 = vpack.c.bf16 %v334_v4, %v331_v3  ;;  %v283_v8 = vld [vmem:[#allocation3 + $0xa0] sm:$0xff]  ;;  %v306_v10 = vld [vmem:[#allocation3 + $0x158] sm:$0xff]  ;;  %v80_v13 = vld [vmem:[%s9117_s0 + $0x30] sm:$0xff] }
  0x49   :  { %222 = vmatprep.mubr.f32.mxu0 %v9127_v0  ;;  %6054 = vmatprep.subr.bf16.mxu0 %v6053_v59  ;;  %v340_v14 = vld [vmem:[#allocation3 + $0x268] sm:$0xff]  ;;  %v305_v16 = vld [vmem:[#allocation3 + $0x150] sm:$0xff]  ;;  %v6059_v18 = vpack.c.bf16 %v286_v9, %v283_v8  ;;  %v6009_v19 = vpack.c.bf16 %v309_v11, %v306_v10  ;;  %v315_v24 = vld [vmem:[#allocation3 + $0x1a0] sm:$0xff] }
  0x4a   :  { %v308_v17 = vld [vmem:[#allocation3 + $0x168] sm:$0xff]  ;;  %v6061_v21 = vpack.c.bf16 %v340_v14, %v337_v12  ;;  %v289_v22 = vld [vmem:[#allocation3 + $0xd0] sm:$0xff]  ;;  %v343_v25 = vld [vmem:[#allocation3 + $0x280] sm:$0xff] }
  0x4b   :  { %6000 = vmatpush1.bf16.msra.mxu1 %v5999_v49  ;;  %6056 = vmatpush3.bf16.msra.mxu0 %v6055_v2  ;;  %v312_v20 = vld [vmem:[#allocation3 + $0x188] sm:$0xff]  ;;  %v346_v26 = vld [vmem:[#allocation3 + $0x298] sm:$0xff]  ;;  %v81_v27 = vld [vmem:[%s9117_s0 + $0x38] sm:$0xff]  ;;  %v6011_v28 = vpack.c.bf16 %v308_v17, %v305_v16 }
  0x4c   :  { %4634 = vmatmul.mubr.msk.f32.gmra.mrb[8].mxu0 %vm104_vm1, %v78_v36  ;;  %6002 = vmatprep.subr.bf16.mxu1 %v6001_v54  ;;  %v292_v23 = vld [vmem:[#allocation3 + $0xe8] sm:$0xff]  ;;  %v311_v29 = vld [vmem:[#allocation3 + $0x180] sm:$0xff]  ;;  %v314_v30 = vld [vmem:[#allocation3 + $0x198] sm:$0xff]  ;;  %v6013_v32 = vpack.c.bf16 %v315_v24, %v312_v20  ;;  %v6065_v34 = vpack.c.bf16 %v346_v26, %v343_v25 }
  0x4d   :  { %228 = vmatprep.mubr.f32.mxu0 %v9127_v0  ;;  %6058 = vmatprep.subr.bf16.mxu0 %v6057_v7  ;;  %v6063_v31 = vpack.c.bf16 %v292_v23, %v289_v22  ;;  %v318_v33 = vld [vmem:[#allocation3 + $0x1b8] sm:$0xff]  ;;  %v295_v35 = vld [vmem:[#allocation3 + $0x100] sm:$0xff]  ;;  %v321_v37 = vld [vmem:[#allocation3 + $0x1d0] sm:$0xff]  ;;  %v6015_v40 = vpack.c.bf16 %v314_v30, %v311_v29 }
  0x4e   :  { %v298_v36 = vld [vmem:[#allocation3 + $0x118] sm:$0xff]  ;;  %v349_v38 = vld [vmem:[#allocation3 + $0x2b0] sm:$0xff]  ;;  %v352_v39 = vld [vmem:[#allocation3 + $0x2c8] sm:$0xff]  ;;  %v6017_v42 = vpack.c.bf16 %v321_v37, %v318_v33  ;;  %v85_v33 = vlaneseq }
  0x4f   :  { %6004 = vmatpush1.bf16.msra.mxu1 %v6003_v63  ;;  %6060 = vmatpush3.bf16.msra.mxu0 %v6059_v18  ;;  %v6067_v41 = vpack.c.bf16 %v298_v36, %v295_v35  ;;  %v317_v43 = vld [vmem:[#allocation3 + $0x1b0] sm:$0xff]  ;;  %v320_v44 = vld [vmem:[#allocation3 + $0x1c8] sm:$0xff]  ;;  %v6069_v45 = vpack.c.bf16 %v352_v39, %v349_v38  ;;  %v327_v47 = vld [vmem:[#allocation3 + $0x200] sm:$0xff] }
  0x50   :  { %4635 = vmatmul.mubr.msk.f32.gmra.mrb[10].mxu0 %vm104_vm1, %v79_v62  ;;  %6006 = vmatprep.subr.bf16.mxu1 %v6005_v5  ;;  %v324_v46 = vld [vmem:[#allocation3 + $0x1e8] sm:$0xff]  ;;  %v6019_v48 = vpack.c.bf16 %v320_v44, %v317_v43  ;;  %v323_v50 = vld [vmem:[#allocation3 + $0x1e0] sm:$0xff]  ;;  %v326_v51 = vld [vmem:[#allocation3 + $0x1f8] sm:$0xff] }
  0x51   :  { %234 = vmatprep.mubr.f32.mxu0 %v9127_v0  ;;  %6062 = vmatprep.subr.bf16.mxu0 %v6061_v21  ;;  %v6021_v49 = vpack.c.bf16 %v327_v47, %v324_v46  ;;  %v330_v52 = vld [vmem:[#allocation3 + $0x218] sm:$0xff]  ;;  %v333_v53 = vld [vmem:[#allocation3 + $0x230] sm:$0xff]  ;;  %v6023_v54 = vpack.c.bf16 %v326_v51, %v323_v50  ;;  %v332_v57 = vld [vmem:[#allocation3 + $0x228] sm:$0xff] }
  0x52   :  { %v6025_v55 = vpack.c.bf16 %v333_v53, %v330_v52  ;;  %v329_v56 = vld [vmem:[#allocation3 + $0x210] sm:$0xff]  ;;  %v336_v58 = vld [vmem:[#allocation3 + $0x248] sm:$0xff]  ;;  %v339_v59 = vld [vmem:[#allocation3 + $0x260] sm:$0xff] }
  0x53   :  { %6008 = vmatpush1.bf16.msra.mxu1 %v6007_v15  ;;  %6064 = vmatpush3.bf16.msra.mxu0 %v6063_v31  ;;  %v6027_v60 = vpack.c.bf16 %v332_v57, %v329_v56  ;;  %v6029_v61 = vpack.c.bf16 %v339_v59, %v336_v58  ;;  %v335_v62 = vld [vmem:[#allocation3 + $0x240] sm:$0xff]  ;;  %v338_v63 = vld [vmem:[#allocation3 + $0x258] sm:$0xff]  ;;  %v345_v2 = vld [vmem:[#allocation3 + $0x290] sm:$0xff] }
  0x54   :  { %4636 = vmatmul.mubr.msk.f32.gmra.mrb[12].mxu0 %vm104_vm1, %v80_v13  ;;  %6010 = vmatprep.subr.bf16.mxu1 %v6009_v19  ;;  %v342_v1 = vld [vmem:[#allocation3 + $0x278] sm:$0xff]  ;;  %v6031_v3 = vpack.c.bf16 %v338_v63, %v335_v62  ;;  %v341_v5 = vld [vmem:[#allocation3 + $0x270] sm:$0xff]  ;;  %v344_v6 = vld [vmem:[#allocation3 + $0x288] sm:$0xff] }
  0x55   :  { %240 = vmatprep.mubr.f32.mxu0 %v9127_v0  ;;  %6066 = vmatprep.subr.bf16.mxu0 %v6065_v34  ;;  %v6033_v4 = vpack.c.bf16 %v345_v2, %v342_v1  ;;  %v348_v7 = vld [vmem:[#allocation3 + $0x2a8] sm:$0xff]  ;;  %v351_v8 = vld [vmem:[#allocation3 + $0x2c0] sm:$0xff]  ;;  %v6035_v9 = vpack.c.bf16 %v344_v6, %v341_v5  ;;  %v350_v12 = vld [vmem:[#allocation3 + $0x2b8] sm:$0xff]  ;;  %v86_v34 = vshrl.u32 %v85_v33, 7 }
  0x56   :  { %v6037_v10 = vpack.c.bf16 %v351_v8, %v348_v7  ;;  %v347_v11 = vld [vmem:[#allocation3 + $0x2a0] sm:$0xff]  ;;  %v301_v14 = vld [vmem:[#allocation3 + $0x130] sm:$0xff]  ;;  %v304_v15 = vld [vmem:[#allocation3 + $0x148] sm:$0xff] }
  0x57   :  { %6012 = vmatpush1.bf16.msra.mxu1 %v6011_v28  ;;  %6068 = vmatpush3.bf16.msra.mxu0 %v6067_v41  ;;  %v6039_v13 = vpack.c.bf16 %v350_v12, %v347_v11  ;;  %v6071_v16 = vpack.c.bf16 %v304_v15, %v301_v14  ;;  %v354_v17 = vld [vmem:[#allocation3 + $0x2d8] sm:$0xff]  ;;  %v357_v18 = vld [vmem:[#allocation3 + $0x2f0] sm:$0xff]  ;;  %v355_v19 = vld [vmem:[#allocation3 + $0x2e0] sm:$0xff]  ;;  %v7878_v35 = vsub.s32 0, %v86_v34  ;;  %v7883_v37 = vsub.s32 1, %v86_v34 }
  0x58   :  { %4637 = vmatmul.mubr.msk.f32.gmra.mrb[14].mxu0 %vm104_vm1, %v81_v27  ;;  %6014 = vmatprep.subr.bf16.mxu1 %v6013_v32  ;;  %v6041_v20 = vpack.c.bf16 %v357_v18, %v354_v17  ;;  %v353_v21 = vld [vmem:[#allocation3 + $0x2d0] sm:$0xff]  ;;  %v356_v22 = vld [vmem:[#allocation3 + $0x2e8] sm:$0xff]  ;;  %v358_v23 = vld [vmem:[#allocation3 + $0x2f8] sm:$0xff]  ;;  %v9133_v32 = vmov 0.0|0.0  }
  0x59   :  { %6070 = vmatprep.subr.bf16.mxu0 %v6069_v45  ;;  %v6043_v24 = vpack.c.bf16 %v356_v22, %v353_v21  ;;  %v6073_v25 = vpack.c.bf16 %v358_v23, %v355_v19  ;;  %v307_v26 = vld [vmem:[#allocation3 + $0x160] sm:$0xff]  ;;  %v310_v27 = vld [vmem:[#allocation3 + $0x178] sm:$0xff]  ;;  %v605_v29 = vld [vmem:[#allocation8 + $0x8] sm:$0xff]  ;;  %9249 = vst [vmem:[#allocation13_spill] sm:$0xff] %v7878_v35 }
  0x5a   :  { %v6075_v28 = vpack.c.bf16 %v310_v27, %v307_v26  ;;  %v608_v30 = vld [vmem:[#allocation8 + $0x20] sm:$0xff]  ;;  %v83_v36 = vld [vmem:[%s9119_s2] sm:$0x3]  ;;  %9250 = vst [vmem:[#allocation14_spill] sm:$0xff] %v7883_v37  ;;  %v606_v45 = vld [vmem:[#allocation8 + $0x10] sm:$0xff] }
  0x5b   :  { %6016 = vmatpush1.bf16.msra.mxu1 %v6015_v40  ;;  %6072 = vmatpush3.bf16.msra.mxu0 %v6071_v16  ;;  %v7874_v31 = vpack.c.bf16 %v608_v30, %v605_v29  ;;  %v7886_v38 = vrot.slane %v83_v36, %v7878_v35  ;;  %v7889_v39 = vrot.slane %v83_v36, %v7883_v37  ;;  %v604_v41 = vld [vmem:[#allocation8] sm:$0xff]  ;;  %v607_v44 = vld [vmem:[#allocation8 + $0x18] sm:$0xff]  ;;  %v609_v46 = vld [vmem:[#allocation8 + $0x28] sm:$0xff] }
  0x5c   :  { %6018 = vmatprep.subr.bf16.mxu1 %v6017_v42  ;;  %6074 = vmatprep.subr.bf16.mxu0 %v6073_v25  ;;  %v7893_v52 = vpack.c.bf16 %v607_v44, %v604_v41  ;;  %v610_v53 = vld [vmem:[#allocation8 + $0x30] sm:$0xff]  ;;  %v613_v59 = vld [vmem:[#allocation8 + $0x48] sm:$0xff]  ;;  %v620_v1 = vld [vmem:[#allocation8 + $0x80] sm:$0xff] }
  0x5d   :  { %v617_v63 = vld [vmem:[#allocation8 + $0x68] sm:$0xff]  ;;  %v616_v5 = vld [vmem:[#allocation8 + $0x60] sm:$0xff]  ;;  %v619_v11 = vld [vmem:[#allocation8 + $0x78] sm:$0xff] }
  0x5e   :  { %v618_v12 = vld [vmem:[#allocation8 + $0x70] sm:$0xff]  ;;  %v623_v15 = vld [vmem:[#allocation8 + $0x98] sm:$0xff]  ;;  %v7914_v19 = vpack.c.bf16 %v619_v11, %v616_v5  ;;  %v625_v26 = vld [vmem:[#allocation8 + $0xa8] sm:$0xff] }
  0x5f   :  { %6020 = vmatpush1.bf16.msra.mxu1 %v6019_v48  ;;  %6076 = vmatpush3.bf16.msra.mxu0 %v6075_v28  ;;  %v611_v48 = vld [vmem:[#allocation8 + $0x38] sm:$0xff]  ;;  %v626_v16 = vld [vmem:[#allocation8 + $0xb0] sm:$0xff]  ;;  %v624_v27 = vld [vmem:[#allocation8 + $0xa0] sm:$0xff] }
  0x60   :  { %6022 = vmatprep.subr.bf16.mxu1 %v6021_v49  ;;  %6109 = vmatprep.subr.bf16.mxu0 %v9133_v32  ;;  %v614_v49 = vld [vmem:[#allocation8 + $0x50] sm:$0xff]  ;;  %v7921_v25 = vpack.c.bf16 %v626_v16, %v623_v15  ;;  %v627_v28 = vld [vmem:[#allocation8 + $0xb8] sm:$0xff]  ;;  %v629_v30 = vld [vmem:[#allocation8 + $0xc8] sm:$0xff] }
  0x61   :  { %v7898_v58 = vpack.c.bf16 %v614_v49, %v611_v48  ;;  %v632_v33 = vld [vmem:[#allocation8 + $0xe0] sm:$0xff]  ;;  %v630_v48 = vld [vmem:[#allocation8 + $0xd0] sm:$0xff]  ;;  %v633_v49 = vld [vmem:[#allocation8 + $0xe8] sm:$0xff] }
  0x62   :  { %v628_v41 = vld [vmem:[#allocation8 + $0xc0] sm:$0xff]  ;;  %v639_v5 = vld [vmem:[#allocation8 + $0x118] sm:$0xff] }
  0x63   :  { %6024 = vmatpush1.bf16.msra.mxu1 %v6023_v54  ;;  %v7895_v54 = vpack.c.bf16 %v609_v46, %v606_v45  ;;  %v7933_v46 = vpack.c.bf16 %v632_v33, %v629_v30 }
  0x64   :  { %6026 = vmatprep.subr.bf16.mxu1 %v6025_v55 }
  0x67   :  { %6028 = vmatpush1.bf16.msra.mxu1 %v6027_v60  ;;  %v612_v60 = vld [vmem:[#allocation8 + $0x40] sm:$0xff] }
  0x68   :  { %6030 = vmatprep.subr.bf16.mxu1 %v6029_v61  ;;  %v615_v61 = vld [vmem:[#allocation8 + $0x58] sm:$0xff] }
  0x69   :  { %v7905_v6 = vpack.c.bf16 %v615_v61, %v612_v60  ;;  %v7941_v60 = vpack.c.bf16 %v633_v49, %v630_v48  ;;  %v648_v49 = vld [vmem:[#allocation8 + $0x160] sm:$0xff] }
  0x6b   :  { %6032 = vmatpush1.bf16.msra.mxu1 %v6031_v3  ;;  %9252 = vst [vmem:[#allocation16_spill] sm:$0xff] %v7941_v60 }
  0x6c   :  { %6034 = vmatprep.subr.bf16.mxu1 %v6033_v4  ;;  %v7902_v4 = vpack.c.bf16 %v613_v59, %v610_v53  ;;  %v638_v53 = vld [vmem:[#allocation8 + $0x110] sm:$0xff] }
  0x6d   :  { %v634_v59 = vld [vmem:[#allocation8 + $0xf0] sm:$0xff] }
  0x6f   :  { %6036 = vmatpush1.bf16.msra.mxu1 %v6035_v9 }
  0x70   :  { %6038 = vmatprep.subr.bf16.mxu1 %v6037_v10  ;;  %v7909_v10 = vpack.c.bf16 %v620_v1, %v617_v63 }
  0x73   :  { %6040 = vmatpush1.bf16.msra.mxu1 %v6039_v13  ;;  %v621_v13 = vld [vmem:[#allocation8 + $0x88] sm:$0xff] }
  0x74   :  { %6042 = vmatprep.subr.bf16.mxu1 %v6041_v20  ;;  %v622_v20 = vld [vmem:[#allocation8 + $0x90] sm:$0xff]  ;;  %v7917_v21 = vpack.c.bf16 %v621_v13, %v618_v12 }
  0x77   :  { %6044 = vmatpush1.bf16.msra.mxu1 %v6043_v24 }
  0x78   :  { %6078 = vmatprep.subr.bf16.mxu1 %v7874_v31 }
 0x10f   :  { %v200_v40 = vpop.f32.mrb[0].mxu0 }
 0x110   :  { %v201_v42 = vadd.f32 %v200_v40, %v7886_v38  ;;  %v202_v43 = vpop.f32.mrb[1].mxu0  ;;  %v7926_v40 = vpack.c.bf16 %v625_v26, %v622_v20 }
 0x111   :  { %v203_v47 = vadd.f32 %v202_v43, %v7889_v39 }
 0x112   :  { %v247_v55 = vmax.f32 %v201_v42, 0.0  ;;  %v7929_v42 = vpack.c.bf16 %v627_v28, %v624_v27  ;;  %v647_v27 = vld [vmem:[#allocation8 + $0x158] sm:$0xff]  ;;  %v650_v28 = vld [vmem:[#allocation8 + $0x170] sm:$0xff] }
 0x113   :  { %v248_v50 = vmax.f32 %v203_v47, 0.0  ;;  %v206_v51 = vpop.f32.mrb[2].mxu0  ;;  %v631_v47 = vld [vmem:[#allocation8 + $0xd8] sm:$0xff] }
 0x114   :  { %v207_v56 = vadd.f32 %v206_v51, %v7886_v38  ;;  %v208_v57 = vpop.f32.mrb[3].mxu0  ;;  %v635_v51 = vld [vmem:[#allocation8 + $0xf8] sm:$0xff] }
 0x115   :  { %v209_v62 = vadd.f32 %v208_v57, %v7889_v39  ;;  %423 = vmatprep.mubr.f32.mxu1 %v248_v50  ;;  %536 = vmatprep.mubr.f32.mxu0 %v248_v50  ;;  %v7938_v57 = vpack.c.bf16 %v631_v47, %v628_v41  ;;  %v7945_v1 = vpack.c.bf16 %v638_v53, %v635_v51  ;;  %v649_v47 = vld [vmem:[#allocation8 + $0x168] sm:$0xff] }
 0x116   :  { %424 = vmatmul.mubr.f32.vlgmr.msra.gmra.mrb[0].mxu1 %v247_v55  ;;  %537 = vmatmul.mubr.f32.vlgmr.msra.gmra.mrb[16].mxu0 %v247_v55  ;;  %v249_v7 = vmax.f32 %v207_v56, 0.0 }
 0x117   :  { %v250_v2 = vmax.f32 %v209_v62, 0.0  ;;  %6080 = vmatpush1.bf16.msra.mxu1 %v7893_v52  ;;  %v212_v3 = vpop.f32.mrb[4].mxu0  ;;  %6111 = vmatpush3.bf16.msra.mxu0 %v7895_v54  ;;  %9251 = vst [vmem:[#allocation15_spill] sm:$0xff] %v7938_v57  ;;  %9253 = vst [vmem:[#allocation17_spill] sm:$0xff] %v7945_v1 }
 0x118   :  { %v213_v8 = vadd.f32 %v212_v3, %v7886_v38  ;;  %v214_v9 = vpop.f32.mrb[5].mxu0  ;;  %6082 = vmatprep.subr.bf16.mxu1 %v7898_v58  ;;  %6112 = vmatprep.subr.bf16.mxu0 %v9133_v32  ;;  %v636_v3 = vld [vmem:[#allocation8 + $0x100] sm:$0xff] }
 0x119   :  { %v215_v14 = vadd.f32 %v214_v9, %v7889_v39  ;;  %429 = vmatprep.mubr.f32.mxu1 %v250_v2  ;;  %541 = vmatprep.mubr.f32.mxu0 %v250_v2  ;;  %v637_v2 = vld [vmem:[#allocation8 + $0x108] sm:$0xff]  ;;  %v644_v9 = vld [vmem:[#allocation8 + $0x140] sm:$0xff]  ;;  %v7953_v15 = vpack.c.bf16 %v639_v5, %v636_v3 }
 0x11a   :  { %430 = vmatmul.mubr.f32.gmra.mrb[2].mxu1 %v249_v7  ;;  %542 = vmatmul.mubr.f32.gmra.mrb[18].mxu0 %v249_v7  ;;  %v251_v22 = vmax.f32 %v213_v8, 0.0  ;;  %v641_v8 = vld [vmem:[#allocation8 + $0x128] sm:$0xff]  ;;  %v7950_v13 = vpack.c.bf16 %v637_v2, %v634_v59 }
 0x11b   :  { %v252_v17 = vmax.f32 %v215_v14, 0.0  ;;  %6084 = vmatpush1.bf16.msra.mxu1 %v7902_v4  ;;  %v218_v18 = vpop.f32.mrb[6].mxu0  ;;  %6114 = vmatpush3.bf16.msra.mxu0 %v7905_v6  ;;  %v640_v14 = vld [vmem:[#allocation8 + $0x120] sm:$0xff]  ;;  %9255 = vst [vmem:[#allocation19_spill] sm:$0xff] %v7953_v15  ;;  %v7957_v20 = vpack.c.bf16 %v644_v9, %v641_v8  ;;  %v849_v3 = vld [vmem:[#allocation6 + $0x28] sm:$0xff]  ;;  %v854_v8 = vld [vmem:[#allocation6 + $0x50] sm:$0xff] }
 0x11c   :  { %v219_v23 = vadd.f32 %v218_v18, %v7886_v38  ;;  %v220_v24 = vpop.f32.mrb[7].mxu0  ;;  %6086 = vmatprep.subr.bf16.mxu1 %v7909_v10  ;;  %6115 = vmatprep.subr.bf16.mxu0 %v9133_v32  ;;  %9254 = vst [vmem:[#allocation18_spill] sm:$0xff] %v7950_v13 }
 0x11d   :  { %v221_v29 = vadd.f32 %v220_v24, %v7889_v39  ;;  %435 = vmatprep.mubr.f32.mxu1 %v252_v17  ;;  %546 = vmatprep.mubr.f32.mxu0 %v252_v17  ;;  %9256 = vst [vmem:[#allocation20_spill] sm:$0xff] %v7957_v20  ;;  %v645_v24 = vld [vmem:[#allocation8 + $0x148] sm:$0xff] }
 0x11e   :  { %436 = vmatmul.mubr.f32.gmra.mrb[4].mxu1 %v251_v22  ;;  %547 = vmatmul.mubr.f32.gmra.mrb[20].mxu0 %v251_v22  ;;  %v253_v43 = vmax.f32 %v219_v23, 0.0  ;;  %v643_v22 = vld [vmem:[#allocation8 + $0x138] sm:$0xff]  ;;  %v642_v23 = vld [vmem:[#allocation8 + $0x130] sm:$0xff] }
 0x11f   :  { %v254_v34 = vmax.f32 %v221_v29, 0.0  ;;  %6088 = vmatpush1.bf16.msra.mxu1 %v7914_v19  ;;  %v224_v36 = vpop.f32.mrb[8].mxu0  ;;  %6117 = vmatpush3.bf16.msra.mxu0 %v7917_v21  ;;  %v7962_v33 = vpack.c.bf16 %v643_v22, %v640_v14  ;;  %v852_v14 = vld [vmem:[#allocation6 + $0x40] sm:$0xff]  ;;  %v857_v22 = vld [vmem:[#allocation6 + $0x68] sm:$0xff] }
 0x120   :  { %v225_v44 = vadd.f32 %v224_v36, %v7886_v38  ;;  %v226_v45 = vpop.f32.mrb[9].mxu0  ;;  %6090 = vmatprep.subr.bf16.mxu1 %v7921_v25  ;;  %6118 = vmatprep.subr.bf16.mxu0 %v9133_v32 }
 0x121   :  { %v227_v50 = vadd.f32 %v226_v45, %v7889_v39  ;;  %441 = vmatprep.mubr.f32.mxu1 %v254_v34  ;;  %551 = vmatprep.mubr.f32.mxu0 %v254_v34  ;;  %9257 = vst [vmem:[#allocation21_spill] sm:$0xff] %v7962_v33  ;;  %v7965_v34 = vpack.c.bf16 %v645_v24, %v642_v23  ;;  %v646_v45 = vld [vmem:[#allocation8 + $0x150] sm:$0xff]  ;;  %v860_v23 = vld [vmem:[#allocation6 + $0x80] sm:$0xff] }
 0x122   :  { %442 = vmatmul.mubr.f32.gmra.mrb[6].mxu1 %v253_v43  ;;  %552 = vmatmul.mubr.f32.gmra.mrb[22].mxu0 %v253_v43  ;;  %v255_v61 = vmax.f32 %v225_v44, 0.0  ;;  %v7969_v44 = vpack.c.bf16 %v650_v28, %v647_v27  ;;  %v8011_v24 = vpack.c.bf16 %v860_v23, %v857_v22  ;;  %v859_v27 = vld [vmem:[#allocation6 + $0x78] sm:$0xff]  ;;  %v858_v28 = vld [vmem:[#allocation6 + $0x70] sm:$0xff]  ;;  %v877_v23 = vld [vmem:[#allocation6 + $0x108] sm:$0xff] }
 0x123   :  { %v256_v55 = vmax.f32 %v227_v50, 0.0  ;;  %6092 = vmatpush1.bf16.msra.mxu1 %v7926_v40  ;;  %v230_v56 = vpop.f32.mrb[10].mxu0  ;;  %6120 = vmatpush3.bf16.msra.mxu0 %v7929_v42  ;;  %9258 = vst [vmem:[#allocation22_spill] sm:$0xff] %v7965_v34  ;;  %v651_v50 = vld [vmem:[#allocation8 + $0x178] sm:$0xff]  ;;  %v874_v22 = vld [vmem:[#allocation6 + $0xf0] sm:$0xff] }
 0x124   :  { %v231_v62 = vadd.f32 %v230_v56, %v7886_v38  ;;  %v232_v63 = vpop.f32.mrb[11].mxu0  ;;  %6094 = vmatprep.subr.bf16.mxu1 %v7933_v46  ;;  %6121 = vmatprep.subr.bf16.mxu0 %v9133_v32  ;;  %9259 = vst [vmem:[#allocation23_spill] sm:$0xff] %v7969_v44  ;;  %v848_v56 = vld [vmem:[#allocation6 + $0x20] sm:$0xff]  ;;  %9268 = vst [vmem:[#allocation32_spill] sm:$0xff] %v8011_v24 }
 0x125   :  { %v233_v7 = vadd.f32 %v232_v63, %v7889_v39  ;;  %447 = vmatprep.mubr.f32.mxu1 %v256_v55  ;;  %556 = vmatprep.mubr.f32.mxu0 %v256_v55  ;;  %v7979_v55 = vpack.c.bf16 %v651_v50, %v648_v49  ;;  %v846_v63 = vld [vmem:[#allocation6 + $0x10] sm:$0xff]  ;;  %v864_v49 = vld [vmem:[#allocation6 + $0xa0] sm:$0xff] }
 0x126   :  { %448 = vmatmul.mubr.f32.gmra.mrb[8].mxu1 %v255_v61  ;;  %557 = vmatmul.mubr.f32.gmra.mrb[24].mxu0 %v255_v61  ;;  %v257_v16 = vmax.f32 %v231_v62, 0.0  ;;  %v844_v61 = vld [vmem:[#allocation6] sm:$0xff]  ;;  %v847_v62 = vld [vmem:[#allocation6 + $0x18] sm:$0xff]  ;;  %v7997_v5 = vpack.c.bf16 %v849_v3, %v846_v63  ;;  %v870_v3 = vld [vmem:[#allocation6 + $0xd0] sm:$0xff] }
 0x127   :  { %v258_v11 = vmax.f32 %v233_v7, 0.0  ;;  %6096 = vmatpush1.bf16.msra.mxu1 %v7938_v57  ;;  %v236_v12 = vpop.f32.mrb[12].mxu0  ;;  %6123 = vmatpush3.bf16.msra.mxu0 %v7941_v60  ;;  %9261 = vst [vmem:[#allocation25_spill] sm:$0xff] %v7979_v55  ;;  %v7994_v2 = vpack.c.bf16 %v847_v62, %v844_v61  ;;  %v851_v7 = vld [vmem:[#allocation6 + $0x38] sm:$0xff]  ;;  %v868_v62 = vld [vmem:[#allocation6 + $0xc0] sm:$0xff] }
 0x128   :  { %v237_v17 = vadd.f32 %v236_v12, %v7886_v38  ;;  %v238_v18 = vpop.f32.mrb[13].mxu0  ;;  %6098 = vmatprep.subr.bf16.mxu1 %v7945_v1  ;;  %6124 = vmatprep.subr.bf16.mxu0 %v9133_v32  ;;  %9264 = vst [vmem:[#allocation28_spill] sm:$0xff] %v7997_v5  ;;  %v8001_v9 = vpack.c.bf16 %v854_v8, %v851_v7  ;;  %v853_v12 = vld [vmem:[#allocation6 + $0x48] sm:$0xff]  ;;  %v871_v63 = vld [vmem:[#allocation6 + $0xd8] sm:$0xff] }
 0x129   :  { %v239_v26 = vadd.f32 %v238_v18, %v7889_v39  ;;  %453 = vmatprep.mubr.f32.mxu1 %v258_v11  ;;  %561 = vmatprep.mubr.f32.mxu0 %v258_v11  ;;  %9263 = vst [vmem:[#allocation27_spill] sm:$0xff] %v7994_v2  ;;  %v850_v11 = vld [vmem:[#allocation6 + $0x30] sm:$0xff]  ;;  %v8034_v7 = vpack.c.bf16 %v871_v63, %v868_v62  ;;  %v873_v8 = vld [vmem:[#allocation6 + $0xe8] sm:$0xff]  ;;  %v887_v62 = vld [vmem:[#allocation6 + $0x158] sm:$0xff] }
 0x12a   :  { %454 = vmatmul.mubr.f32.gmra.mrb[10].mxu1 %v257_v16  ;;  %562 = vmatmul.mubr.f32.gmra.mrb[26].mxu0 %v257_v16  ;;  %v259_v36 = vmax.f32 %v237_v17, 0.0  ;;  %9265 = vst [vmem:[#allocation29_spill] sm:$0xff] %v8001_v9  ;;  %v8004_v16 = vpack.c.bf16 %v853_v12, %v850_v11  ;;  %v855_v17 = vld [vmem:[#allocation6 + $0x58] sm:$0xff]  ;;  %v8037_v11 = vpack.c.bf16 %v873_v8, %v870_v3  ;;  %v890_v63 = vld [vmem:[#allocation6 + $0x170] sm:$0xff] }
 0x12b   :  { %v260_v29 = vmax.f32 %v239_v26, 0.0  ;;  %6100 = vmatpush1.bf16.msra.mxu1 %v7950_v13  ;;  %v242_v30 = vpop.f32.mrb[14].mxu0  ;;  %6126 = vmatpush3.bf16.msra.mxu0 %v7953_v15  ;;  %v8007_v18 = vpack.c.bf16 %v855_v17, %v852_v14  ;;  %v856_v26 = vld [vmem:[#allocation6 + $0x60] sm:$0xff]  ;;  %9275 = vst [vmem:[#allocation39_spill] sm:$0xff] %v8034_v7  ;;  %v875_v12 = vld [vmem:[#allocation6 + $0xf8] sm:$0xff]  ;;  %v878_v14 = vld [vmem:[#allocation6 + $0x110] sm:$0xff]  ;;  %v8058_v8 = vpack.c.bf16 %v890_v63, %v887_v62 }
 0x12c   :  { %v243_v41 = vadd.f32 %v242_v30, %v7886_v38  ;;  %v244_v43 = vpop.f32.mrb[15].mxu0  ;;  %6102 = vmatprep.subr.bf16.mxu1 %v7957_v20  ;;  %6127 = vmatprep.subr.bf16.mxu0 %v9133_v32  ;;  %v7974_v38 = vpack.c.bf16 %v649_v47, %v646_v45  ;;  %9266 = vst [vmem:[#allocation30_spill] sm:$0xff] %v8004_v16  ;;  %v861_v30 = vld [vmem:[#allocation6 + $0x88] sm:$0xff]  ;;  %v862_v47 = vld [vmem:[#allocation6 + $0x90] sm:$0xff]  ;;  %9276 = vst [vmem:[#allocation40_spill] sm:$0xff] %v8037_v11 }
 0x12d   :  { %v245_v48 = vadd.f32 %v244_v43, %v7889_v39  ;;  %459 = vmatprep.mubr.f32.mxu1 %v260_v29  ;;  %566 = vmatprep.mubr.f32.mxu0 %v260_v29  ;;  %v845_v39 = vld [vmem:[#allocation6 + $0x8] sm:$0xff]  ;;  %9267 = vst [vmem:[#allocation31_spill] sm:$0xff] %v8007_v18  ;;  %v8014_v29 = vpack.c.bf16 %v859_v27, %v856_v26  ;;  %v866_v43 = vld [vmem:[#allocation6 + $0xb0] sm:$0xff]  ;;  %v876_v26 = vld [vmem:[#allocation6 + $0x100] sm:$0xff] }
 0x12e   :  { %460 = vmatmul.mubr.f32.gmra.mrb[12].mxu1 %v259_v36  ;;  %567 = vmatmul.mubr.f32.gmra.mrb[28].mxu0 %v259_v36  ;;  %9260 = vst [vmem:[#allocation24_spill] sm:$0xff] %v7974_v38  ;;  %v261_v53 = vmax.f32 %v243_v41, 0.0  ;;  %v7992_v59 = vpack.c.bf16 %v848_v56, %v845_v39  ;;  %v8017_v36 = vpack.c.bf16 %v861_v30, %v858_v28  ;;  %v863_v41 = vld [vmem:[#allocation6 + $0x98] sm:$0xff]  ;;  %v869_v39 = vld [vmem:[#allocation6 + $0xc8] sm:$0xff]  ;;  %v872_v56 = vld [vmem:[#allocation6 + $0xe0] sm:$0xff] }
 0x12f   :  { %v262_v51 = vmax.f32 %v245_v48, 0.0  ;;  %6104 = vmatpush1.bf16.msra.mxu1 %v7962_v33  ;;  %6129 = vmatpush3.bf16.msra.mxu0 %v7965_v34  ;;  %9269 = vst [vmem:[#allocation33_spill] sm:$0xff] %v8014_v29  ;;  %v8021_v45 = vpack.c.bf16 %v866_v43, %v863_v41  ;;  %v865_v48 = vld [vmem:[#allocation6 + $0xa8] sm:$0xff]  ;;  %v8031_v61 = vpack.c.bf16 %v872_v56, %v869_v39  ;;  %v879_v28 = vld [vmem:[#allocation6 + $0x118] sm:$0xff]  ;;  %v884_v41 = vld [vmem:[#allocation6 + $0x140] sm:$0xff] }
 0x130   :  { %6106 = vmatprep.subr.bf16.mxu1 %v7969_v44  ;;  %6130 = vmatprep.subr.bf16.mxu0 %v9133_v32  ;;  %9262 = vst [vmem:[#allocation26_spill] sm:$0xff] %v7992_v59  ;;  %9270 = vst [vmem:[#allocation34_spill] sm:$0xff] %v8017_v36  ;;  %v8024_v50 = vpack.c.bf16 %v865_v48, %v862_v47  ;;  %v8041_v17 = vpack.c.bf16 %v878_v14, %v875_v12  ;;  %v881_v30 = vld [vmem:[#allocation6 + $0x128] sm:$0xff]  ;;  %v880_v48 = vld [vmem:[#allocation6 + $0x120] sm:$0xff] }
 0x131   :  { %465 = vmatprep.mubr.f32.mxu1 %v262_v51  ;;  %571 = vmatprep.mubr.f32.mxu0 %v262_v51  ;;  %9271 = vst [vmem:[#allocation35_spill] sm:$0xff] %v8021_v45  ;;  %v867_v51 = vld [vmem:[#allocation6 + $0xb8] sm:$0xff]  ;;  %9274 = vst [vmem:[#allocation38_spill] sm:$0xff] %v8031_v61  ;;  %v8044_v27 = vpack.c.bf16 %v877_v23, %v874_v22  ;;  %v8047_v43 = vpack.c.bf16 %v879_v28, %v876_v26  ;;  %v885_v56 = vld [vmem:[#allocation6 + $0x148] sm:$0xff] }
 0x132   :  { %466 = vmatmul.mubr.f32.gmra.mrb[14].mxu1 %v261_v53  ;;  %572 = vmatmul.mubr.f32.gmra.mrb[30].mxu0 %v261_v53  ;;  %9272 = vst [vmem:[#allocation36_spill] sm:$0xff] %v8024_v50  ;;  %v8027_v53 = vpack.c.bf16 %v867_v51, %v864_v49  ;;  %9277 = vst [vmem:[#allocation41_spill] sm:$0xff] %v8041_v17  ;;  %v8049_v47 = vpack.c.bf16 %v884_v41, %v881_v30  ;;  %v883_v49 = vld [vmem:[#allocation6 + $0x138] sm:$0xff]  ;;  %v882_v51 = vld [vmem:[#allocation6 + $0x130] sm:$0xff] }
 0x133   :  { %6108 = vmatpush1.bf16.msra.mxu1 %v7974_v38  ;;  %716 = vmatprep.mubr.f32.mxu1 %v9127_v0  ;;  %9278 = vst [vmem:[#allocation42_spill] sm:$0xff] %v8044_v27  ;;  %9279 = vst [vmem:[#allocation43_spill] sm:$0xff] %v8047_v43  ;;  %v8052_v39 = vpack.c.bf16 %v883_v49, %v880_v48  ;;  %v8056_v3 = vpack.c.bf16 %v885_v56, %v882_v51  ;;  %v886_v12 = vld [vmem:[#allocation6 + $0x150] sm:$0xff]  ;;  %v889_v14 = vld [vmem:[#allocation6 + $0x168] sm:$0xff] }
 0x134   :  { %6132 = vmatpush3.bf16.msra.mxu0 %v7979_v55  ;;  %5173 = vmatprep.mubr.msk.f32.mxu0 %vm7727_vm2, %v9127_v0  ;;  %9273 = vst [vmem:[#allocation37_spill] sm:$0xff] %v8027_v53  ;;  %9280 = vst [vmem:[#allocation44_spill] sm:$0xff] %v8049_v47  ;;  %v888_v22 = vld [vmem:[#allocation6 + $0x160] sm:$0xff]  ;;  %v891_v23 = vld [vmem:[#allocation6 + $0x178] sm:$0xff]  ;;  %v8062_v30 = vpack.c.bf16 %v889_v14, %v886_v12 }
 0x135   :  { %6165 = vmatprep.subr.bf16.mxu1 %v9133_v32  ;;  %6134 = vmatprep.subr.bf16.mxu0 %v7992_v59  ;;  %9281 = vst [vmem:[#allocation45_spill] sm:$0xff] %v8052_v39  ;;  %9282 = vst [vmem:[#allocation46_spill] sm:$0xff] %v8056_v3  ;;  %v1035_v26 = vld [vmem:[#allocation8 + $0x188] sm:$0xff]  ;;  %v1038_v28 = vld [vmem:[#allocation8 + $0x1a0] sm:$0xff]  ;;  %v8066_v41 = vpack.c.bf16 %v891_v23, %v888_v22 }
 0x136   :  { %717 = vmatmul.mubr.f32.vlgmr.msra.gmra.mrb[0].mxu1 %v9127_v0  ;;  %9283 = vst [vmem:[#allocation47_spill] sm:$0xff] %v8058_v8  ;;  %9284 = vst [vmem:[#allocation48_spill] sm:$0xff] %v8062_v30  ;;  %v8068_v48 = vpack.c.bf16 %v1038_v28, %v1035_v26  ;;  %v4640_v14 = vld [vmem:[%s9124_s7] ss:$0 sm:$0xff] }
 0x137   :  { %5174 = vmatmul.mubr.f32.vlgmr.msra.gmra.mrb[32].mxu0 %v9127_v0  ;;  %5208 = vmatprep.mubr.msk.f32.mxu1 %vm7727_vm2, %v9127_v0  ;;  %9285 = vst [vmem:[#allocation49_spill] sm:$0xff] %v8066_v41 }
 0x138   :  { %956 = vmatprep.mubr.f32.mxu0 %v9127_v0  ;;  %6136 = vmatpush1.bf16.msra.mxu0 %v7994_v2  ;;  %9286 = vst [vmem:[#allocation50_spill] sm:$0xff] %v8068_v48 }
 0x139   :  { %6167 = vmatpush3.bf16.msra.mxu1 %v7997_v5  ;;  %6138 = vmatprep.subr.bf16.mxu0 %v8001_v9 }
 0x13a   :  { %6168 = vmatprep.subr.bf16.mxu1 %v9133_v32 }
 0x13c   :  { %6140 = vmatpush1.bf16.msra.mxu0 %v8004_v16 }
 0x13d   :  { %6170 = vmatpush3.bf16.msra.mxu1 %v8007_v18  ;;  %6142 = vmatprep.subr.bf16.mxu0 %v8011_v24 }
 0x13e   :  { %6171 = vmatprep.subr.bf16.mxu1 %v9133_v32 }
 0x140   :  { %6144 = vmatpush1.bf16.msra.mxu0 %v8014_v29 }
 0x141   :  { %6173 = vmatpush3.bf16.msra.mxu1 %v8017_v36  ;;  %6146 = vmatprep.subr.bf16.mxu0 %v8021_v45 }
 0x142   :  { %6174 = vmatprep.subr.bf16.mxu1 %v9133_v32 }
 0x144   :  { %6148 = vmatpush1.bf16.msra.mxu0 %v8024_v50 }
 0x145   :  { %6176 = vmatpush3.bf16.msra.mxu1 %v8027_v53  ;;  %6150 = vmatprep.subr.bf16.mxu0 %v8031_v61 }
 0x146   :  { %6177 = vmatprep.subr.bf16.mxu1 %v9133_v32 }
 0x148   :  { %6152 = vmatpush1.bf16.msra.mxu0 %v8034_v7 }
 0x149   :  { %6179 = vmatpush3.bf16.msra.mxu1 %v8037_v11  ;;  %6154 = vmatprep.subr.bf16.mxu0 %v8041_v17 }
 0x14a   :  { %6180 = vmatprep.subr.bf16.mxu1 %v9133_v32 }
 0x14c   :  { %6156 = vmatpush1.bf16.msra.mxu0 %v8044_v27 }
 0x14d   :  { %6182 = vmatpush3.bf16.msra.mxu1 %v8047_v43  ;;  %6158 = vmatprep.subr.bf16.mxu0 %v8049_v47 }
 0x14e   :  { %6183 = vmatprep.subr.bf16.mxu1 %v9133_v32 }
 0x150   :  { %6160 = vmatpush1.bf16.msra.mxu0 %v8052_v39 }
 0x151   :  { %6185 = vmatpush3.bf16.msra.mxu1 %v8056_v3  ;;  %6162 = vmatprep.subr.bf16.mxu0 %v8058_v8 }
 0x152   :  { %6186 = vmatprep.subr.bf16.mxu1 %v9133_v32 }
 0x154   :  { %6164 = vmatpush1.bf16.msra.mxu0 %v8062_v30 }
 0x155   :  { %6188 = vmatpush3.bf16.msra.mxu1 %v8066_v41  ;;  %6190 = vmatprep.subr.bf16.mxu0 %v8068_v48 }
 0x156   :  { %6221 = vmatprep.subr.bf16.mxu1 %v9133_v32 }
 0x1e9   :  { %v4709_v49 = vpop.f32.mrb[16].mxu0 }
 0x1ea   :  { %v4710_v51 = vpop.f32.mrb[17].mxu0 }
 0x1eb   :  { %v4711_v56 = vadd.f32 %v4710_v51, %v4709_v49 }
 0x1ed   :  { %v4712_v62 = vpop.f32.mrb[18].mxu0 }
 0x1ee   :  { %v4713_v63 = vpop.f32.mrb[19].mxu0 }
 0x1ef   :  { %v4714_v12 = vadd.f32 %v4713_v63, %v4712_v62 }
 0x1f1   :  { %v8078_v22 = vadd.f32 %v4714_v12, %v4640_v14  ;;  %v4715_v23 = vpop.f32.mrb[20].mxu0 }
 0x1f2   :  { %v4716_v26 = vpop.f32.mrb[21].mxu0 }
 0x1f3   :  { %9287 = vst [vmem:[#allocation51_spill] sm:$0xff] %v8078_v22  ;;  %v4717_v28 = vadd.f32 %v4716_v26, %v4715_v23  ;;  %v795_v26 = vld [vmem:[%s9123_s6] sm:$0x3] }
 0x1f5   :  { %v8080_v0 = vadd.f32 %v4717_v28, %v4640_v14  ;;  %v4718_v48 = vpop.f32.mrb[22].mxu0  ;;  %v8094_v28 = vrot.slane %v795_v26, %v7878_v35 }
 0x1f6   :  { %v4719_v41 = vpop.f32.mrb[23].mxu0 }
 0x1f7   :  { %9288 = vst [vmem:[#allocation52_spill] sm:$0xff] %v8080_v0  ;;  %v4720_v32 = vadd.f32 %v4719_v41, %v4718_v48  ;;  %9293 = vst [vmem:[#allocation57_spill] sm:$0xff] %v8094_v28 }
 0x1f9   :  { %v8082_v30 = vadd.f32 %v4720_v32, %v4640_v14  ;;  %v4721_v49 = vpop.f32.mrb[24].mxu0 }
 0x1fa   :  { %v4722_v51 = vpop.f32.mrb[25].mxu0 }
 0x1fb   :  { %9289 = vst [vmem:[#allocation53_spill] sm:$0xff] %v8082_v30  ;;  %v4723_v8 = vadd.f32 %v4722_v51, %v4721_v49 }
 0x1fd   :  { %v8084_v62 = vadd.f32 %v4723_v8, %v4640_v14  ;;  %v4724_v63 = vpop.f32.mrb[26].mxu0 }
 0x1fe   :  { %v4725_v3 = vpop.f32.mrb[27].mxu0 }
 0x1ff   :  { %9290 = vst [vmem:[#allocation54_spill] sm:$0xff] %v8084_v62  ;;  %v4726_v39 = vadd.f32 %v4725_v3, %v4724_v63 }
 0x201   :  { %v8086_v12 = vadd.f32 %v4726_v39, %v4640_v14  ;;  %v4727_v22 = vpop.f32.mrb[28].mxu0  ;;  %v8099_v39 = vrot.slane %v795_v26, %v7883_v37  ;;  %v8106_v26 = vld [vmem:[%s9125_s8] ss:$0 sm:$0xff] }
 0x202   :  { %v4728_v47 = vpop.f32.mrb[29].mxu0 }
 0x203   :  { %9291 = vst [vmem:[#allocation55_spill] sm:$0xff] %v8086_v12  ;;  %v4729_v23 = vadd.f32 %v4728_v47, %v4727_v22  ;;  %9295 = vst [vmem:[#allocation59_spill] sm:$0xff] %v8099_v39 }
 0x205   :  { %v8091_v41 = vadd.f32 %v4729_v23, %v4640_v14  ;;  %v4730_v32 = vpop.f32.mrb[30].mxu0 }
 0x206   :  { %v4731_v48 = vpop.f32.mrb[31].mxu0 }
 0x207   :  { %9292 = vst [vmem:[#allocation56_spill] sm:$0xff] %v8091_v41  ;;  %v4732_v8 = vadd.f32 %v4731_v48, %v4730_v32 }
 0x209   :  { %v8096_v49 = vadd.f32 %v4732_v8, %v4640_v14  ;;  %v718_v3 = vpop.f32.mrb[0].mxu1 }
 0x20a   :  { %v807_v47 = vadd.f32 %v8094_v28, %v718_v3  ;;  %v720_v22 = vpop.f32.mrb[1].mxu1  ;;  %v789_v51 = vpop.f32.mrb[32].mxu0  ;;  %v1044_v28 = vld [vmem:[#allocation8 + $0x1d0] sm:$0xff] }
 0x20b   :  { %9294 = vst [vmem:[#allocation58_spill] sm:$0xff] %v8096_v49  ;;  %v5175_v63 = vpop.f32.mrb[33].mxu0  ;;  %v808_v23 = vadd.f32 %v8099_v39, %v720_v22  ;;  %v836_v8 = vadd.f32 %v8106_v26, %v789_v51  ;;  %v1039_v49 = vld [vmem:[#allocation8 + $0x1a8] sm:$0xff]  ;;  %v1041_v39 = vld [vmem:[#allocation8 + $0x1b8] sm:$0xff] }
 0x20c   :  { %v4638_v12 = vmul.f32 -1.442695, %v807_v47  ;;  %v828_v63 = vadd.f32 %v4711_v56, %v4640_v14  ;;  %v1040_v56 = vld [vmem:[#allocation8 + $0x1b0] sm:$0xff] }
 0x20d   :  { %v4639_v41 = vmul.f32 -1.442695, %v808_v23 }
 0x20e   :  { %7462 = vpow2.f32 %v4638_v12 }
 0x20f   :  { %7464 = vpow2.f32 %v4639_v41  ;;  %v1034_v41 = vld [vmem:[#allocation8 + $0x180] sm:$0xff] }
 0x218   :  { %v7463_v62 = vpop.eup %7462 }
 0x219   :  { %v815_v30 = vadd.f32 1.0, %v7463_v62  ;;  %v7465_v32 = vpop.eup %7464  ;;  %v1037_v62 = vld [vmem:[#allocation8 + $0x198] sm:$0xff] }
 0x21a   :  { %v816_v48 = vadd.f32 1.0, %v7465_v32  ;;  %v8109_v32 = vpack.c.bf16 %v1037_v62, %v1034_v41  ;;  %v1051_v41 = vld [vmem:[#allocation8 + $0x208] sm:$0xff]  ;;  %v1056_v62 = vld [vmem:[#allocation8 + $0x230] sm:$0xff] }
 0x21b   :  { %7466 = vrcp.f32 %v815_v30  ;;  %v1036_v30 = vld [vmem:[#allocation8 + $0x190] sm:$0xff] }
 0x21c   :  { %7468 = vrcp.f32 %v816_v48  ;;  %9296 = vst [vmem:[#allocation60_spill] sm:$0xff] %v8109_v32  ;;  %v8111_v51 = vpack.c.bf16 %v1039_v49, %v1036_v30  ;;  %v8115_v48 = vpack.c.bf16 %v1044_v28, %v1041_v39  ;;  %v1049_v39 = vld [vmem:[#allocation8 + $0x1f8] sm:$0xff]  ;;  %v9303_v30 = vmov 0.0  }
 0x21e   :  { %9297 = vst [vmem:[#allocation61_spill] sm:$0xff] %v8111_v51  ;;  %9298 = vst [vmem:[#allocation62_spill] sm:$0xff] %v8115_v48 }
 0x225   :  { %v7467_v3 = vpop.eup %7466 }
 0x226   :  { %v837_v47 = vmul.f32 %v7467_v3, %v836_v8  ;;  %v7469_v12 = vpop.eup %7468  ;;  %v1043_v8 = vld [vmem:[#allocation8 + $0x1c8] sm:$0xff]  ;;  %v1042_v3 = vld [vmem:[#allocation8 + $0x1c0] sm:$0xff] }
 0x227   :  { %v840_v23 = vsub.f32 1.0, %v7469_v12  ;;  %v842_v35 = vmul.f32 0.0, %v7469_v12  ;;  %v1048_v12 = vld [vmem:[#allocation8 + $0x1f0] sm:$0xff] }
 0x228   :  { %v838_v22 = vadd.f32 %v837_v47, %v828_v63  ;;  %v1045_v63 = vld [vmem:[#allocation8 + $0x1d8] sm:$0xff]  ;;  %v1047_v47 = vld [vmem:[#allocation8 + $0x1e8] sm:$0xff] }
 0x229   :  { %v8123_v49 = vpack.c.bf16 %v1045_v63, %v1042_v3  ;;  %v1052_v3 = vld [vmem:[#allocation8 + $0x210] sm:$0xff] }
 0x22a   :  { %7470 = vtanh.f32 %v838_v22  ;;  %v1050_v22 = vld [vmem:[#allocation8 + $0x200] sm:$0xff] }
 0x22b   :  { %9300 = vst [vmem:[#allocation64_spill] sm:$0xff] %v8123_v49  ;;  %v8127_v28 = vpack.c.bf16 %v1050_v22, %v1047_v47  ;;  %v1055_v47 = vld [vmem:[#allocation8 + $0x228] sm:$0xff]  ;;  %v1054_v22 = vld [vmem:[#allocation8 + $0x220] sm:$0xff] }
 0x22d   :  { %9302 = vst [vmem:[#allocation65_spill] sm:$0xff] %v8127_v28 }
 0x234   :  { %v7471_v0 = vpop.eup %7470 }
 0x235   :  { %v841_v37 = vmul.f32 %v7471_v0, %v840_v23  ;;  %v8121_v0 = vpack.c.bf16 %v1043_v8, %v1040_v56  ;;  %v1053_v23 = vld [vmem:[#allocation8 + $0x218] sm:$0xff]  ;;  %v8136_v8 = vpack.c.bf16 %v1051_v41, %v1048_v12  ;;  %v1058_v12 = vld [vmem:[#allocation8 + $0x240] sm:$0xff] }
 0x236   :  { %v8140_v63 = vpack.c.bf16 %v1056_v62, %v1053_v23  ;;  %v1061_v23 = vld [vmem:[#allocation8 + $0x258] sm:$0xff]  ;;  %v1060_v62 = vld [vmem:[#allocation8 + $0x250] sm:$0xff] }
 0x237   :  { %v8113_v14 = vadd.f32 %v842_v35, %v841_v37  ;;  %9299 = vst [vmem:[#allocation63_spill] sm:$0xff] %v8121_v0  ;;  %v1046_v35 = vld [vmem:[#allocation8 + $0x1e0] sm:$0xff]  ;;  %v9301_v37 = vmov 0.0|0.0   ;;  %9305 = vst [vmem:[#allocation67_spill] sm:$0xff] %v8136_v8 }
 0x238   :  { %v8134_v56 = vpack.c.bf16 %v1049_v39, %v1046_v35  ;;  %9306 = vst [vmem:[#allocation68_spill] sm:$0xff] %v8140_v63  ;;  %v8144_v35 = vpack.c.bf16 %v1055_v47, %v1052_v3  ;;  %v8154_v3 = vpack.c.bf16 %v1061_v23, %v1058_v12  ;;  %v1064_v47 = vld [vmem:[#allocation8 + $0x270] sm:$0xff]  ;;  %v1070_v23 = vld [vmem:[#allocation8 + $0x2a0] sm:$0xff] }
 0x239   :  { %957 = vmatmul.mubr.f32.vlgmr.msra.gmra.mrb[34].mxu0 %v8113_v14  ;;  %5209 = vmatmul.mubr.f32.vlgmr.msra.gmra.mrb[16].mxu1 %v8113_v14 }
 0x23a   :  { %6192 = vmatpush1.bf16.msra.mxu0 %v8109_v32  ;;  %6223 = vmatpush3.bf16.msra.mxu1 %v8111_v51  ;;  %9304 = vst [vmem:[#allocation66_spill] sm:$0xff] %v8134_v56  ;;  %v1059_v51 = vld [vmem:[#allocation8 + $0x248] sm:$0xff]  ;;  %v1062_v32 = vld [vmem:[#allocation8 + $0x260] sm:$0xff]  ;;  %9307 = vst [vmem:[#allocation69_spill] sm:$0xff] %v8144_v35 }
 0x23b   :  { %6194 = vmatprep.subr.bf16.mxu0 %v8115_v48  ;;  %6224 = vmatprep.subr.bf16.mxu1 %v9301_v37  ;;  %v1057_v48 = vld [vmem:[#allocation8 + $0x238] sm:$0xff]  ;;  %v8150_v41 = vpack.c.bf16 %v1062_v32, %v1059_v51  ;;  %v1067_v51 = vld [vmem:[#allocation8 + $0x288] sm:$0xff] }
 0x23c   :  { %1146 = vmatprep.mubr.f32.mxu0 %v9303_v30  ;;  %5243 = vmatprep.mubr.msk.f32.mxu1 %vm7727_vm2, %v9303_v30  ;;  %v8146_v39 = vpack.c.bf16 %v1057_v48, %v1054_v22  ;;  %v1066_v22 = vld [vmem:[#allocation8 + $0x280] sm:$0xff]  ;;  %v8164_v12 = vpack.c.bf16 %v1067_v51, %v1064_v47  ;;  %v1076_v51 = vld [vmem:[#allocation8 + $0x2d0] sm:$0xff] }
 0x23d   :  { %9309 = vst [vmem:[#allocation71_spill] sm:$0xff] %v8150_v41 }
 0x23e   :  { %6196 = vmatpush1.bf16.msra.mxu0 %v8121_v0  ;;  %6226 = vmatpush3.bf16.msra.mxu1 %v8123_v49  ;;  %9308 = vst [vmem:[#allocation70_spill] sm:$0xff] %v8146_v39  ;;  %v1065_v49 = vld [vmem:[#allocation8 + $0x278] sm:$0xff]  ;;  %v1068_v0 = vld [vmem:[#allocation8 + $0x290] sm:$0xff]  ;;  %9311 = vst [vmem:[#allocation73_spill] sm:$0xff] %v8164_v12 }
 0x23f   :  { %6198 = vmatprep.subr.bf16.mxu0 %v8127_v28  ;;  %6227 = vmatprep.subr.bf16.mxu1 %v9301_v37  ;;  %v1063_v28 = vld [vmem:[#allocation8 + $0x268] sm:$0xff]  ;;  %v8160_v32 = vpack.c.bf16 %v1068_v0, %v1065_v49  ;;  %v1073_v49 = vld [vmem:[#allocation8 + $0x2b8] sm:$0xff] }
 0x240   :  { %v8156_v48 = vpack.c.bf16 %v1063_v28, %v1060_v62  ;;  %v1072_v62 = vld [vmem:[#allocation8 + $0x2b0] sm:$0xff]  ;;  %v8174_v47 = vpack.c.bf16 %v1073_v49, %v1070_v23  ;;  %v9316_v49 = vld [vmem:[#allocation48_spill] sm:$0xff] }
 0x241   :  { %9310 = vst [vmem:[#allocation72_spill] sm:$0xff] %v8160_v32 }
 0x242   :  { %6200 = vmatpush1.bf16.msra.mxu0 %v8134_v56  ;;  %6229 = vmatpush3.bf16.msra.mxu1 %v8136_v8  ;;  %v1071_v8 = vld [vmem:[#allocation8 + $0x2a8] sm:$0xff]  ;;  %v1074_v56 = vld [vmem:[#allocation8 + $0x2c0] sm:$0xff] }
 0x243   :  { %6202 = vmatprep.subr.bf16.mxu0 %v8140_v63  ;;  %6230 = vmatprep.subr.bf16.mxu1 %v9301_v37  ;;  %v1069_v63 = vld [vmem:[#allocation8 + $0x298] sm:$0xff]  ;;  %v8170_v0 = vpack.c.bf16 %v1074_v56, %v1071_v8  ;;  %v1079_v8 = vld [vmem:[#allocation8 + $0x2e8] sm:$0xff] }
 0x244   :  { %v8166_v28 = vpack.c.bf16 %v1069_v63, %v1066_v22  ;;  %v1078_v22 = vld [vmem:[#allocation8 + $0x2e0] sm:$0xff] }
 0x246   :  { %6204 = vmatpush1.bf16.msra.mxu0 %v8144_v35  ;;  %6232 = vmatpush3.bf16.msra.mxu1 %v8146_v39  ;;  %v1077_v39 = vld [vmem:[#allocation8 + $0x2d8] sm:$0xff]  ;;  %v1080_v35 = vld [vmem:[#allocation8 + $0x2f0] sm:$0xff] }
 0x247   :  { %6206 = vmatprep.subr.bf16.mxu0 %v8150_v41  ;;  %6233 = vmatprep.subr.bf16.mxu1 %v9301_v37  ;;  %v1075_v41 = vld [vmem:[#allocation8 + $0x2c8] sm:$0xff]  ;;  %v8180_v56 = vpack.c.bf16 %v1080_v35, %v1077_v39  ;;  %v9312_v35 = vld [vmem:[#allocation44_spill] sm:$0xff] }
 0x248   :  { %v8176_v63 = vpack.c.bf16 %v1075_v41, %v1072_v62  ;;  %v9313_v39 = vld [vmem:[#allocation45_spill] sm:$0xff]  ;;  %v9314_v41 = vld [vmem:[#allocation46_spill] sm:$0xff] }
 0x249   :  { %v9317_v62 = vld [vmem:[#allocation49_spill] sm:$0xff] }
 0x24a   :  { %6208 = vmatpush1.bf16.msra.mxu0 %v8154_v3  ;;  %6235 = vmatpush3.bf16.msra.mxu1 %v8156_v48 }
 0x24b   :  { %6210 = vmatprep.subr.bf16.mxu0 %v8160_v32  ;;  %6236 = vmatprep.subr.bf16.mxu1 %v9301_v37  ;;  %v1081_v32 = vld [vmem:[#allocation8 + $0x2f8] sm:$0xff] }
 0x24c   :  { %v8186_v23 = vpack.c.bf16 %v1081_v32, %v1078_v22  ;;  %v9315_v32 = vld [vmem:[#allocation47_spill] sm:$0xff] }
 0x24e   :  { %6212 = vmatpush1.bf16.msra.mxu0 %v8164_v12  ;;  %6238 = vmatpush3.bf16.msra.mxu1 %v8166_v28  ;;  %v8184_v12 = vpack.c.bf16 %v1079_v8, %v1076_v51  ;;  %v9318_v51 = vld [vmem:[#allocation50_spill] sm:$0xff] }
 0x24f   :  { %6214 = vmatprep.subr.bf16.mxu0 %v8170_v0  ;;  %6239 = vmatprep.subr.bf16.mxu1 %v9301_v37 }
 0x252   :  { %6216 = vmatpush1.bf16.msra.mxu0 %v8174_v47  ;;  %6241 = vmatpush3.bf16.msra.mxu1 %v8176_v63 }
 0x253   :  { %6218 = vmatprep.subr.bf16.mxu0 %v8180_v56  ;;  %6242 = vmatprep.subr.bf16.mxu1 %v9301_v37 }
 0x256   :  { %6220 = vmatpush1.bf16.msra.mxu0 %v8184_v12  ;;  %6244 = vmatpush3.bf16.msra.mxu1 %v8186_v23 }
 0x257   :  { %6246 = vmatprep.subr.bf16.mxu1 %v7874_v31  ;;  %6277 = vmatprep.subr.bf16.mxu0 %v9301_v37 }
 0x259   :  { %1147 = vmatmul.mubr.f32.vlgmr.msra.gmra.mrb[34].mxu0 %v9303_v30  ;;  %5244 = vmatmul.mubr.f32.vlgmr.msra.gmra.mrb[18].mxu1 %v9303_v30 }
 0x25a   :  { %6248 = vmatpush1.bf16.msra.mxu1 %v7893_v52  ;;  %6279 = vmatpush3.bf16.msra.mxu0 %v7895_v54 }
 0x25b   :  { %6250 = vmatprep.subr.bf16.mxu1 %v7898_v58  ;;  %6280 = vmatprep.subr.bf16.mxu0 %v9301_v37 }
 0x25c   :  { %1344 = vmatprep.mubr.f32.mxu1 %v9303_v30  ;;  %5278 = vmatprep.mubr.msk.f32.mxu0 %vm7727_vm2, %v9303_v30 }
 0x25e   :  { %6252 = vmatpush1.bf16.msra.mxu1 %v7902_v4  ;;  %6282 = vmatpush3.bf16.msra.mxu0 %v7905_v6 }
 0x25f   :  { %6254 = vmatprep.subr.bf16.mxu1 %v7909_v10  ;;  %6283 = vmatprep.subr.bf16.mxu0 %v9301_v37 }
 0x262   :  { %6256 = vmatpush1.bf16.msra.mxu1 %v7914_v19  ;;  %6285 = vmatpush3.bf16.msra.mxu0 %v7917_v21 }
 0x263   :  { %6258 = vmatprep.subr.bf16.mxu1 %v7921_v25  ;;  %6286 = vmatprep.subr.bf16.mxu0 %v9301_v37 }
 0x266   :  { %6260 = vmatpush1.bf16.msra.mxu1 %v7926_v40  ;;  %6288 = vmatpush3.bf16.msra.mxu0 %v7929_v42 }
 0x267   :  { %6262 = vmatprep.subr.bf16.mxu1 %v7933_v46  ;;  %6289 = vmatprep.subr.bf16.mxu0 %v9301_v37 }
 0x26a   :  { %6264 = vmatpush1.bf16.msra.mxu1 %v7938_v57  ;;  %6291 = vmatpush3.bf16.msra.mxu0 %v7941_v60 }
 0x26b   :  { %6266 = vmatprep.subr.bf16.mxu1 %v7945_v1  ;;  %6292 = vmatprep.subr.bf16.mxu0 %v9301_v37 }
 0x26e   :  { %6268 = vmatpush1.bf16.msra.mxu1 %v7950_v13  ;;  %6294 = vmatpush3.bf16.msra.mxu0 %v7953_v15 }
 0x26f   :  { %6270 = vmatprep.subr.bf16.mxu1 %v7957_v20  ;;  %6295 = vmatprep.subr.bf16.mxu0 %v9301_v37 }
 0x272   :  { %6272 = vmatpush1.bf16.msra.mxu1 %v7962_v33  ;;  %6297 = vmatpush3.bf16.msra.mxu0 %v7965_v34 }
 0x273   :  { %6274 = vmatprep.subr.bf16.mxu1 %v7969_v44  ;;  %6298 = vmatprep.subr.bf16.mxu0 %v9301_v37 }
 0x276   :  { %6276 = vmatpush1.bf16.msra.mxu1 %v7974_v38  ;;  %6300 = vmatpush3.bf16.msra.mxu0 %v7979_v55 }
 0x277   :  { %6302 = vmatprep.subr.bf16.mxu0 %v7992_v59  ;;  %6333 = vmatprep.subr.bf16.mxu1 %v9301_v37 }
 0x279   :  { %1345 = vmatmul.mubr.f32.vlgmr.msra.gmra.mrb[2].mxu1 %v8113_v14  ;;  %5279 = vmatmul.mubr.f32.vlgmr.msra.gmra.mrb[36].mxu0 %v8113_v14 }
 0x27a   :  { %6304 = vmatpush1.bf16.msra.mxu0 %v7994_v2  ;;  %6335 = vmatpush3.bf16.msra.mxu1 %v7997_v5 }
 0x27b   :  { %6306 = vmatprep.subr.bf16.mxu0 %v8001_v9  ;;  %6336 = vmatprep.subr.bf16.mxu1 %v9301_v37 }
 0x27c   :  { %1510 = vmatprep.mubr.f32.mxu0 %v9303_v30  ;;  %5313 = vmatprep.mubr.msk.f32.mxu1 %vm7727_vm2, %v9303_v30 }
 0x27e   :  { %6308 = vmatpush1.bf16.msra.mxu0 %v8004_v16  ;;  %6338 = vmatpush3.bf16.msra.mxu1 %v8007_v18 }
 0x27f   :  { %6310 = vmatprep.subr.bf16.mxu0 %v8011_v24  ;;  %6339 = vmatprep.subr.bf16.mxu1 %v9301_v37 }
 0x282   :  { %6312 = vmatpush1.bf16.msra.mxu0 %v8014_v29  ;;  %6341 = vmatpush3.bf16.msra.mxu1 %v8017_v36 }
 0x283   :  { %6314 = vmatprep.subr.bf16.mxu0 %v8021_v45  ;;  %6342 = vmatprep.subr.bf16.mxu1 %v9301_v37  ;;  %v9325_v45 = vld [vmem:[#allocation59_spill] sm:$0xff] }
 0x286   :  { %6316 = vmatpush1.bf16.msra.mxu0 %v8024_v50  ;;  %6344 = vmatpush3.bf16.msra.mxu1 %v8027_v53  ;;  %v8282_v50 = vld [vmem:[%s9125_s8 + $0x1] ss:$0 sm:$0xff] }
 0x287   :  { %6318 = vmatprep.subr.bf16.mxu0 %v8031_v61  ;;  %6345 = vmatprep.subr.bf16.mxu1 %v9301_v37  ;;  %9323 = vst [vmem:[#allocation74_spill] sm:$0xff] %v8282_v50 }
 0x28a   :  { %6320 = vmatpush1.bf16.msra.mxu0 %v8034_v7  ;;  %6347 = vmatpush3.bf16.msra.mxu1 %v8037_v11 }
 0x28b   :  { %6322 = vmatprep.subr.bf16.mxu0 %v8041_v17  ;;  %6348 = vmatprep.subr.bf16.mxu1 %v9301_v37 }
 0x28e   :  { %6324 = vmatpush1.bf16.msra.mxu0 %v8044_v27  ;;  %6350 = vmatpush3.bf16.msra.mxu1 %v8047_v43  ;;  %v9321_v27 = vld [vmem:[#allocation14_spill] sm:$0xff] }
 0x28f   :  { %6326 = vmatprep.subr.bf16.mxu0 %v9312_v35  ;;  %6351 = vmatprep.subr.bf16.mxu1 %v9301_v37  ;;  %v9319_v35 = vld [vmem:[#allocation13_spill] sm:$0xff] }
 0x292   :  { %6328 = vmatpush1.bf16.msra.mxu0 %v9313_v39  ;;  %6353 = vmatpush3.bf16.msra.mxu1 %v9314_v41  ;;  %v4642_v39 = vld [vmem:[%s9123_s6 + $0x2] sm:$0x3] }
 0x293   :  { %6330 = vmatprep.subr.bf16.mxu0 %v9315_v32  ;;  %6354 = vmatprep.subr.bf16.mxu1 %v9301_v37  ;;  %v8272_v41 = vrot.slane %v4642_v39, %v9319_v35  ;;  %v8275_v17 = vrot.slane %v4642_v39, %v9321_v27  ;;  %v8287_v39 = vld [vmem:[%s9124_s7 + $0x1] ss:$0 sm:$0xff] }
 0x295   :  { %9320 = vst [vmem:[#allocation13_spill] sm:$0xff] %v8272_v41  ;;  %9322 = vst [vmem:[#allocation14_spill] sm:$0xff] %v8275_v17 }
 0x296   :  { %6332 = vmatpush1.bf16.msra.mxu0 %v9316_v49  ;;  %6356 = vmatpush3.bf16.msra.mxu1 %v9317_v62 }
 0x297   :  { %6358 = vmatprep.subr.bf16.mxu0 %v9318_v51  ;;  %6389 = vmatprep.subr.bf16.mxu1 %v9301_v37 }
 0x30c   :  { %v1029_v8 = vpop.f32.mrb[16].mxu1 }
 0x30d   :  { %v5210_v22 = vpop.f32.mrb[17].mxu1 }
 0x32c   :  { %v1148_v32 = vpop.f32.mrb[34].mxu0  ;;  %v1219_v43 = vpop.f32.mrb[18].mxu1 }
 0x32d   :  { %v1238_v62 = vadd.f32 %v8272_v41, %v1148_v32  ;;  %v1150_v49 = vpop.f32.mrb[35].mxu0  ;;  %v5245_v51 = vpop.f32.mrb[19].mxu1  ;;  %v1269_v32 = vadd.f32 %v8282_v50, %v1219_v43 }
 0x32e   :  { %v1239_v7 = vadd.f32 %v8275_v17, %v1150_v49  ;;  %v9324_v51 = vld [vmem:[#allocation57_spill] sm:$0xff] }
 0x32f   :  { %v4643_v11 = vmul.f32 -1.442695, %v1238_v62 }
 0x330   :  { %v4644_v22 = vmul.f32 -1.442695, %v1239_v7  ;;  %v1260_v7 = vadd.f32 %v8287_v39, %v1029_v8 }
 0x331   :  { %7472 = vpow2.f32 %v4643_v11 }
 0x332   :  { %7474 = vpow2.f32 %v4644_v22 }
 0x33b   :  { %v7473_v61 = vpop.eup %7472 }
 0x33c   :  { %v1246_v53 = vadd.f32 1.0, %v7473_v61  ;;  %v7475_v35 = vpop.eup %7474 }
 0x33d   :  { %v1247_v27 = vadd.f32 1.0, %v7475_v35 }
 0x33e   :  { %7476 = vrcp.f32 %v1246_v53 }
 0x33f   :  { %7478 = vrcp.f32 %v1247_v27 }
 0x348   :  { %v7477_v11 = vpop.eup %7476 }
 0x349   :  { %v1270_v49 = vmul.f32 %v7477_v11, %v1269_v32  ;;  %v7479_v29 = vpop.eup %7478 }
 0x34a   :  { %v1273_v43 = vsub.f32 1.0, %v7479_v29  ;;  %v1275_v32 = vmul.f32 0.0, %v7479_v29 }
 0x34b   :  { %v1271_v53 = vadd.f32 %v1270_v49, %v1260_v7 }
 0x34c   :  { %v1346_v61 = vpop.f32.mrb[2].mxu1  ;;  %v1417_v62 = vpop.f32.mrb[36].mxu0 }
 0x34d   :  { %7480 = vtanh.f32 %v1271_v53  ;;  %v1423_v22 = vadd.f32 %v1346_v61, %v9324_v51  ;;  %v1348_v17 = vpop.f32.mrb[3].mxu1  ;;  %v5280_v35 = vpop.f32.mrb[37].mxu0  ;;  %v1438_v61 = vadd.f32 %v8106_v26, %v1417_v62  ;;  %v9328_v62 = vld [vmem:[#allocation61_spill] sm:$0xff] }
 0x34e   :  { %v1424_v36 = vadd.f32 %v1348_v17, %v9325_v45  ;;  %v9326_v17 = vld [vmem:[#allocation51_spill] sm:$0xff] }
 0x34f   :  { %v4649_v41 = vmul.f32 -1.442695, %v1423_v22 }
 0x350   :  { %v4650_v24 = vmul.f32 -1.442695, %v1424_v36 }
 0x351   :  { %7482 = vpow2.f32 %v4649_v41 }
 0x352   :  { %7484 = vpow2.f32 %v4650_v24 }
 0x357   :  { %v7481_v50 = vpop.eup %7480 }
 0x358   :  { %v1274_v8 = vmul.f32 %v7481_v50, %v1273_v43 }
 0x35a   :  { %v8293_v27 = vadd.f32 %v1275_v32, %v1274_v8  ;;  %v9327_v8 = vld [vmem:[#allocation60_spill] sm:$0xff]  ;;  %v9329_v32 = vld [vmem:[#allocation62_spill] sm:$0xff] }
 0x35b   :  { %v7483_v11 = vpop.eup %7482 }
 0x35c   :  { %v1431_v7 = vadd.f32 1.0, %v7483_v11  ;;  %v7485_v49 = vpop.eup %7484  ;;  %v9332_v11 = vld [vmem:[#allocation65_spill] sm:$0xff] }
 0x35d   :  { %v1432_v53 = vadd.f32 1.0, %v7485_v49  ;;  %v9334_v49 = vld [vmem:[#allocation67_spill] sm:$0xff] }
 0x35e   :  { %7486 = vrcp.f32 %v1431_v7  ;;  %v9333_v7 = vld [vmem:[#allocation66_spill] sm:$0xff] }
 0x35f   :  { %7488 = vrcp.f32 %v1432_v53  ;;  %v9335_v53 = vld [vmem:[#allocation68_spill] sm:$0xff] }
 0x368   :  { %v7487_v22 = vpop.eup %7486 }
 0x369   :  { %v1439_v35 = vmul.f32 %v7487_v22, %v1438_v61  ;;  %v7489_v36 = vpop.eup %7488  ;;  %v9336_v61 = vld [vmem:[#allocation69_spill] sm:$0xff]  ;;  %v9337_v22 = vld [vmem:[#allocation70_spill] sm:$0xff] }
 0x36a   :  { %v1442_v45 = vsub.f32 1.0, %v7489_v36  ;;  %v1444_v29 = vmul.f32 %v7489_v36, %v8113_v14  ;;  %v9331_v14 = vld [vmem:[#allocation64_spill] sm:$0xff] }
 0x36b   :  { %v1440_v41 = vadd.f32 %v1439_v35, %v9326_v17  ;;  %v9338_v35 = vld [vmem:[#allocation71_spill] sm:$0xff]  ;;  %v9339_v17 = vld [vmem:[#allocation72_spill] sm:$0xff] }
 0x36c   :  { %v9341_v36 = vld [vmem:[#allocation32_spill] sm:$0xff] }
 0x36d   :  { %7490 = vtanh.f32 %v1440_v41  ;;  %v9340_v41 = vld [vmem:[#allocation73_spill] sm:$0xff] }
 0x377   :  { %v7491_v24 = vpop.eup %7490 }
 0x378   :  { %v1443_v50 = vmul.f32 %v7491_v24, %v1442_v45  ;;  %v9330_v45 = vld [vmem:[#allocation63_spill] sm:$0xff]  ;;  %v9342_v24 = vld [vmem:[#allocation33_spill] sm:$0xff] }
 0x37a   :  { %v8298_v43 = vadd.f32 %v1444_v29, %v1443_v50  ;;  %v9343_v50 = vld [vmem:[#allocation34_spill] sm:$0xff]  ;;  %v9344_v29 = vld [vmem:[#allocation35_spill] sm:$0xff] }
 0x37c   :  { %1511 = vmatmul.mubr.f32.vlgmr.msra.gmra.mrb[38].mxu0 %v8298_v43  ;;  %5314 = vmatmul.mubr.f32.vlgmr.msra.gmra.mrb[20].mxu1 %v8298_v43 }
 0x37d   :  { %6360 = vmatpush1.bf16.msra.mxu0 %v9327_v8  ;;  %6391 = vmatpush3.bf16.msra.mxu1 %v9328_v62 }
 0x37e   :  { %6362 = vmatprep.subr.bf16.mxu0 %v9329_v32  ;;  %6392 = vmatprep.subr.bf16.mxu1 %v9301_v37 }
 0x37f   :  { %1651 = vmatprep.mubr.f32.mxu0 %v9303_v30  ;;  %5348 = vmatprep.mubr.msk.f32.mxu1 %vm7727_vm2, %v9303_v30 }
 0x381   :  { %6364 = vmatpush1.bf16.msra.mxu0 %v9330_v45  ;;  %6394 = vmatpush3.bf16.msra.mxu1 %v9331_v14 }
 0x382   :  { %6366 = vmatprep.subr.bf16.mxu0 %v9332_v11  ;;  %6395 = vmatprep.subr.bf16.mxu1 %v9301_v37 }
 0x385   :  { %6368 = vmatpush1.bf16.msra.mxu0 %v9333_v7  ;;  %6397 = vmatpush3.bf16.msra.mxu1 %v9334_v49 }
 0x386   :  { %6370 = vmatprep.subr.bf16.mxu0 %v9335_v53  ;;  %6398 = vmatprep.subr.bf16.mxu1 %v9301_v37 }
 0x389   :  { %6372 = vmatpush1.bf16.msra.mxu0 %v9336_v61  ;;  %6400 = vmatpush3.bf16.msra.mxu1 %v9337_v22 }
 0x38a   :  { %6374 = vmatprep.subr.bf16.mxu0 %v9338_v35  ;;  %6401 = vmatprep.subr.bf16.mxu1 %v9301_v37 }
 0x38d   :  { %6376 = vmatpush1.bf16.msra.mxu0 %v8154_v3  ;;  %6403 = vmatpush3.bf16.msra.mxu1 %v8156_v48 }
 0x38e   :  { %6378 = vmatprep.subr.bf16.mxu0 %v9339_v17  ;;  %6404 = vmatprep.subr.bf16.mxu1 %v9301_v37 }
 0x391   :  { %6380 = vmatpush1.bf16.msra.mxu0 %v9340_v41  ;;  %6406 = vmatpush3.bf16.msra.mxu1 %v8166_v28 }
 0x392   :  { %6382 = vmatprep.subr.bf16.mxu0 %v8170_v0  ;;  %6407 = vmatprep.subr.bf16.mxu1 %v9301_v37 }
 0x395   :  { %6384 = vmatpush1.bf16.msra.mxu0 %v8174_v47  ;;  %6409 = vmatpush3.bf16.msra.mxu1 %v8176_v63 }
 0x396   :  { %6386 = vmatprep.subr.bf16.mxu0 %v8180_v56  ;;  %6410 = vmatprep.subr.bf16.mxu1 %v9301_v37 }
 0x399   :  { %6388 = vmatpush1.bf16.msra.mxu0 %v8184_v12  ;;  %6412 = vmatpush3.bf16.msra.mxu1 %v8186_v23 }
 0x39a   :  { %6414 = vmatprep.subr.bf16.mxu1 %v7874_v31  ;;  %6445 = vmatprep.subr.bf16.mxu0 %v9301_v37 }
 0x39c   :  { %1652 = vmatmul.mubr.f32.vlgmr.msra.gmra.mrb[38].mxu0 %v8293_v27  ;;  %5349 = vmatmul.mubr.f32.vlgmr.msra.gmra.mrb[22].mxu1 %v8293_v27 }
 0x39d   :  { %6416 = vmatpush1.bf16.msra.mxu1 %v7893_v52  ;;  %6447 = vmatpush3.bf16.msra.mxu0 %v7895_v54 }
 0x39e   :  { %6418 = vmatprep.subr.bf16.mxu1 %v7898_v58  ;;  %6448 = vmatprep.subr.bf16.mxu0 %v9301_v37 }
 0x39f   :  { %1820 = vmatprep.mubr.f32.mxu1 %v9303_v30  ;;  %5383 = vmatprep.mubr.msk.f32.mxu0 %vm7727_vm2, %v9303_v30 }
 0x3a1   :  { %6420 = vmatpush1.bf16.msra.mxu1 %v7902_v4  ;;  %6450 = vmatpush3.bf16.msra.mxu0 %v7905_v6 }
 0x3a2   :  { %6422 = vmatprep.subr.bf16.mxu1 %v7909_v10  ;;  %6451 = vmatprep.subr.bf16.mxu0 %v9301_v37 }
 0x3a5   :  { %6424 = vmatpush1.bf16.msra.mxu1 %v7914_v19  ;;  %6453 = vmatpush3.bf16.msra.mxu0 %v7917_v21 }
 0x3a6   :  { %6426 = vmatprep.subr.bf16.mxu1 %v7921_v25  ;;  %6454 = vmatprep.subr.bf16.mxu0 %v9301_v37 }
 0x3a9   :  { %6428 = vmatpush1.bf16.msra.mxu1 %v7926_v40  ;;  %6456 = vmatpush3.bf16.msra.mxu0 %v7929_v42 }
 0x3aa   :  { %6430 = vmatprep.subr.bf16.mxu1 %v7933_v46  ;;  %6457 = vmatprep.subr.bf16.mxu0 %v9301_v37 }
 0x3ad   :  { %6432 = vmatpush1.bf16.msra.mxu1 %v7938_v57  ;;  %6459 = vmatpush3.bf16.msra.mxu0 %v7941_v60 }
 0x3ae   :  { %6434 = vmatprep.subr.bf16.mxu1 %v7945_v1  ;;  %6460 = vmatprep.subr.bf16.mxu0 %v9301_v37 }
 0x3b1   :  { %6436 = vmatpush1.bf16.msra.mxu1 %v7950_v13  ;;  %6462 = vmatpush3.bf16.msra.mxu0 %v7953_v15  ;;  %v9362_v15 = vld [vmem:[#allocation74_spill] sm:$0xff] }
 0x3b2   :  { %6438 = vmatprep.subr.bf16.mxu1 %v7957_v20  ;;  %6463 = vmatprep.subr.bf16.mxu0 %v9301_v37 }
 0x3b5   :  { %6440 = vmatpush1.bf16.msra.mxu1 %v7962_v33  ;;  %6465 = vmatpush3.bf16.msra.mxu0 %v7965_v34 }
 0x3b6   :  { %6442 = vmatprep.subr.bf16.mxu1 %v7969_v44  ;;  %6466 = vmatprep.subr.bf16.mxu0 %v9301_v37 }
 0x3b9   :  { %6444 = vmatpush1.bf16.msra.mxu1 %v7974_v38  ;;  %6468 = vmatpush3.bf16.msra.mxu0 %v7979_v55  ;;  %v9360_v55 = vld [vmem:[#allocation13_spill] sm:$0xff] }
 0x3ba   :  { %6470 = vmatprep.subr.bf16.mxu0 %v7992_v59  ;;  %6501 = vmatprep.subr.bf16.mxu1 %v9301_v37 }
 0x3bc   :  { %1821 = vmatmul.mubr.f32.vlgmr.msra.gmra.mrb[4].mxu1 %v8298_v43  ;;  %5384 = vmatmul.mubr.f32.vlgmr.msra.gmra.mrb[40].mxu0 %v8298_v43 }
 0x3bd   :  { %6472 = vmatpush1.bf16.msra.mxu0 %v7994_v2  ;;  %6503 = vmatpush3.bf16.msra.mxu1 %v7997_v5  ;;  %v9346_v5 = vld [vmem:[#allocation37_spill] sm:$0xff]  ;;  %v9347_v2 = vld [vmem:[#allocation38_spill] sm:$0xff] }
 0x3be   :  { %6474 = vmatprep.subr.bf16.mxu0 %v8001_v9  ;;  %6504 = vmatprep.subr.bf16.mxu1 %v9301_v37  ;;  %v9345_v9 = vld [vmem:[#allocation36_spill] sm:$0xff] }
 0x3bf   :  { %1986 = vmatprep.mubr.f32.mxu0 %v9303_v30  ;;  %5418 = vmatprep.mubr.msk.f32.mxu1 %vm7727_vm2, %v9303_v30 }
 0x3c1   :  { %6476 = vmatpush1.bf16.msra.mxu0 %v8004_v16  ;;  %6506 = vmatpush3.bf16.msra.mxu1 %v8007_v18  ;;  %v9348_v18 = vld [vmem:[#allocation39_spill] sm:$0xff]  ;;  %v9350_v16 = vld [vmem:[#allocation41_spill] sm:$0xff] }
 0x3c2   :  { %6478 = vmatprep.subr.bf16.mxu0 %v9341_v36  ;;  %6507 = vmatprep.subr.bf16.mxu1 %v9301_v37  ;;  %v9349_v36 = vld [vmem:[#allocation40_spill] sm:$0xff] }
 0x3c5   :  { %6480 = vmatpush1.bf16.msra.mxu0 %v9342_v24  ;;  %6509 = vmatpush3.bf16.msra.mxu1 %v9343_v50  ;;  %v9351_v50 = vld [vmem:[#allocation42_spill] sm:$0xff]  ;;  %v9353_v24 = vld [vmem:[#allocation44_spill] sm:$0xff] }
 0x3c6   :  { %6482 = vmatprep.subr.bf16.mxu0 %v9344_v29  ;;  %6510 = vmatprep.subr.bf16.mxu1 %v9301_v37  ;;  %v9352_v29 = vld [vmem:[#allocation43_spill] sm:$0xff] }
 0x3c9   :  { %6484 = vmatpush1.bf16.msra.mxu0 %v9345_v9  ;;  %6512 = vmatpush3.bf16.msra.mxu1 %v9346_v5  ;;  %v9354_v5 = vld [vmem:[#allocation45_spill] sm:$0xff]  ;;  %v9356_v9 = vld [vmem:[#allocation47_spill] sm:$0xff] }
 0x3ca   :  { %6486 = vmatprep.subr.bf16.mxu0 %v9347_v2  ;;  %6513 = vmatprep.subr.bf16.mxu1 %v9301_v37  ;;  %v9355_v2 = vld [vmem:[#allocation46_spill] sm:$0xff] }
 0x3cd   :  { %6488 = vmatpush1.bf16.msra.mxu0 %v9348_v18  ;;  %6515 = vmatpush3.bf16.msra.mxu1 %v9349_v36  ;;  %v9357_v36 = vld [vmem:[#allocation48_spill] sm:$0xff]  ;;  %v9359_v18 = vld [vmem:[#allocation50_spill] sm:$0xff] }
 0x3ce   :  { %6490 = vmatprep.subr.bf16.mxu0 %v9350_v16  ;;  %6516 = vmatprep.subr.bf16.mxu1 %v9301_v37  ;;  %v9358_v16 = vld [vmem:[#allocation49_spill] sm:$0xff] }
 0x3d1   :  { %6492 = vmatpush1.bf16.msra.mxu0 %v9351_v50  ;;  %6518 = vmatpush3.bf16.msra.mxu1 %v9352_v29 }
 0x3d2   :  { %6494 = vmatprep.subr.bf16.mxu0 %v9353_v24  ;;  %6519 = vmatprep.subr.bf16.mxu1 %v9301_v37 }
 0x3d5   :  { %6496 = vmatpush1.bf16.msra.mxu0 %v9354_v5  ;;  %6521 = vmatpush3.bf16.msra.mxu1 %v9355_v2 }
 0x3d6   :  { %6498 = vmatprep.subr.bf16.mxu0 %v9356_v9  ;;  %6522 = vmatprep.subr.bf16.mxu1 %v9301_v37  ;;  %v9361_v9 = vld [vmem:[#allocation14_spill] sm:$0xff] }
 0x3d9   :  { %6500 = vmatpush1.bf16.msra.mxu0 %v9357_v36  ;;  %6524 = vmatpush3.bf16.msra.mxu1 %v9358_v16 }
 0x3da   :  { %6526 = vmatprep.subr.bf16.mxu0 %v9359_v18  ;;  %6557 = vmatprep.subr.bf16.mxu1 %v9301_v37 }
 0x44f   :  { %v1583_v29 = vpop.f32.mrb[20].mxu1 }
 0x450   :  { %v5315_v24 = vpop.f32.mrb[21].mxu1  ;;  %v1744_v1 = vadd.f32 %v8287_v39, %v1583_v29 }
 0x46f   :  { %v1653_v50 = vpop.f32.mrb[38].mxu0  ;;  %v1724_v59 = vpop.f32.mrb[22].mxu1 }
 0x470   :  { %v1730_v5 = vadd.f32 %v1653_v50, %v9360_v55  ;;  %v1655_v38 = vpop.f32.mrb[39].mxu0  ;;  %v5350_v2 = vpop.f32.mrb[23].mxu1  ;;  %v1745_v13 = vadd.f32 %v9362_v15, %v1724_v59 }
 0x471   :  { %v1731_v34 = vadd.f32 %v1655_v38, %v9361_v9 }
 0x472   :  { %v4651_v44 = vmul.f32 -1.442695, %v1730_v5 }
 0x473   :  { %v4652_v33 = vmul.f32 -1.442695, %v1731_v34 }
 0x474   :  { %7492 = vpow2.f32 %v4651_v44 }
 0x475   :  { %7494 = vpow2.f32 %v4652_v33 }
 0x47e   :  { %v7493_v36 = vpop.eup %7492 }
 0x47f   :  { %v1738_v16 = vadd.f32 1.0, %v7493_v36  ;;  %v7495_v18 = vpop.eup %7494  ;;  %v9363_v36 = vld [vmem:[#allocation59_spill] sm:$0xff] }
 0x480   :  { %v1739_v20 = vadd.f32 1.0, %v7495_v18 }
 0x481   :  { %7496 = vrcp.f32 %v1738_v16 }
 0x482   :  { %7498 = vrcp.f32 %v1739_v20 }
 0x48b   :  { %v7497_v24 = vpop.eup %7496 }
 0x48c   :  { %v1746_v60 = vmul.f32 %v7497_v24, %v1745_v13  ;;  %v7499_v18 = vpop.eup %7498 }
 0x48d   :  { %v1749_v59 = vsub.f32 1.0, %v7499_v18  ;;  %v1751_v13 = vmul.f32 %v7499_v18, %v8293_v27 }
 0x48e   :  { %v1747_v50 = vadd.f32 %v1746_v60, %v1744_v1 }
 0x48f   :  { %v1822_v2 = vpop.f32.mrb[4].mxu1  ;;  %v1893_v5 = vpop.f32.mrb[40].mxu0 }
 0x490   :  { %7500 = vtanh.f32 %v1747_v50  ;;  %v1899_v44 = vadd.f32 %v1822_v2, %v9324_v51  ;;  %v1824_v34 = vpop.f32.mrb[5].mxu1  ;;  %v5385_v33 = vpop.f32.mrb[41].mxu0  ;;  %v1914_v2 = vadd.f32 %v8106_v26, %v1893_v5  ;;  %v9365_v26 = vld [vmem:[#allocation16_spill] sm:$0xff]  ;;  %v9367_v5 = vld [vmem:[#allocation18_spill] sm:$0xff] }
 0x491   :  { %v1900_v16 = vadd.f32 %v1824_v34, %v9363_v36  ;;  %v9364_v33 = vld [vmem:[#allocation52_spill] sm:$0xff] }
 0x492   :  { %v4653_v38 = vmul.f32 -1.442695, %v1899_v44 }
 0x493   :  { %v4654_v9 = vmul.f32 -1.442695, %v1900_v16 }
 0x494   :  { %7502 = vpow2.f32 %v4653_v38 }
 0x495   :  { %7504 = vpow2.f32 %v4654_v9 }
 0x49a   :  { %v7501_v15 = vpop.eup %7500 }
 0x49b   :  { %v1750_v29 = vmul.f32 %v7501_v15, %v1749_v59 }
 0x49d   :  { %v8418_v60 = vadd.f32 %v1751_v13, %v1750_v29  ;;  %v9368_v29 = vld [vmem:[#allocation19_spill] sm:$0xff]  ;;  %v9369_v13 = vld [vmem:[#allocation20_spill] sm:$0xff] }
 0x49e   :  { %v7503_v1 = vpop.eup %7502 }
 0x49f   :  { %v1907_v20 = vadd.f32 1.0, %v7503_v1  ;;  %v7505_v24 = vpop.eup %7504  ;;  %v9370_v1 = vld [vmem:[#allocation21_spill] sm:$0xff] }
 0x4a0   :  { %v1908_v50 = vadd.f32 1.0, %v7505_v24  ;;  %v9372_v24 = vld [vmem:[#allocation23_spill] sm:$0xff] }
 0x4a1   :  { %7506 = vrcp.f32 %v1907_v20  ;;  %v9371_v20 = vld [vmem:[#allocation22_spill] sm:$0xff] }
 0x4a2   :  { %7508 = vrcp.f32 %v1908_v50  ;;  %v9373_v50 = vld [vmem:[#allocation24_spill] sm:$0xff] }
 0x4ab   :  { %v7507_v44 = vpop.eup %7506 }
 0x4ac   :  { %v1915_v34 = vmul.f32 %v7507_v44, %v1914_v2  ;;  %v7509_v16 = vpop.eup %7508  ;;  %v9374_v2 = vld [vmem:[#allocation25_spill] sm:$0xff]  ;;  %v9375_v44 = vld [vmem:[#allocation26_spill] sm:$0xff] }
 0x4ad   :  { %v1918_v9 = vsub.f32 1.0, %v7509_v16  ;;  %v1920_v27 = vmul.f32 %v7509_v16, %v8298_v43  ;;  %v9366_v43 = vld [vmem:[#allocation17_spill] sm:$0xff]  ;;  %v9379_v16 = vld [vmem:[#allocation30_spill] sm:$0xff] }
 0x4ae   :  { %v1916_v38 = vadd.f32 %v1915_v34, %v9364_v33  ;;  %v9376_v34 = vld [vmem:[#allocation27_spill] sm:$0xff]  ;;  %v9377_v33 = vld [vmem:[#allocation28_spill] sm:$0xff] }
 0x4b0   :  { %7510 = vtanh.f32 %v1916_v38  ;;  %v9378_v38 = vld [vmem:[#allocation29_spill] sm:$0xff] }
 0x4ba   :  { %v7511_v15 = vpop.eup %7510 }
 0x4bb   :  { %v1919_v59 = vmul.f32 %v7511_v15, %v1918_v9  ;;  %v9380_v9 = vld [vmem:[#allocation31_spill] sm:$0xff]  ;;  %v9381_v15 = vld [vmem:[#allocation32_spill] sm:$0xff] }
 0x4bd   :  { %v8423_v18 = vadd.f32 %v1920_v27, %v1919_v59  ;;  %v9382_v59 = vld [vmem:[#allocation33_spill] sm:$0xff]  ;;  %v9383_v27 = vld [vmem:[#allocation34_spill] sm:$0xff] }
 0x4bf   :  { %1987 = vmatmul.mubr.f32.vlgmr.msra.gmra.mrb[42].mxu0 %v8423_v18  ;;  %5419 = vmatmul.mubr.f32.vlgmr.msra.gmra.mrb[24].mxu1 %v8423_v18 }
 0x4c0   :  { %6528 = vmatpush1.bf16.msra.mxu0 %v9327_v8  ;;  %6559 = vmatpush3.bf16.msra.mxu1 %v9328_v62 }
 0x4c1   :  { %6530 = vmatprep.subr.bf16.mxu0 %v9329_v32  ;;  %6560 = vmatprep.subr.bf16.mxu1 %v9301_v37 }
 0x4c2   :  { %2127 = vmatprep.mubr.f32.mxu0 %v9303_v30  ;;  %5453 = vmatprep.mubr.msk.f32.mxu1 %vm7727_vm2, %v9303_v30 }
 0x4c4   :  { %6532 = vmatpush1.bf16.msra.mxu0 %v9330_v45  ;;  %6562 = vmatpush3.bf16.msra.mxu1 %v9331_v14 }
 0x4c5   :  { %6534 = vmatprep.subr.bf16.mxu0 %v9332_v11  ;;  %6563 = vmatprep.subr.bf16.mxu1 %v9301_v37 }
 0x4c8   :  { %6536 = vmatpush1.bf16.msra.mxu0 %v9333_v7  ;;  %6565 = vmatpush3.bf16.msra.mxu1 %v9334_v49 }
 0x4c9   :  { %6538 = vmatprep.subr.bf16.mxu0 %v9335_v53  ;;  %6566 = vmatprep.subr.bf16.mxu1 %v9301_v37 }
 0x4cc   :  { %6540 = vmatpush1.bf16.msra.mxu0 %v9336_v61  ;;  %6568 = vmatpush3.bf16.msra.mxu1 %v9337_v22 }
 0x4cd   :  { %6542 = vmatprep.subr.bf16.mxu0 %v9338_v35  ;;  %6569 = vmatprep.subr.bf16.mxu1 %v9301_v37 }
 0x4d0   :  { %6544 = vmatpush1.bf16.msra.mxu0 %v8154_v3  ;;  %6571 = vmatpush3.bf16.msra.mxu1 %v8156_v48 }
 0x4d1   :  { %6546 = vmatprep.subr.bf16.mxu0 %v9339_v17  ;;  %6572 = vmatprep.subr.bf16.mxu1 %v9301_v37 }
 0x4d4   :  { %6548 = vmatpush1.bf16.msra.mxu0 %v9340_v41  ;;  %6574 = vmatpush3.bf16.msra.mxu1 %v8166_v28 }
 0x4d5   :  { %6550 = vmatprep.subr.bf16.mxu0 %v8170_v0  ;;  %6575 = vmatprep.subr.bf16.mxu1 %v9301_v37 }
 0x4d8   :  { %6552 = vmatpush1.bf16.msra.mxu0 %v8174_v47  ;;  %6577 = vmatpush3.bf16.msra.mxu1 %v8176_v63 }
 0x4d9   :  { %6554 = vmatprep.subr.bf16.mxu0 %v8180_v56  ;;  %6578 = vmatprep.subr.bf16.mxu1 %v9301_v37 }
 0x4dc   :  { %6556 = vmatpush1.bf16.msra.mxu0 %v8184_v12  ;;  %6580 = vmatpush3.bf16.msra.mxu1 %v8186_v23 }
 0x4dd   :  { %6582 = vmatprep.subr.bf16.mxu1 %v7874_v31  ;;  %6613 = vmatprep.subr.bf16.mxu0 %v9301_v37 }
 0x4df   :  { %2128 = vmatmul.mubr.f32.vlgmr.msra.gmra.mrb[42].mxu0 %v8418_v60  ;;  %5454 = vmatmul.mubr.f32.vlgmr.msra.gmra.mrb[26].mxu1 %v8418_v60 }
 0x4e0   :  { %6584 = vmatpush1.bf16.msra.mxu1 %v7893_v52  ;;  %6615 = vmatpush3.bf16.msra.mxu0 %v7895_v54 }
 0x4e1   :  { %6586 = vmatprep.subr.bf16.mxu1 %v7898_v58  ;;  %6616 = vmatprep.subr.bf16.mxu0 %v9301_v37 }
 0x4e2   :  { %2296 = vmatprep.mubr.f32.mxu1 %v9303_v30  ;;  %5488 = vmatprep.mubr.msk.f32.mxu0 %vm7727_vm2, %v9303_v30 }
 0x4e4   :  { %6588 = vmatpush1.bf16.msra.mxu1 %v7902_v4  ;;  %6618 = vmatpush3.bf16.msra.mxu0 %v7905_v6 }
 0x4e5   :  { %6590 = vmatprep.subr.bf16.mxu1 %v7909_v10  ;;  %6619 = vmatprep.subr.bf16.mxu0 %v9301_v37 }
 0x4e8   :  { %6592 = vmatpush1.bf16.msra.mxu1 %v7914_v19  ;;  %6621 = vmatpush3.bf16.msra.mxu0 %v7917_v21 }
 0x4e9   :  { %6594 = vmatprep.subr.bf16.mxu1 %v7921_v25  ;;  %6622 = vmatprep.subr.bf16.mxu0 %v9301_v37 }
 0x4ec   :  { %6596 = vmatpush1.bf16.msra.mxu1 %v7926_v40  ;;  %6624 = vmatpush3.bf16.msra.mxu0 %v7929_v42 }
 0x4ed   :  { %6598 = vmatprep.subr.bf16.mxu1 %v7933_v46  ;;  %6625 = vmatprep.subr.bf16.mxu0 %v9301_v37 }
 0x4f0   :  { %6600 = vmatpush1.bf16.msra.mxu1 %v7938_v57  ;;  %6627 = vmatpush3.bf16.msra.mxu0 %v9365_v26 }
 0x4f1   :  { %6602 = vmatprep.subr.bf16.mxu1 %v9366_v43  ;;  %6628 = vmatprep.subr.bf16.mxu0 %v9301_v37 }
 0x4f4   :  { %6604 = vmatpush1.bf16.msra.mxu1 %v9367_v5  ;;  %6630 = vmatpush3.bf16.msra.mxu0 %v9368_v29  ;;  %v9401_v29 = vld [vmem:[#allocation74_spill] sm:$0xff] }
 0x4f5   :  { %6606 = vmatprep.subr.bf16.mxu1 %v9369_v13  ;;  %6631 = vmatprep.subr.bf16.mxu0 %v9301_v37 }
 0x4f8   :  { %6608 = vmatpush1.bf16.msra.mxu1 %v9370_v1  ;;  %6633 = vmatpush3.bf16.msra.mxu0 %v9371_v20 }
 0x4f9   :  { %6610 = vmatprep.subr.bf16.mxu1 %v9372_v24  ;;  %6634 = vmatprep.subr.bf16.mxu0 %v9301_v37 }
 0x4fc   :  { %6612 = vmatpush1.bf16.msra.mxu1 %v9373_v50  ;;  %6636 = vmatpush3.bf16.msra.mxu0 %v9374_v2 }
 0x4fd   :  { %6638 = vmatprep.subr.bf16.mxu0 %v9375_v44  ;;  %6669 = vmatprep.subr.bf16.mxu1 %v9301_v37  ;;  %v9387_v44 = vld [vmem:[#allocation38_spill] sm:$0xff] }
 0x4ff   :  { %2297 = vmatmul.mubr.f32.vlgmr.msra.gmra.mrb[6].mxu1 %v8423_v18  ;;  %5489 = vmatmul.mubr.f32.vlgmr.msra.gmra.mrb[44].mxu0 %v8423_v18 }
 0x500   :  { %6640 = vmatpush1.bf16.msra.mxu0 %v9376_v34  ;;  %6671 = vmatpush3.bf16.msra.mxu1 %v9377_v33  ;;  %v9385_v33 = vld [vmem:[#allocation36_spill] sm:$0xff]  ;;  %v9386_v34 = vld [vmem:[#allocation37_spill] sm:$0xff] }
 0x501   :  { %6642 = vmatprep.subr.bf16.mxu0 %v9378_v38  ;;  %6672 = vmatprep.subr.bf16.mxu1 %v9301_v37  ;;  %v9384_v38 = vld [vmem:[#allocation35_spill] sm:$0xff] }
 0x502   :  { %2462 = vmatprep.mubr.f32.mxu0 %v9303_v30  ;;  %5523 = vmatprep.mubr.msk.f32.mxu1 %vm7727_vm2, %v9303_v30 }
 0x504   :  { %6644 = vmatpush1.bf16.msra.mxu0 %v9379_v16  ;;  %6674 = vmatpush3.bf16.msra.mxu1 %v9380_v9  ;;  %v9388_v9 = vld [vmem:[#allocation39_spill] sm:$0xff]  ;;  %v9390_v16 = vld [vmem:[#allocation41_spill] sm:$0xff] }
 0x505   :  { %6646 = vmatprep.subr.bf16.mxu0 %v9381_v15  ;;  %6675 = vmatprep.subr.bf16.mxu1 %v9301_v37  ;;  %v9389_v15 = vld [vmem:[#allocation40_spill] sm:$0xff] }
 0x508   :  { %6648 = vmatpush1.bf16.msra.mxu0 %v9382_v59  ;;  %6677 = vmatpush3.bf16.msra.mxu1 %v9383_v27  ;;  %v9391_v27 = vld [vmem:[#allocation42_spill] sm:$0xff]  ;;  %v9393_v59 = vld [vmem:[#allocation44_spill] sm:$0xff] }
 0x509   :  { %6650 = vmatprep.subr.bf16.mxu0 %v9384_v38  ;;  %6678 = vmatprep.subr.bf16.mxu1 %v9301_v37  ;;  %v9392_v38 = vld [vmem:[#allocation43_spill] sm:$0xff] }
 0x50c   :  { %6652 = vmatpush1.bf16.msra.mxu0 %v9385_v33  ;;  %6680 = vmatpush3.bf16.msra.mxu1 %v9386_v34  ;;  %v9394_v34 = vld [vmem:[#allocation45_spill] sm:$0xff]  ;;  %v9396_v33 = vld [vmem:[#allocation47_spill] sm:$0xff] }
 0x50d   :  { %6654 = vmatprep.subr.bf16.mxu0 %v9387_v44  ;;  %6681 = vmatprep.subr.bf16.mxu1 %v9301_v37  ;;  %v9395_v44 = vld [vmem:[#allocation46_spill] sm:$0xff] }
 0x510   :  { %6656 = vmatpush1.bf16.msra.mxu0 %v9388_v9  ;;  %6683 = vmatpush3.bf16.msra.mxu1 %v9389_v15  ;;  %v9397_v15 = vld [vmem:[#allocation48_spill] sm:$0xff]  ;;  %v9399_v9 = vld [vmem:[#allocation50_spill] sm:$0xff] }
 0x511   :  { %6658 = vmatprep.subr.bf16.mxu0 %v9390_v16  ;;  %6684 = vmatprep.subr.bf16.mxu1 %v9301_v37  ;;  %v9398_v16 = vld [vmem:[#allocation49_spill] sm:$0xff] }
 0x514   :  { %6660 = vmatpush1.bf16.msra.mxu0 %v9391_v27  ;;  %6686 = vmatpush3.bf16.msra.mxu1 %v9392_v38 }
 0x515   :  { %6662 = vmatprep.subr.bf16.mxu0 %v9393_v59  ;;  %6687 = vmatprep.subr.bf16.mxu1 %v9301_v37 }
 0x518   :  { %6664 = vmatpush1.bf16.msra.mxu0 %v9394_v34  ;;  %6689 = vmatpush3.bf16.msra.mxu1 %v9395_v44 }
 0x519   :  { %6666 = vmatprep.subr.bf16.mxu0 %v9396_v33  ;;  %6690 = vmatprep.subr.bf16.mxu1 %v9301_v37  ;;  %v9400_v33 = vld [vmem:[#allocation14_spill] sm:$0xff] }
 0x51c   :  { %6668 = vmatpush1.bf16.msra.mxu0 %v9397_v15  ;;  %6692 = vmatpush3.bf16.msra.mxu1 %v9398_v16 }
 0x51d   :  { %6694 = vmatprep.subr.bf16.mxu0 %v9399_v9  ;;  %6725 = vmatprep.subr.bf16.mxu1 %v9301_v37 }
 0x592   :  { %v2059_v38 = vpop.f32.mrb[24].mxu1 }
 0x593   :  { %v5420_v59 = vpop.f32.mrb[25].mxu1  ;;  %v2220_v43 = vadd.f32 %v8287_v39, %v2059_v38 }
 0x5b2   :  { %v2129_v27 = vpop.f32.mrb[42].mxu0  ;;  %v2200_v2 = vpop.f32.mrb[26].mxu1 }
 0x5b3   :  { %v2206_v34 = vadd.f32 %v2129_v27, %v9360_v55  ;;  %v2131_v50 = vpop.f32.mrb[43].mxu0  ;;  %v5455_v44 = vpop.f32.mrb[27].mxu1  ;;  %v2221_v5 = vadd.f32 %v9401_v29, %v2200_v2 }
 0x5b4   :  { %v2207_v20 = vadd.f32 %v2131_v50, %v9400_v33 }
 0x5b5   :  { %v4655_v24 = vmul.f32 -1.442695, %v2206_v34 }
 0x5b6   :  { %v4656_v1 = vmul.f32 -1.442695, %v2207_v20 }
 0x5b7   :  { %7512 = vpow2.f32 %v4655_v24 }
 0x5b8   :  { %7514 = vpow2.f32 %v4656_v1 }
 0x5c1   :  { %v7513_v15 = vpop.eup %7512 }
 0x5c2   :  { %v2214_v16 = vadd.f32 1.0, %v7513_v15  ;;  %v7515_v9 = vpop.eup %7514 }
 0x5c3   :  { %v2215_v13 = vadd.f32 1.0, %v7515_v9 }
 0x5c4   :  { %7516 = vrcp.f32 %v2214_v16 }
 0x5c5   :  { %7518 = vrcp.f32 %v2215_v13 }
 0x5ce   :  { %v7517_v59 = vpop.eup %7516 }
 0x5cf   :  { %v2222_v26 = vmul.f32 %v7517_v59, %v2221_v5  ;;  %v7519_v9 = vpop.eup %7518 }
 0x5d0   :  { %v2225_v2 = vsub.f32 1.0, %v7519_v9  ;;  %v2227_v5 = vmul.f32 %v7519_v9, %v8418_v60 }
 0x5d1   :  { %v2223_v27 = vadd.f32 %v2222_v26, %v2220_v43 }
 0x5d2   :  { %v2298_v44 = vpop.f32.mrb[6].mxu1  ;;  %v2369_v34 = vpop.f32.mrb[44].mxu0 }
 0x5d3   :  { %7520 = vtanh.f32 %v2223_v27  ;;  %v2375_v24 = vadd.f32 %v2298_v44, %v9324_v51  ;;  %v2300_v20 = vpop.f32.mrb[7].mxu1  ;;  %v5490_v1 = vpop.f32.mrb[45].mxu0  ;;  %v8548_v44 = vld [vmem:[%s9125_s8] ss:$0 sm:$0xff] }
 0x5d4   :  { %v2376_v16 = vadd.f32 %v2300_v20, %v9363_v36 }
 0x5d5   :  { %v4657_v50 = vmul.f32 -1.442695, %v2375_v24  ;;  %v2390_v24 = vadd.f32 %v8548_v44, %v2369_v34  ;;  %v9404_v34 = vld [vmem:[#allocation17_spill] sm:$0xff] }
 0x5d6   :  { %v4658_v15 = vmul.f32 -1.442695, %v2376_v16 }
 0x5d7   :  { %7522 = vpow2.f32 %v4657_v50 }
 0x5d8   :  { %7524 = vpow2.f32 %v4658_v15 }
 0x5dd   :  { %v7521_v29 = vpop.eup %7520 }
 0x5de   :  { %v2226_v38 = vmul.f32 %v7521_v29, %v2225_v2  ;;  %v9402_v29 = vld [vmem:[#allocation53_spill] sm:$0xff] }
 0x5e0   :  { %v8543_v26 = vadd.f32 %v2227_v5, %v2226_v38  ;;  %v9405_v5 = vld [vmem:[#allocation18_spill] sm:$0xff] }
 0x5e1   :  { %v7523_v43 = vpop.eup %7522 }
 0x5e2   :  { %v2383_v13 = vadd.f32 1.0, %v7523_v43  ;;  %v7525_v59 = vpop.eup %7524  ;;  %v9406_v43 = vld [vmem:[#allocation19_spill] sm:$0xff] }
 0x5e3   :  { %v2384_v27 = vadd.f32 1.0, %v7525_v59  ;;  %v9408_v59 = vld [vmem:[#allocation21_spill] sm:$0xff] }
 0x5e4   :  { %7526 = vrcp.f32 %v2383_v13  ;;  %v9407_v13 = vld [vmem:[#allocation20_spill] sm:$0xff] }
 0x5e5   :  { %7528 = vrcp.f32 %v2384_v27  ;;  %v9409_v27 = vld [vmem:[#allocation22_spill] sm:$0xff] }
 0x5ee   :  { %v7527_v20 = vpop.eup %7526 }
 0x5ef   :  { %v2391_v1 = vmul.f32 %v7527_v20, %v2390_v24  ;;  %v7529_v60 = vpop.eup %7528  ;;  %v9410_v24 = vld [vmem:[#allocation23_spill] sm:$0xff]  ;;  %v9411_v20 = vld [vmem:[#allocation24_spill] sm:$0xff] }
 0x5f0   :  { %v2394_v16 = vsub.f32 1.0, %v7529_v60  ;;  %v2396_v2 = vmul.f32 %v7529_v60, %v8423_v18  ;;  %v9403_v18 = vld [vmem:[#allocation16_spill] sm:$0xff] }
 0x5f1   :  { %v2392_v50 = vadd.f32 %v2391_v1, %v9402_v29  ;;  %v9412_v1 = vld [vmem:[#allocation25_spill] sm:$0xff]  ;;  %v9413_v29 = vld [vmem:[#allocation26_spill] sm:$0xff]  ;;  %v9415_v60 = vld [vmem:[#allocation28_spill] sm:$0xff] }
 0x5f3   :  { %7530 = vtanh.f32 %v2392_v50  ;;  %v9414_v50 = vld [vmem:[#allocation27_spill] sm:$0xff] }
 0x5fd   :  { %v7531_v9 = vpop.eup %7530 }
 0x5fe   :  { %v2395_v15 = vmul.f32 %v7531_v9, %v2394_v16  ;;  %v9416_v16 = vld [vmem:[#allocation29_spill] sm:$0xff]  ;;  %v9417_v9 = vld [vmem:[#allocation30_spill] sm:$0xff] }
 0x600   :  { %v8553_v38 = vadd.f32 %v2396_v2, %v2395_v15  ;;  %v9418_v15 = vld [vmem:[#allocation31_spill] sm:$0xff]  ;;  %v9419_v2 = vld [vmem:[#allocation32_spill] sm:$0xff] }
 0x602   :  { %2463 = vmatmul.mubr.f32.vlgmr.msra.gmra.mrb[46].mxu0 %v8553_v38  ;;  %5524 = vmatmul.mubr.f32.vlgmr.msra.gmra.mrb[28].mxu1 %v8553_v38 }
 0x603   :  { %6696 = vmatpush1.bf16.msra.mxu0 %v9327_v8  ;;  %6727 = vmatpush3.bf16.msra.mxu1 %v9328_v62 }
 0x604   :  { %6698 = vmatprep.subr.bf16.mxu0 %v9329_v32  ;;  %6728 = vmatprep.subr.bf16.mxu1 %v9301_v37 }
 0x605   :  { %2603 = vmatprep.mubr.f32.mxu0 %v9303_v30  ;;  %5558 = vmatprep.mubr.msk.f32.mxu1 %vm7727_vm2, %v9303_v30 }
 0x607   :  { %6700 = vmatpush1.bf16.msra.mxu0 %v9330_v45  ;;  %6730 = vmatpush3.bf16.msra.mxu1 %v9331_v14 }
 0x608   :  { %6702 = vmatprep.subr.bf16.mxu0 %v9332_v11  ;;  %6731 = vmatprep.subr.bf16.mxu1 %v9301_v37 }
 0x60b   :  { %6704 = vmatpush1.bf16.msra.mxu0 %v9333_v7  ;;  %6733 = vmatpush3.bf16.msra.mxu1 %v9334_v49 }
 0x60c   :  { %6706 = vmatprep.subr.bf16.mxu0 %v9335_v53  ;;  %6734 = vmatprep.subr.bf16.mxu1 %v9301_v37 }
 0x60f   :  { %6708 = vmatpush1.bf16.msra.mxu0 %v9336_v61  ;;  %6736 = vmatpush3.bf16.msra.mxu1 %v9337_v22 }
 0x610   :  { %6710 = vmatprep.subr.bf16.mxu0 %v9338_v35  ;;  %6737 = vmatprep.subr.bf16.mxu1 %v9301_v37 }
 0x613   :  { %6712 = vmatpush1.bf16.msra.mxu0 %v8154_v3  ;;  %6739 = vmatpush3.bf16.msra.mxu1 %v8156_v48 }
 0x614   :  { %6714 = vmatprep.subr.bf16.mxu0 %v9339_v17  ;;  %6740 = vmatprep.subr.bf16.mxu1 %v9301_v37 }
 0x617   :  { %6716 = vmatpush1.bf16.msra.mxu0 %v9340_v41  ;;  %6742 = vmatpush3.bf16.msra.mxu1 %v8166_v28 }
 0x618   :  { %6718 = vmatprep.subr.bf16.mxu0 %v8170_v0  ;;  %6743 = vmatprep.subr.bf16.mxu1 %v9301_v37 }
 0x61b   :  { %6720 = vmatpush1.bf16.msra.mxu0 %v8174_v47  ;;  %6745 = vmatpush3.bf16.msra.mxu1 %v8176_v63 }
 0x61c   :  { %6722 = vmatprep.subr.bf16.mxu0 %v8180_v56  ;;  %6746 = vmatprep.subr.bf16.mxu1 %v9301_v37 }
 0x61f   :  { %6724 = vmatpush1.bf16.msra.mxu0 %v8184_v12  ;;  %6748 = vmatpush3.bf16.msra.mxu1 %v8186_v23 }
 0x620   :  { %6750 = vmatprep.subr.bf16.mxu1 %v7874_v31  ;;  %6781 = vmatprep.subr.bf16.mxu0 %v9301_v37 }
 0x622   :  { %2604 = vmatmul.mubr.f32.vlgmr.msra.gmra.mrb[46].mxu0 %v8543_v26  ;;  %5559 = vmatmul.mubr.f32.vlgmr.msra.gmra.mrb[30].mxu1 %v8543_v26 }
 0x623   :  { %6752 = vmatpush1.bf16.msra.mxu1 %v7893_v52  ;;  %6783 = vmatpush3.bf16.msra.mxu0 %v7895_v54 }
 0x624   :  { %6754 = vmatprep.subr.bf16.mxu1 %v7898_v58  ;;  %6784 = vmatprep.subr.bf16.mxu0 %v9301_v37 }
 0x625   :  { %2772 = vmatprep.mubr.f32.mxu1 %v9303_v30  ;;  %5593 = vmatprep.mubr.msk.f32.mxu0 %vm7727_vm2, %v9303_v30 }
 0x627   :  { %6756 = vmatpush1.bf16.msra.mxu1 %v7902_v4  ;;  %6786 = vmatpush3.bf16.msra.mxu0 %v7905_v6 }
 0x628   :  { %6758 = vmatprep.subr.bf16.mxu1 %v7909_v10  ;;  %6787 = vmatprep.subr.bf16.mxu0 %v9301_v37 }
 0x62b   :  { %6760 = vmatpush1.bf16.msra.mxu1 %v7914_v19  ;;  %6789 = vmatpush3.bf16.msra.mxu0 %v7917_v21 }
 0x62c   :  { %6762 = vmatprep.subr.bf16.mxu1 %v7921_v25  ;;  %6790 = vmatprep.subr.bf16.mxu0 %v9301_v37 }
 0x62f   :  { %6764 = vmatpush1.bf16.msra.mxu1 %v7926_v40  ;;  %6792 = vmatpush3.bf16.msra.mxu0 %v7929_v42 }
 0x630   :  { %6766 = vmatprep.subr.bf16.mxu1 %v7933_v46  ;;  %6793 = vmatprep.subr.bf16.mxu0 %v9301_v37 }
 0x633   :  { %6768 = vmatpush1.bf16.msra.mxu1 %v7938_v57  ;;  %6795 = vmatpush3.bf16.msra.mxu0 %v9403_v18 }
 0x634   :  { %6770 = vmatprep.subr.bf16.mxu1 %v9404_v34  ;;  %6796 = vmatprep.subr.bf16.mxu0 %v9301_v37 }
 0x637   :  { %6772 = vmatpush1.bf16.msra.mxu1 %v9405_v5  ;;  %6798 = vmatpush3.bf16.msra.mxu0 %v9406_v43  ;;  %v9438_v5 = vld [vmem:[#allocation74_spill] sm:$0xff] }
 0x638   :  { %6774 = vmatprep.subr.bf16.mxu1 %v9407_v13  ;;  %6799 = vmatprep.subr.bf16.mxu0 %v9301_v37 }
 0x63b   :  { %6776 = vmatpush1.bf16.msra.mxu1 %v9408_v59  ;;  %6801 = vmatpush3.bf16.msra.mxu0 %v9409_v27 }
 0x63c   :  { %6778 = vmatprep.subr.bf16.mxu1 %v9410_v24  ;;  %6802 = vmatprep.subr.bf16.mxu0 %v9301_v37 }
 0x63f   :  { %6780 = vmatpush1.bf16.msra.mxu1 %v9411_v20  ;;  %6804 = vmatpush3.bf16.msra.mxu0 %v9412_v1  ;;  %v9424_v1 = vld [vmem:[#allocation37_spill] sm:$0xff]  ;;  %v9425_v20 = vld [vmem:[#allocation38_spill] sm:$0xff] }
 0x640   :  { %6806 = vmatprep.subr.bf16.mxu0 %v9413_v29  ;;  %6837 = vmatprep.subr.bf16.mxu1 %v9301_v37  ;;  %v9423_v29 = vld [vmem:[#allocation36_spill] sm:$0xff] }
 0x642   :  { %2773 = vmatmul.mubr.f32.vlgmr.msra.gmra.mrb[8].mxu1 %v8553_v38  ;;  %5594 = vmatmul.mubr.f32.vlgmr.msra.gmra.mrb[48].mxu0 %v8553_v38 }
 0x643   :  { %6808 = vmatpush1.bf16.msra.mxu0 %v9414_v50  ;;  %6839 = vmatpush3.bf16.msra.mxu1 %v9415_v60  ;;  %v9420_v50 = vld [vmem:[#allocation33_spill] sm:$0xff]  ;;  %v9421_v60 = vld [vmem:[#allocation34_spill] sm:$0xff] }
 0x644   :  { %6810 = vmatprep.subr.bf16.mxu0 %v9416_v16  ;;  %6840 = vmatprep.subr.bf16.mxu1 %v9301_v37  ;;  %v9422_v16 = vld [vmem:[#allocation35_spill] sm:$0xff] }
 0x645   :  { %2938 = vmatprep.mubr.f32.mxu0 %v9303_v30  ;;  %5628 = vmatprep.mubr.msk.f32.mxu1 %vm7727_vm2, %v9303_v30 }
 0x647   :  { %6812 = vmatpush1.bf16.msra.mxu0 %v9417_v9  ;;  %6842 = vmatpush3.bf16.msra.mxu1 %v9418_v15  ;;  %v9426_v15 = vld [vmem:[#allocation39_spill] sm:$0xff]  ;;  %v9428_v9 = vld [vmem:[#allocation41_spill] sm:$0xff] }
 0x648   :  { %6814 = vmatprep.subr.bf16.mxu0 %v9419_v2  ;;  %6843 = vmatprep.subr.bf16.mxu1 %v9301_v37  ;;  %v9427_v2 = vld [vmem:[#allocation40_spill] sm:$0xff] }
 0x64b   :  { %6816 = vmatpush1.bf16.msra.mxu0 %v9420_v50  ;;  %6845 = vmatpush3.bf16.msra.mxu1 %v9421_v60  ;;  %v9429_v60 = vld [vmem:[#allocation42_spill] sm:$0xff]  ;;  %v9431_v50 = vld [vmem:[#allocation44_spill] sm:$0xff] }
 0x64c   :  { %6818 = vmatprep.subr.bf16.mxu0 %v9422_v16  ;;  %6846 = vmatprep.subr.bf16.mxu1 %v9301_v37  ;;  %v9430_v16 = vld [vmem:[#allocation43_spill] sm:$0xff] }
 0x64f   :  { %6820 = vmatpush1.bf16.msra.mxu0 %v9423_v29  ;;  %6848 = vmatpush3.bf16.msra.mxu1 %v9424_v1  ;;  %v9432_v1 = vld [vmem:[#allocation45_spill] sm:$0xff]  ;;  %v9434_v29 = vld [vmem:[#allocation47_spill] sm:$0xff] }
 0x650   :  { %6822 = vmatprep.subr.bf16.mxu0 %v9425_v20  ;;  %6849 = vmatprep.subr.bf16.mxu1 %v9301_v37  ;;  %v9433_v20 = vld [vmem:[#allocation46_spill] sm:$0xff] }
 0x653   :  { %6824 = vmatpush1.bf16.msra.mxu0 %v9426_v15  ;;  %6851 = vmatpush3.bf16.msra.mxu1 %v9427_v2  ;;  %v9435_v2 = vld [vmem:[#allocation48_spill] sm:$0xff]  ;;  %v9437_v15 = vld [vmem:[#allocation50_spill] sm:$0xff] }
 0x654   :  { %6826 = vmatprep.subr.bf16.mxu0 %v9428_v9  ;;  %6852 = vmatprep.subr.bf16.mxu1 %v9301_v37  ;;  %v9436_v9 = vld [vmem:[#allocation49_spill] sm:$0xff] }
 0x657   :  { %6828 = vmatpush1.bf16.msra.mxu0 %v9429_v60  ;;  %6854 = vmatpush3.bf16.msra.mxu1 %v9430_v16 }
 0x658   :  { %6830 = vmatprep.subr.bf16.mxu0 %v9431_v50  ;;  %6855 = vmatprep.subr.bf16.mxu1 %v9301_v37 }
 0x65b   :  { %6832 = vmatpush1.bf16.msra.mxu0 %v9432_v1  ;;  %6857 = vmatpush3.bf16.msra.mxu1 %v9433_v20 }
 0x65c   :  { %6834 = vmatprep.subr.bf16.mxu0 %v9434_v29  ;;  %6858 = vmatprep.subr.bf16.mxu1 %v9301_v37 }
 0x65f   :  { %6836 = vmatpush1.bf16.msra.mxu0 %v9435_v2  ;;  %6860 = vmatpush3.bf16.msra.mxu1 %v9436_v9 }
 0x660   :  { %6862 = vmatprep.subr.bf16.mxu0 %v9437_v15  ;;  %6893 = vmatprep.subr.bf16.mxu1 %v9301_v37 }
 0x6d5   :  { %v2535_v16 = vpop.f32.mrb[28].mxu1 }
 0x6d6   :  { %v5525_v50 = vpop.f32.mrb[29].mxu1  ;;  %v2696_v18 = vadd.f32 %v8287_v39, %v2535_v16 }
 0x6f5   :  { %v2605_v60 = vpop.f32.mrb[46].mxu0  ;;  %v2676_v24 = vpop.f32.mrb[30].mxu1 }
 0x6f6   :  { %v2682_v1 = vadd.f32 %v2605_v60, %v9360_v55  ;;  %v2607_v27 = vpop.f32.mrb[47].mxu0  ;;  %v5560_v20 = vpop.f32.mrb[31].mxu1  ;;  %v2697_v34 = vadd.f32 %v9438_v5, %v2676_v24 }
 0x6f7   :  { %v2683_v29 = vadd.f32 %v2607_v27, %v9400_v33 }
 0x6f8   :  { %v4659_v59 = vmul.f32 -1.442695, %v2682_v1 }
 0x6f9   :  { %v4660_v13 = vmul.f32 -1.442695, %v2683_v29 }
 0x6fa   :  { %7532 = vpow2.f32 %v4659_v59 }
 0x6fb   :  { %7534 = vpow2.f32 %v4660_v13 }
 0x704   :  { %v7533_v2 = vpop.eup %7532 }
 0x705   :  { %v2690_v9 = vadd.f32 1.0, %v7533_v2  ;;  %v7535_v15 = vpop.eup %7534 }
 0x706   :  { %v2691_v43 = vadd.f32 1.0, %v7535_v15 }
 0x707   :  { %7536 = vrcp.f32 %v2690_v9 }
 0x708   :  { %7538 = vrcp.f32 %v2691_v43 }
 0x711   :  { %v7537_v50 = vpop.eup %7536 }
 0x712   :  { %v2698_v57 = vmul.f32 %v7537_v50, %v2697_v34  ;;  %v7539_v15 = vpop.eup %7538 }
 0x713   :  { %v2701_v5 = vsub.f32 1.0, %v7539_v15  ;;  %v2703_v34 = vmul.f32 %v7539_v15, %v8543_v26 }
 0x714   :  { %v2699_v60 = vadd.f32 %v2698_v57, %v2696_v18 }
 0x715   :  { %v2774_v20 = vpop.f32.mrb[8].mxu1  ;;  %v2845_v1 = vpop.f32.mrb[48].mxu0 }
 0x716   :  { %7540 = vtanh.f32 %v2699_v60  ;;  %v2851_v59 = vadd.f32 %v2774_v20, %v9324_v51  ;;  %v2776_v27 = vpop.f32.mrb[9].mxu1  ;;  %v5595_v13 = vpop.f32.mrb[49].mxu0  ;;  %v2866_v60 = vadd.f32 %v8548_v44, %v2845_v1  ;;  %v9441_v1 = vld [vmem:[#allocation16_spill] sm:$0xff] }
 0x717   :  { %v2852_v9 = vadd.f32 %v2776_v27, %v9363_v36  ;;  %v9439_v27 = vld [vmem:[#allocation54_spill] sm:$0xff] }
 0x718   :  { %v4661_v29 = vmul.f32 -1.442695, %v2851_v59 }
 0x719   :  { %v4662_v2 = vmul.f32 -1.442695, %v2852_v9 }
 0x71a   :  { %7542 = vpow2.f32 %v4661_v29 }
 0x71b   :  { %7544 = vpow2.f32 %v4662_v2 }
 0x720   :  { %v7541_v24 = vpop.eup %7540 }
 0x721   :  { %v2702_v39 = vmul.f32 %v7541_v24, %v2701_v5  ;;  %v9442_v24 = vld [vmem:[#allocation17_spill] sm:$0xff] }
 0x723   :  { %v8673_v57 = vadd.f32 %v2703_v34, %v2702_v39  ;;  %v9443_v39 = vld [vmem:[#allocation18_spill] sm:$0xff]  ;;  %v9444_v34 = vld [vmem:[#allocation19_spill] sm:$0xff] }
 0x724   :  { %v7543_v18 = vpop.eup %7542 }
 0x725   :  { %v2859_v43 = vadd.f32 1.0, %v7543_v18  ;;  %v7545_v16 = vpop.eup %7544  ;;  %v9445_v18 = vld [vmem:[#allocation20_spill] sm:$0xff] }
 0x726   :  { %v2860_v50 = vadd.f32 1.0, %v7545_v16  ;;  %v9447_v16 = vld [vmem:[#allocation22_spill] sm:$0xff] }
 0x727   :  { %7546 = vrcp.f32 %v2859_v43  ;;  %v9446_v43 = vld [vmem:[#allocation21_spill] sm:$0xff] }
 0x728   :  { %7548 = vrcp.f32 %v2860_v50  ;;  %v9448_v50 = vld [vmem:[#allocation23_spill] sm:$0xff] }
 0x731   :  { %v7547_v20 = vpop.eup %7546 }
 0x732   :  { %v2867_v59 = vmul.f32 %v7547_v20, %v2866_v60  ;;  %v7549_v29 = vpop.eup %7548  ;;  %v9449_v60 = vld [vmem:[#allocation24_spill] sm:$0xff]  ;;  %v9450_v20 = vld [vmem:[#allocation25_spill] sm:$0xff] }
 0x733   :  { %v2870_v9 = vsub.f32 1.0, %v7549_v29  ;;  %v2872_v26 = vmul.f32 %v7549_v29, %v8553_v38  ;;  %v9440_v38 = vld [vmem:[#allocation15_spill] sm:$0xff]  ;;  %v9454_v29 = vld [vmem:[#allocation29_spill] sm:$0xff] }
 0x734   :  { %v2868_v13 = vadd.f32 %v2867_v59, %v9439_v27  ;;  %v9451_v59 = vld [vmem:[#allocation26_spill] sm:$0xff]  ;;  %v9452_v27 = vld [vmem:[#allocation27_spill] sm:$0xff] }
 0x736   :  { %7550 = vtanh.f32 %v2868_v13  ;;  %v9453_v13 = vld [vmem:[#allocation28_spill] sm:$0xff] }
 0x740   :  { %v7551_v2 = vpop.eup %7550 }
 0x741   :  { %v2871_v5 = vmul.f32 %v7551_v2, %v2870_v9  ;;  %v9455_v9 = vld [vmem:[#allocation30_spill] sm:$0xff]  ;;  %v9456_v2 = vld [vmem:[#allocation31_spill] sm:$0xff] }
 0x743   :  { %v8678_v15 = vadd.f32 %v2872_v26, %v2871_v5  ;;  %v9457_v5 = vld [vmem:[#allocation32_spill] sm:$0xff]  ;;  %v9458_v26 = vld [vmem:[#allocation33_spill] sm:$0xff] }
 0x745   :  { %2939 = vmatmul.mubr.f32.vlgmr.msra.gmra.mrb[50].mxu0 %v8678_v15  ;;  %5629 = vmatmul.mubr.f32.vlgmr.msra.gmra.mrb[32].mxu1 %v8678_v15 }
 0x746   :  { %6864 = vmatpush1.bf16.msra.mxu0 %v9327_v8  ;;  %6895 = vmatpush3.bf16.msra.mxu1 %v9328_v62 }
 0x747   :  { %6866 = vmatprep.subr.bf16.mxu0 %v9329_v32  ;;  %6896 = vmatprep.subr.bf16.mxu1 %v9301_v37 }
 0x748   :  { %3079 = vmatprep.mubr.f32.mxu0 %v9303_v30  ;;  %5663 = vmatprep.mubr.msk.f32.mxu1 %vm7727_vm2, %v9303_v30 }
 0x74a   :  { %6868 = vmatpush1.bf16.msra.mxu0 %v9330_v45  ;;  %6898 = vmatpush3.bf16.msra.mxu1 %v9331_v14 }
 0x74b   :  { %6870 = vmatprep.subr.bf16.mxu0 %v9332_v11  ;;  %6899 = vmatprep.subr.bf16.mxu1 %v9301_v37 }
 0x74e   :  { %6872 = vmatpush1.bf16.msra.mxu0 %v9333_v7  ;;  %6901 = vmatpush3.bf16.msra.mxu1 %v9334_v49 }
 0x74f   :  { %6874 = vmatprep.subr.bf16.mxu0 %v9335_v53  ;;  %6902 = vmatprep.subr.bf16.mxu1 %v9301_v37 }
 0x752   :  { %6876 = vmatpush1.bf16.msra.mxu0 %v9336_v61  ;;  %6904 = vmatpush3.bf16.msra.mxu1 %v9337_v22 }
 0x753   :  { %6878 = vmatprep.subr.bf16.mxu0 %v9338_v35  ;;  %6905 = vmatprep.subr.bf16.mxu1 %v9301_v37 }
 0x756   :  { %6880 = vmatpush1.bf16.msra.mxu0 %v8154_v3  ;;  %6907 = vmatpush3.bf16.msra.mxu1 %v8156_v48 }
 0x757   :  { %6882 = vmatprep.subr.bf16.mxu0 %v9339_v17  ;;  %6908 = vmatprep.subr.bf16.mxu1 %v9301_v37 }
 0x75a   :  { %6884 = vmatpush1.bf16.msra.mxu0 %v9340_v41  ;;  %6910 = vmatpush3.bf16.msra.mxu1 %v8166_v28 }
 0x75b   :  { %6886 = vmatprep.subr.bf16.mxu0 %v8170_v0  ;;  %6911 = vmatprep.subr.bf16.mxu1 %v9301_v37 }
 0x75e   :  { %6888 = vmatpush1.bf16.msra.mxu0 %v8174_v47  ;;  %6913 = vmatpush3.bf16.msra.mxu1 %v8176_v63 }
 0x75f   :  { %6890 = vmatprep.subr.bf16.mxu0 %v8180_v56  ;;  %6914 = vmatprep.subr.bf16.mxu1 %v9301_v37 }
 0x762   :  { %6892 = vmatpush1.bf16.msra.mxu0 %v8184_v12  ;;  %6916 = vmatpush3.bf16.msra.mxu1 %v8186_v23 }
 0x763   :  { %6918 = vmatprep.subr.bf16.mxu1 %v7874_v31  ;;  %6949 = vmatprep.subr.bf16.mxu0 %v9301_v37 }
 0x765   :  { %3080 = vmatmul.mubr.f32.vlgmr.msra.gmra.mrb[50].mxu0 %v8673_v57  ;;  %5664 = vmatmul.mubr.f32.vlgmr.msra.gmra.mrb[34].mxu1 %v8673_v57 }
 0x766   :  { %6920 = vmatpush1.bf16.msra.mxu1 %v7893_v52  ;;  %6951 = vmatpush3.bf16.msra.mxu0 %v7895_v54 }
 0x767   :  { %6922 = vmatprep.subr.bf16.mxu1 %v7898_v58  ;;  %6952 = vmatprep.subr.bf16.mxu0 %v9301_v37 }
 0x768   :  { %3248 = vmatprep.mubr.f32.mxu1 %v9303_v30  ;;  %5698 = vmatprep.mubr.msk.f32.mxu0 %vm7727_vm2, %v9303_v30 }
 0x76a   :  { %6924 = vmatpush1.bf16.msra.mxu1 %v7902_v4  ;;  %6954 = vmatpush3.bf16.msra.mxu0 %v7905_v6 }
 0x76b   :  { %6926 = vmatprep.subr.bf16.mxu1 %v7909_v10  ;;  %6955 = vmatprep.subr.bf16.mxu0 %v9301_v37 }
 0x76e   :  { %6928 = vmatpush1.bf16.msra.mxu1 %v7914_v19  ;;  %6957 = vmatpush3.bf16.msra.mxu0 %v7917_v21 }
 0x76f   :  { %6930 = vmatprep.subr.bf16.mxu1 %v7921_v25  ;;  %6958 = vmatprep.subr.bf16.mxu0 %v9301_v37 }
 0x772   :  { %6932 = vmatpush1.bf16.msra.mxu1 %v7926_v40  ;;  %6960 = vmatpush3.bf16.msra.mxu0 %v7929_v42 }
 0x773   :  { %6934 = vmatprep.subr.bf16.mxu1 %v7933_v46  ;;  %6961 = vmatprep.subr.bf16.mxu0 %v9301_v37 }
 0x776   :  { %6936 = vmatpush1.bf16.msra.mxu1 %v9440_v38  ;;  %6963 = vmatpush3.bf16.msra.mxu0 %v9441_v1 }
 0x777   :  { %6938 = vmatprep.subr.bf16.mxu1 %v9442_v24  ;;  %6964 = vmatprep.subr.bf16.mxu0 %v9301_v37 }
 0x77a   :  { %6940 = vmatpush1.bf16.msra.mxu1 %v9443_v39  ;;  %6966 = vmatpush3.bf16.msra.mxu0 %v9444_v34 }
 0x77b   :  { %6942 = vmatprep.subr.bf16.mxu1 %v9445_v18  ;;  %6967 = vmatprep.subr.bf16.mxu0 %v9301_v37 }
 0x77e   :  { %6944 = vmatpush1.bf16.msra.mxu1 %v9446_v43  ;;  %6969 = vmatpush3.bf16.msra.mxu0 %v9447_v16 }
 0x77f   :  { %6946 = vmatprep.subr.bf16.mxu1 %v9448_v50  ;;  %6970 = vmatprep.subr.bf16.mxu0 %v9301_v37 }
 0x782   :  { %6948 = vmatpush1.bf16.msra.mxu1 %v9449_v60  ;;  %6972 = vmatpush3.bf16.msra.mxu0 %v9450_v20  ;;  %v9463_v20 = vld [vmem:[#allocation38_spill] sm:$0xff] }
 0x783   :  { %6974 = vmatprep.subr.bf16.mxu0 %v9451_v59  ;;  %7005 = vmatprep.subr.bf16.mxu1 %v9301_v37  ;;  %v9462_v59 = vld [vmem:[#allocation37_spill] sm:$0xff] }
 0x785   :  { %3249 = vmatmul.mubr.f32.vlgmr.msra.gmra.mrb[10].mxu1 %v8678_v15  ;;  %5699 = vmatmul.mubr.f32.vlgmr.msra.gmra.mrb[52].mxu0 %v8678_v15 }
 0x786   :  { %6976 = vmatpush1.bf16.msra.mxu0 %v9452_v27  ;;  %7007 = vmatpush3.bf16.msra.mxu1 %v9453_v13  ;;  %v9459_v13 = vld [vmem:[#allocation34_spill] sm:$0xff]  ;;  %v9461_v27 = vld [vmem:[#allocation36_spill] sm:$0xff] }
 0x787   :  { %6978 = vmatprep.subr.bf16.mxu0 %v9454_v29  ;;  %7008 = vmatprep.subr.bf16.mxu1 %v9301_v37  ;;  %v9460_v29 = vld [vmem:[#allocation35_spill] sm:$0xff] }
 0x788   :  { %3414 = vmatprep.mubr.f32.mxu0 %v9303_v30  ;;  %5733 = vmatprep.mubr.msk.f32.mxu1 %vm7727_vm2, %v9303_v30 }
 0x78a   :  { %6980 = vmatpush1.bf16.msra.mxu0 %v9455_v9  ;;  %7010 = vmatpush3.bf16.msra.mxu1 %v9456_v2  ;;  %v9464_v2 = vld [vmem:[#allocation39_spill] sm:$0xff]  ;;  %v9466_v9 = vld [vmem:[#allocation41_spill] sm:$0xff] }
 0x78b   :  { %6982 = vmatprep.subr.bf16.mxu0 %v9457_v5  ;;  %7011 = vmatprep.subr.bf16.mxu1 %v9301_v37  ;;  %v9465_v5 = vld [vmem:[#allocation40_spill] sm:$0xff] }
 0x78e   :  { %6984 = vmatpush1.bf16.msra.mxu0 %v9458_v26  ;;  %7013 = vmatpush3.bf16.msra.mxu1 %v9459_v13  ;;  %v9467_v13 = vld [vmem:[#allocation42_spill] sm:$0xff]  ;;  %v9469_v26 = vld [vmem:[#allocation44_spill] sm:$0xff] }
 0x78f   :  { %6986 = vmatprep.subr.bf16.mxu0 %v9460_v29  ;;  %7014 = vmatprep.subr.bf16.mxu1 %v9301_v37  ;;  %v9468_v29 = vld [vmem:[#allocation43_spill] sm:$0xff] }
 0x792   :  { %6988 = vmatpush1.bf16.msra.mxu0 %v9461_v27  ;;  %7016 = vmatpush3.bf16.msra.mxu1 %v9462_v59  ;;  %v9470_v59 = vld [vmem:[#allocation45_spill] sm:$0xff]  ;;  %v9472_v27 = vld [vmem:[#allocation47_spill] sm:$0xff] }
 0x793   :  { %6990 = vmatprep.subr.bf16.mxu0 %v9463_v20  ;;  %7017 = vmatprep.subr.bf16.mxu1 %v9301_v37  ;;  %v9471_v20 = vld [vmem:[#allocation46_spill] sm:$0xff] }
 0x796   :  { %6992 = vmatpush1.bf16.msra.mxu0 %v9464_v2  ;;  %7019 = vmatpush3.bf16.msra.mxu1 %v9465_v5  ;;  %v9473_v5 = vld [vmem:[#allocation48_spill] sm:$0xff]  ;;  %v9475_v2 = vld [vmem:[#allocation50_spill] sm:$0xff] }
 0x797   :  { %6994 = vmatprep.subr.bf16.mxu0 %v9466_v9  ;;  %7020 = vmatprep.subr.bf16.mxu1 %v9301_v37  ;;  %v9474_v9 = vld [vmem:[#allocation49_spill] sm:$0xff] }
 0x79a   :  { %6996 = vmatpush1.bf16.msra.mxu0 %v9467_v13  ;;  %7022 = vmatpush3.bf16.msra.mxu1 %v9468_v29 }
 0x79b   :  { %6998 = vmatprep.subr.bf16.mxu0 %v9469_v26  ;;  %7023 = vmatprep.subr.bf16.mxu1 %v9301_v37 }
 0x79e   :  { %7000 = vmatpush1.bf16.msra.mxu0 %v9470_v59  ;;  %7025 = vmatpush3.bf16.msra.mxu1 %v9471_v20 }
 0x79f   :  { %7002 = vmatprep.subr.bf16.mxu0 %v9472_v27  ;;  %7026 = vmatprep.subr.bf16.mxu1 %v9301_v37 }
 0x7a2   :  { %7004 = vmatpush1.bf16.msra.mxu0 %v9473_v5  ;;  %7028 = vmatpush3.bf16.msra.mxu1 %v9474_v9 }
 0x7a3   :  { %7030 = vmatprep.subr.bf16.mxu0 %v9475_v2  ;;  %7061 = vmatprep.subr.bf16.mxu1 %v9301_v37 }
 0x818   :  { %v3011_v29 = vpop.f32.mrb[32].mxu1 }
 0x819   :  { %v5630_v26 = vpop.f32.mrb[33].mxu1 }
 0x81a   :  { %v8796_v26 = vld [vmem:[%s9125_s8 + $0x1] ss:$0 sm:$0xff] }
 0x81b   :  { %9476 = vst [vmem:[#allocation57_spill] sm:$0xff] %v8796_v26 }
 0x838   :  { %v3081_v13 = vpop.f32.mrb[50].mxu0  ;;  %v3152_v60 = vpop.f32.mrb[34].mxu1 }
 0x839   :  { %v3158_v59 = vadd.f32 %v3081_v13, %v9360_v55  ;;  %v3083_v50 = vpop.f32.mrb[51].mxu0  ;;  %v5665_v20 = vpop.f32.mrb[35].mxu1  ;;  %v3173_v13 = vadd.f32 %v8796_v26, %v3152_v60 }
 0x83a   :  { %v3159_v27 = vadd.f32 %v3083_v50, %v9400_v33  ;;  %v8802_v50 = vld [vmem:[%s9124_s7 + $0x1] ss:$0 sm:$0xff] }
 0x83b   :  { %v4663_v16 = vmul.f32 -1.442695, %v3158_v59 }
 0x83c   :  { %v4664_v43 = vmul.f32 -1.442695, %v3159_v27 }
 0x83d   :  { %7552 = vpow2.f32 %v4663_v16 }
 0x83e   :  { %7554 = vpow2.f32 %v4664_v43  ;;  %v3172_v43 = vadd.f32 %v8802_v50, %v3011_v29 }
 0x847   :  { %v7553_v5 = vpop.eup %7552 }
 0x848   :  { %v3166_v9 = vadd.f32 1.0, %v7553_v5  ;;  %v7555_v2 = vpop.eup %7554 }
 0x849   :  { %v3167_v18 = vadd.f32 1.0, %v7555_v2 }
 0x84a   :  { %7556 = vrcp.f32 %v3166_v9 }
 0x84b   :  { %7558 = vrcp.f32 %v3167_v18 }
 0x854   :  { %v7557_v55 = vpop.eup %7556 }
 0x855   :  { %v3174_v16 = vmul.f32 %v7557_v55, %v3173_v13  ;;  %v7559_v26 = vpop.eup %7558 }
 0x856   :  { %v3177_v39 = vsub.f32 1.0, %v7559_v26  ;;  %v3179_v55 = vmul.f32 %v7559_v26, %v8673_v57 }
 0x857   :  { %v3175_v20 = vadd.f32 %v3174_v16, %v3172_v43 }
 0x858   :  { %v3250_v59 = vpop.f32.mrb[10].mxu1  ;;  %v3321_v27 = vpop.f32.mrb[52].mxu0 }
 0x859   :  { %7560 = vtanh.f32 %v3175_v20  ;;  %v3327_v9 = vadd.f32 %v3250_v59, %v9324_v51  ;;  %v3252_v2 = vpop.f32.mrb[11].mxu1  ;;  %v5700_v5 = vpop.f32.mrb[53].mxu0  ;;  %v3342_v59 = vadd.f32 %v8548_v44, %v3321_v27  ;;  %v9479_v27 = vld [vmem:[#allocation18_spill] sm:$0xff] }
 0x85a   :  { %v3328_v60 = vadd.f32 %v3252_v2, %v9363_v36 }
 0x85b   :  { %v4665_v33 = vmul.f32 -1.442695, %v3327_v9 }
 0x85c   :  { %v4666_v34 = vmul.f32 -1.442695, %v3328_v60 }
 0x85d   :  { %7562 = vpow2.f32 %v4665_v33  ;;  %v9477_v33 = vld [vmem:[#allocation55_spill] sm:$0xff] }
 0x85e   :  { %7564 = vpow2.f32 %v4666_v34 }
 0x863   :  { %v7561_v24 = vpop.eup %7560 }
 0x864   :  { %v3178_v29 = vmul.f32 %v7561_v24, %v3177_v39 }
 0x866   :  { %v8808_v18 = vadd.f32 %v3179_v55, %v3178_v29  ;;  %v9480_v29 = vld [vmem:[#allocation19_spill] sm:$0xff]  ;;  %v9481_v55 = vld [vmem:[#allocation20_spill] sm:$0xff] }
 0x867   :  { %v7563_v13 = vpop.eup %7562 }
 0x868   :  { %v3335_v43 = vadd.f32 1.0, %v7563_v13  ;;  %v7565_v16 = vpop.eup %7564  ;;  %v9482_v13 = vld [vmem:[#allocation21_spill] sm:$0xff] }
 0x869   :  { %v3336_v20 = vadd.f32 1.0, %v7565_v16  ;;  %v9484_v16 = vld [vmem:[#allocation23_spill] sm:$0xff] }
 0x86a   :  { %7566 = vrcp.f32 %v3335_v43  ;;  %v9483_v43 = vld [vmem:[#allocation22_spill] sm:$0xff] }
 0x86b   :  { %7568 = vrcp.f32 %v3336_v20  ;;  %v9485_v20 = vld [vmem:[#allocation24_spill] sm:$0xff] }
 0x874   :  { %v7567_v9 = vpop.eup %7566 }
 0x875   :  { %v3343_v2 = vmul.f32 %v7567_v9, %v3342_v59  ;;  %v7569_v60 = vpop.eup %7568  ;;  %v9486_v59 = vld [vmem:[#allocation25_spill] sm:$0xff]  ;;  %v9487_v9 = vld [vmem:[#allocation26_spill] sm:$0xff] }
 0x876   :  { %v3346_v34 = vsub.f32 1.0, %v7569_v60  ;;  %v3348_v57 = vmul.f32 %v7569_v60, %v8678_v15  ;;  %v9478_v15 = vld [vmem:[#allocation17_spill] sm:$0xff]  ;;  %v9491_v60 = vld [vmem:[#allocation30_spill] sm:$0xff] }
 0x877   :  { %v3344_v5 = vadd.f32 %v3343_v2, %v9477_v33  ;;  %v9488_v2 = vld [vmem:[#allocation27_spill] sm:$0xff]  ;;  %v9489_v33 = vld [vmem:[#allocation28_spill] sm:$0xff] }
 0x879   :  { %7570 = vtanh.f32 %v3344_v5  ;;  %v9490_v5 = vld [vmem:[#allocation29_spill] sm:$0xff] }
 0x883   :  { %v7571_v24 = vpop.eup %7570 }
 0x884   :  { %v3347_v39 = vmul.f32 %v7571_v24, %v3346_v34  ;;  %v9492_v34 = vld [vmem:[#allocation31_spill] sm:$0xff]  ;;  %v9493_v24 = vld [vmem:[#allocation32_spill] sm:$0xff] }
 0x886   :  { %v8813_v26 = vadd.f32 %v3348_v57, %v3347_v39  ;;  %v9494_v39 = vld [vmem:[#allocation33_spill] sm:$0xff]  ;;  %v9495_v57 = vld [vmem:[#allocation34_spill] sm:$0xff] }
 0x888   :  { %3415 = vmatmul.mubr.f32.vlgmr.msra.gmra.mrb[54].mxu0 %v8813_v26  ;;  %5734 = vmatmul.mubr.f32.vlgmr.msra.gmra.mrb[36].mxu1 %v8813_v26 }
 0x889   :  { %7032 = vmatpush1.bf16.msra.mxu0 %v9327_v8  ;;  %7063 = vmatpush3.bf16.msra.mxu1 %v9328_v62 }
 0x88a   :  { %7034 = vmatprep.subr.bf16.mxu0 %v9329_v32  ;;  %7064 = vmatprep.subr.bf16.mxu1 %v9301_v37 }
 0x88b   :  { %3555 = vmatprep.mubr.f32.mxu0 %v9303_v30  ;;  %5768 = vmatprep.mubr.msk.f32.mxu1 %vm7727_vm2, %v9303_v30 }
 0x88d   :  { %7036 = vmatpush1.bf16.msra.mxu0 %v9330_v45  ;;  %7066 = vmatpush3.bf16.msra.mxu1 %v9331_v14 }
 0x88e   :  { %7038 = vmatprep.subr.bf16.mxu0 %v9332_v11  ;;  %7067 = vmatprep.subr.bf16.mxu1 %v9301_v37 }
 0x891   :  { %7040 = vmatpush1.bf16.msra.mxu0 %v9333_v7  ;;  %7069 = vmatpush3.bf16.msra.mxu1 %v9334_v49 }
 0x892   :  { %7042 = vmatprep.subr.bf16.mxu0 %v9335_v53  ;;  %7070 = vmatprep.subr.bf16.mxu1 %v9301_v37 }
 0x895   :  { %7044 = vmatpush1.bf16.msra.mxu0 %v9336_v61  ;;  %7072 = vmatpush3.bf16.msra.mxu1 %v9337_v22 }
 0x896   :  { %7046 = vmatprep.subr.bf16.mxu0 %v9338_v35  ;;  %7073 = vmatprep.subr.bf16.mxu1 %v9301_v37 }
 0x899   :  { %7048 = vmatpush1.bf16.msra.mxu0 %v8154_v3  ;;  %7075 = vmatpush3.bf16.msra.mxu1 %v8156_v48 }
 0x89a   :  { %7050 = vmatprep.subr.bf16.mxu0 %v9339_v17  ;;  %7076 = vmatprep.subr.bf16.mxu1 %v9301_v37 }
 0x89d   :  { %7052 = vmatpush1.bf16.msra.mxu0 %v9340_v41  ;;  %7078 = vmatpush3.bf16.msra.mxu1 %v8166_v28 }
 0x89e   :  { %7054 = vmatprep.subr.bf16.mxu0 %v8170_v0  ;;  %7079 = vmatprep.subr.bf16.mxu1 %v9301_v37 }
 0x8a1   :  { %7056 = vmatpush1.bf16.msra.mxu0 %v8174_v47  ;;  %7081 = vmatpush3.bf16.msra.mxu1 %v8176_v63 }
 0x8a2   :  { %7058 = vmatprep.subr.bf16.mxu0 %v8180_v56  ;;  %7082 = vmatprep.subr.bf16.mxu1 %v9301_v37 }
 0x8a5   :  { %7060 = vmatpush1.bf16.msra.mxu0 %v8184_v12  ;;  %7084 = vmatpush3.bf16.msra.mxu1 %v8186_v23 }
 0x8a6   :  { %7086 = vmatprep.subr.bf16.mxu1 %v7874_v31  ;;  %7117 = vmatprep.subr.bf16.mxu0 %v9301_v37 }
 0x8a8   :  { %3556 = vmatmul.mubr.f32.vlgmr.msra.gmra.mrb[54].mxu0 %v8808_v18  ;;  %5769 = vmatmul.mubr.f32.vlgmr.msra.gmra.mrb[38].mxu1 %v8808_v18 }
 0x8a9   :  { %7088 = vmatpush1.bf16.msra.mxu1 %v7893_v52  ;;  %7119 = vmatpush3.bf16.msra.mxu0 %v7895_v54 }
 0x8aa   :  { %7090 = vmatprep.subr.bf16.mxu1 %v7898_v58  ;;  %7120 = vmatprep.subr.bf16.mxu0 %v9301_v37 }
 0x8ab   :  { %3724 = vmatprep.mubr.f32.mxu1 %v9303_v30  ;;  %5803 = vmatprep.mubr.msk.f32.mxu0 %vm7727_vm2, %v9303_v30 }
 0x8ad   :  { %7092 = vmatpush1.bf16.msra.mxu1 %v7902_v4  ;;  %7122 = vmatpush3.bf16.msra.mxu0 %v7905_v6 }
 0x8ae   :  { %7094 = vmatprep.subr.bf16.mxu1 %v7909_v10  ;;  %7123 = vmatprep.subr.bf16.mxu0 %v9301_v37 }
 0x8b1   :  { %7096 = vmatpush1.bf16.msra.mxu1 %v7914_v19  ;;  %7125 = vmatpush3.bf16.msra.mxu0 %v7917_v21 }
 0x8b2   :  { %7098 = vmatprep.subr.bf16.mxu1 %v7921_v25  ;;  %7126 = vmatprep.subr.bf16.mxu0 %v9301_v37 }
 0x8b5   :  { %7100 = vmatpush1.bf16.msra.mxu1 %v7926_v40  ;;  %7128 = vmatpush3.bf16.msra.mxu0 %v7929_v42 }
 0x8b6   :  { %7102 = vmatprep.subr.bf16.mxu1 %v7933_v46  ;;  %7129 = vmatprep.subr.bf16.mxu0 %v9301_v37 }
 0x8b9   :  { %7104 = vmatpush1.bf16.msra.mxu1 %v9440_v38  ;;  %7131 = vmatpush3.bf16.msra.mxu0 %v9441_v1 }
 0x8ba   :  { %7106 = vmatprep.subr.bf16.mxu1 %v9478_v15  ;;  %7132 = vmatprep.subr.bf16.mxu0 %v9301_v37 }
 0x8bd   :  { %7108 = vmatpush1.bf16.msra.mxu1 %v9479_v27  ;;  %7134 = vmatpush3.bf16.msra.mxu0 %v9480_v29  ;;  %v9514_v27 = vld [vmem:[#allocation57_spill] sm:$0xff] }
 0x8be   :  { %7110 = vmatprep.subr.bf16.mxu1 %v9481_v55  ;;  %7135 = vmatprep.subr.bf16.mxu0 %v9301_v37 }
 0x8c1   :  { %7112 = vmatpush1.bf16.msra.mxu1 %v9482_v13  ;;  %7137 = vmatpush3.bf16.msra.mxu0 %v9483_v43 }
 0x8c2   :  { %7114 = vmatprep.subr.bf16.mxu1 %v9484_v16  ;;  %7138 = vmatprep.subr.bf16.mxu0 %v9301_v37 }
 0x8c5   :  { %7116 = vmatpush1.bf16.msra.mxu1 %v9485_v20  ;;  %7140 = vmatpush3.bf16.msra.mxu0 %v9486_v59  ;;  %v9512_v20 = vld [vmem:[#allocation13_spill] sm:$0xff] }
 0x8c6   :  { %7142 = vmatprep.subr.bf16.mxu0 %v9487_v9  ;;  %7173 = vmatprep.subr.bf16.mxu1 %v9301_v37  ;;  %v9499_v9 = vld [vmem:[#allocation38_spill] sm:$0xff] }
 0x8c8   :  { %3725 = vmatmul.mubr.f32.vlgmr.msra.gmra.mrb[12].mxu1 %v8813_v26  ;;  %5804 = vmatmul.mubr.f32.vlgmr.msra.gmra.mrb[56].mxu0 %v8813_v26 }
 0x8c9   :  { %7144 = vmatpush1.bf16.msra.mxu0 %v9488_v2  ;;  %7175 = vmatpush3.bf16.msra.mxu1 %v9489_v33  ;;  %v9497_v33 = vld [vmem:[#allocation36_spill] sm:$0xff]  ;;  %v9498_v2 = vld [vmem:[#allocation37_spill] sm:$0xff] }
 0x8ca   :  { %7146 = vmatprep.subr.bf16.mxu0 %v9490_v5  ;;  %7176 = vmatprep.subr.bf16.mxu1 %v9301_v37  ;;  %v9496_v5 = vld [vmem:[#allocation35_spill] sm:$0xff] }
 0x8cb   :  { %3890 = vmatprep.mubr.f32.mxu0 %v9303_v30  ;;  %5838 = vmatprep.mubr.msk.f32.mxu1 %vm7727_vm2, %v9303_v30 }
 0x8cd   :  { %7148 = vmatpush1.bf16.msra.mxu0 %v9491_v60  ;;  %7178 = vmatpush3.bf16.msra.mxu1 %v9492_v34  ;;  %v9500_v34 = vld [vmem:[#allocation39_spill] sm:$0xff]  ;;  %v9502_v60 = vld [vmem:[#allocation41_spill] sm:$0xff] }
 0x8ce   :  { %7150 = vmatprep.subr.bf16.mxu0 %v9493_v24  ;;  %7179 = vmatprep.subr.bf16.mxu1 %v9301_v37  ;;  %v9501_v24 = vld [vmem:[#allocation40_spill] sm:$0xff] }
 0x8d1   :  { %7152 = vmatpush1.bf16.msra.mxu0 %v9494_v39  ;;  %7181 = vmatpush3.bf16.msra.mxu1 %v9495_v57  ;;  %v9503_v57 = vld [vmem:[#allocation42_spill] sm:$0xff]  ;;  %v9505_v39 = vld [vmem:[#allocation44_spill] sm:$0xff] }
 0x8d2   :  { %7154 = vmatprep.subr.bf16.mxu0 %v9496_v5  ;;  %7182 = vmatprep.subr.bf16.mxu1 %v9301_v37  ;;  %v9504_v5 = vld [vmem:[#allocation43_spill] sm:$0xff] }
 0x8d5   :  { %7156 = vmatpush1.bf16.msra.mxu0 %v9497_v33  ;;  %7184 = vmatpush3.bf16.msra.mxu1 %v9498_v2  ;;  %v9506_v2 = vld [vmem:[#allocation45_spill] sm:$0xff]  ;;  %v9508_v33 = vld [vmem:[#allocation47_spill] sm:$0xff] }
 0x8d6   :  { %7158 = vmatprep.subr.bf16.mxu0 %v9499_v9  ;;  %7185 = vmatprep.subr.bf16.mxu1 %v9301_v37  ;;  %v9507_v9 = vld [vmem:[#allocation46_spill] sm:$0xff] }
 0x8d9   :  { %7160 = vmatpush1.bf16.msra.mxu0 %v9500_v34  ;;  %7187 = vmatpush3.bf16.msra.mxu1 %v9501_v24  ;;  %v9509_v24 = vld [vmem:[#allocation48_spill] sm:$0xff]  ;;  %v9511_v34 = vld [vmem:[#allocation50_spill] sm:$0xff] }
 0x8da   :  { %7162 = vmatprep.subr.bf16.mxu0 %v9502_v60  ;;  %7188 = vmatprep.subr.bf16.mxu1 %v9301_v37  ;;  %v9510_v60 = vld [vmem:[#allocation49_spill] sm:$0xff] }
 0x8dd   :  { %7164 = vmatpush1.bf16.msra.mxu0 %v9503_v57  ;;  %7190 = vmatpush3.bf16.msra.mxu1 %v9504_v5 }
 0x8de   :  { %7166 = vmatprep.subr.bf16.mxu0 %v9505_v39  ;;  %7191 = vmatprep.subr.bf16.mxu1 %v9301_v37 }
 0x8e1   :  { %7168 = vmatpush1.bf16.msra.mxu0 %v9506_v2  ;;  %7193 = vmatpush3.bf16.msra.mxu1 %v9507_v9 }
 0x8e2   :  { %7170 = vmatprep.subr.bf16.mxu0 %v9508_v33  ;;  %7194 = vmatprep.subr.bf16.mxu1 %v9301_v37  ;;  %v9513_v33 = vld [vmem:[#allocation14_spill] sm:$0xff] }
 0x8e5   :  { %7172 = vmatpush1.bf16.msra.mxu0 %v9509_v24  ;;  %7196 = vmatpush3.bf16.msra.mxu1 %v9510_v60 }
 0x8e6   :  { %7198 = vmatprep.subr.bf16.mxu0 %v9511_v34  ;;  %7229 = vmatprep.subr.bf16.mxu1 %v9301_v37 }
 0x95b   :  { %v3487_v5 = vpop.f32.mrb[36].mxu1 }
 0x95c   :  { %v5735_v39 = vpop.f32.mrb[37].mxu1  ;;  %v3648_v1 = vadd.f32 %v8802_v50, %v3487_v5 }
 0x97b   :  { %v3557_v57 = vpop.f32.mrb[54].mxu0  ;;  %v3628_v59 = vpop.f32.mrb[38].mxu1 }
 0x97c   :  { %v3634_v2 = vadd.f32 %v3557_v57, %v9512_v20  ;;  %v3559_v16 = vpop.f32.mrb[55].mxu0  ;;  %v5770_v9 = vpop.f32.mrb[39].mxu1  ;;  %v3649_v15 = vadd.f32 %v9514_v27, %v3628_v59 }
 0x97d   :  { %v3635_v13 = vadd.f32 %v3559_v16, %v9513_v33 }
 0x97e   :  { %v4667_v43 = vmul.f32 -1.442695, %v3634_v2 }
 0x97f   :  { %v4668_v55 = vmul.f32 -1.442695, %v3635_v13 }
 0x980   :  { %7572 = vpow2.f32 %v4667_v43 }
 0x981   :  { %7574 = vpow2.f32 %v4668_v55 }
 0x98a   :  { %v7573_v24 = vpop.eup %7572 }
 0x98b   :  { %v3642_v60 = vadd.f32 1.0, %v7573_v24  ;;  %v7575_v34 = vpop.eup %7574 }
 0x98c   :  { %v3643_v29 = vadd.f32 1.0, %v7575_v34 }
 0x98d   :  { %7576 = vrcp.f32 %v3642_v60 }
 0x98e   :  { %7578 = vrcp.f32 %v3643_v29 }
 0x997   :  { %v7577_v39 = vpop.eup %7576 }
 0x998   :  { %v3650_v38 = vmul.f32 %v7577_v39, %v3649_v15  ;;  %v7579_v34 = vpop.eup %7578 }
 0x999   :  { %v3653_v59 = vsub.f32 1.0, %v7579_v34  ;;  %v3655_v15 = vmul.f32 %v7579_v34, %v8808_v18 }
 0x99a   :  { %v3651_v57 = vadd.f32 %v3650_v38, %v3648_v1 }
 0x99b   :  { %v3726_v9 = vpop.f32.mrb[12].mxu1  ;;  %v3797_v2 = vpop.f32.mrb[56].mxu0 }
 0x99c   :  { %7580 = vtanh.f32 %v3651_v57  ;;  %v3803_v43 = vadd.f32 %v3726_v9, %v9324_v51  ;;  %v3728_v13 = vpop.f32.mrb[13].mxu1  ;;  %v5805_v55 = vpop.f32.mrb[57].mxu0  ;;  %v3818_v9 = vadd.f32 %v8548_v44, %v3797_v2  ;;  %v9529_v44 = vld [vmem:[#allocation28_spill] sm:$0xff]  ;;  %v9531_v2 = vld [vmem:[#allocation30_spill] sm:$0xff] }
 0x99d   :  { %v3804_v60 = vadd.f32 %v3728_v13, %v9363_v36  ;;  %v9515_v55 = vld [vmem:[#allocation56_spill] sm:$0xff] }
 0x99e   :  { %v4669_v16 = vmul.f32 -1.442695, %v3803_v43 }
 0x99f   :  { %v4670_v24 = vmul.f32 -1.442695, %v3804_v60 }
 0x9a0   :  { %7582 = vpow2.f32 %v4669_v16 }
 0x9a1   :  { %7584 = vpow2.f32 %v4670_v24 }
 0x9a6   :  { %v7581_v27 = vpop.eup %7580 }
 0x9a7   :  { %v3654_v5 = vmul.f32 %v7581_v27, %v3653_v59 }
 0x9a9   :  { %v8933_v38 = vadd.f32 %v3655_v15, %v3654_v5  ;;  %v9532_v5 = vld [vmem:[#allocation31_spill] sm:$0xff]  ;;  %v9533_v15 = vld [vmem:[#allocation32_spill] sm:$0xff] }
 0x9aa   :  { %v7583_v1 = vpop.eup %7582 }
 0x9ab   :  { %v3811_v29 = vadd.f32 1.0, %v7583_v1  ;;  %v7585_v39 = vpop.eup %7584  ;;  %v9534_v1 = vld [vmem:[#allocation33_spill] sm:$0xff] }
 0x9ac   :  { %v3812_v57 = vadd.f32 1.0, %v7585_v39  ;;  %v9536_v39 = vld [vmem:[#allocation35_spill] sm:$0xff] }
 0x9ad   :  { %7586 = vrcp.f32 %v3811_v29  ;;  %v9535_v29 = vld [vmem:[#allocation34_spill] sm:$0xff] }
 0x9ae   :  { %7588 = vrcp.f32 %v3812_v57  ;;  %v9537_v57 = vld [vmem:[#allocation36_spill] sm:$0xff] }
 0x9b7   :  { %v7587_v43 = vpop.eup %7586 }
 0x9b8   :  { %v3819_v13 = vmul.f32 %v7587_v43, %v3818_v9  ;;  %v7589_v60 = vpop.eup %7588  ;;  %v9538_v9 = vld [vmem:[#allocation37_spill] sm:$0xff]  ;;  %v9539_v43 = vld [vmem:[#allocation38_spill] sm:$0xff] }
 0x9b9   :  { %v3822_v24 = vsub.f32 1.0, %v7589_v60  ;;  %v3824_v18 = vmul.f32 %v7589_v60, %v8813_v26  ;;  %v9530_v26 = vld [vmem:[#allocation29_spill] sm:$0xff]  ;;  %v9543_v60 = vld [vmem:[#allocation42_spill] sm:$0xff] }
 0x9ba   :  { %v3820_v16 = vadd.f32 %v3819_v13, %v9515_v55  ;;  %v9540_v13 = vld [vmem:[#allocation39_spill] sm:$0xff]  ;;  %v9541_v55 = vld [vmem:[#allocation40_spill] sm:$0xff] }
 0x9bc   :  { %7590 = vtanh.f32 %v3820_v16  ;;  %v9542_v16 = vld [vmem:[#allocation41_spill] sm:$0xff] }
 0x9c6   :  { %v7591_v27 = vpop.eup %7590 }
 0x9c7   :  { %v3823_v59 = vmul.f32 %v7591_v27, %v3822_v24  ;;  %v9544_v24 = vld [vmem:[#allocation43_spill] sm:$0xff]  ;;  %v9545_v27 = vld [vmem:[#allocation44_spill] sm:$0xff] }
 0x9c9   :  { %v8938_v34 = vadd.f32 %v3824_v18, %v3823_v59  ;;  %v9546_v59 = vld [vmem:[#allocation45_spill] sm:$0xff]  ;;  %v9547_v18 = vld [vmem:[#allocation46_spill] sm:$0xff] }
 0x9cb   :  { %3891 = vmatmul.mubr.f32.vlgmr.msra.gmra.mrb[58].mxu0 %v8938_v34  ;;  %5839 = vmatmul.mubr.f32.vlgmr.msra.gmra.mrb[40].mxu1 %v8938_v34 }
 0x9cc   :  { %7200 = vmatpush1.bf16.msra.mxu0 %v9327_v8  ;;  %7231 = vmatpush3.bf16.msra.mxu1 %v9328_v62 }
 0x9cd   :  { %7202 = vmatprep.subr.bf16.mxu0 %v9329_v32  ;;  %7232 = vmatprep.subr.bf16.mxu1 %v9301_v37 }
 0x9ce   :  { %4031 = vmatprep.mubr.f32.mxu0 %v9303_v30  ;;  %5873 = vmatprep.mubr.msk.f32.mxu1 %vm7727_vm2, %v9303_v30 }
 0x9d0   :  { %7204 = vmatpush1.bf16.msra.mxu0 %v9330_v45  ;;  %7234 = vmatpush3.bf16.msra.mxu1 %v9331_v14 }
 0x9d1   :  { %7206 = vmatprep.subr.bf16.mxu0 %v9332_v11  ;;  %7235 = vmatprep.subr.bf16.mxu1 %v9301_v37 }
 0x9d4   :  { %7208 = vmatpush1.bf16.msra.mxu0 %v9333_v7  ;;  %7237 = vmatpush3.bf16.msra.mxu1 %v9334_v49 }
 0x9d5   :  { %7210 = vmatprep.subr.bf16.mxu0 %v9335_v53  ;;  %7238 = vmatprep.subr.bf16.mxu1 %v9301_v37 }
 0x9d8   :  { %7212 = vmatpush1.bf16.msra.mxu0 %v9336_v61  ;;  %7240 = vmatpush3.bf16.msra.mxu1 %v9337_v22 }
 0x9d9   :  { %7214 = vmatprep.subr.bf16.mxu0 %v9338_v35  ;;  %7241 = vmatprep.subr.bf16.mxu1 %v9301_v37 }
 0x9dc   :  { %7216 = vmatpush1.bf16.msra.mxu0 %v8154_v3  ;;  %7243 = vmatpush3.bf16.msra.mxu1 %v8156_v48 }
 0x9dd   :  { %7218 = vmatprep.subr.bf16.mxu0 %v9339_v17  ;;  %7244 = vmatprep.subr.bf16.mxu1 %v9301_v37 }
 0x9e0   :  { %7220 = vmatpush1.bf16.msra.mxu0 %v9340_v41  ;;  %7246 = vmatpush3.bf16.msra.mxu1 %v8166_v28 }
 0x9e1   :  { %7222 = vmatprep.subr.bf16.mxu0 %v8170_v0  ;;  %7247 = vmatprep.subr.bf16.mxu1 %v9301_v37 }
 0x9e4   :  { %7224 = vmatpush1.bf16.msra.mxu0 %v8174_v47  ;;  %7249 = vmatpush3.bf16.msra.mxu1 %v8176_v63 }
 0x9e5   :  { %7226 = vmatprep.subr.bf16.mxu0 %v8180_v56  ;;  %7250 = vmatprep.subr.bf16.mxu1 %v9301_v37 }
 0x9e8   :  { %7228 = vmatpush1.bf16.msra.mxu0 %v8184_v12  ;;  %7252 = vmatpush3.bf16.msra.mxu1 %v8186_v23 }
 0x9e9   :  { %7254 = vmatprep.subr.bf16.mxu1 %v7874_v31  ;;  %7285 = vmatprep.subr.bf16.mxu0 %v9301_v37  ;;  %v9516_v31 = vld [vmem:[#allocation15_spill] sm:$0xff] }
 0x9eb   :  { %4032 = vmatmul.mubr.f32.vlgmr.msra.gmra.mrb[58].mxu0 %v8933_v38  ;;  %5874 = vmatmul.mubr.f32.vlgmr.msra.gmra.mrb[42].mxu1 %v8933_v38 }
 0x9ec   :  { %7256 = vmatpush1.bf16.msra.mxu1 %v7893_v52  ;;  %7287 = vmatpush3.bf16.msra.mxu0 %v7895_v54  ;;  %v9517_v52 = vld [vmem:[#allocation16_spill] sm:$0xff]  ;;  %v9518_v54 = vld [vmem:[#allocation17_spill] sm:$0xff] }
 0x9ed   :  { %7258 = vmatprep.subr.bf16.mxu1 %v7898_v58  ;;  %7288 = vmatprep.subr.bf16.mxu0 %v9301_v37  ;;  %v9519_v58 = vld [vmem:[#allocation18_spill] sm:$0xff] }
 0x9ee   :  { %4200 = vmatprep.mubr.f32.mxu1 %v9303_v30  ;;  %5908 = vmatprep.mubr.msk.f32.mxu0 %vm7727_vm2, %v9303_v30 }
 0x9f0   :  { %7260 = vmatpush1.bf16.msra.mxu1 %v7902_v4  ;;  %7290 = vmatpush3.bf16.msra.mxu0 %v7905_v6  ;;  %v9520_v4 = vld [vmem:[#allocation19_spill] sm:$0xff]  ;;  %v9521_v6 = vld [vmem:[#allocation20_spill] sm:$0xff] }
 0x9f1   :  { %7262 = vmatprep.subr.bf16.mxu1 %v7909_v10  ;;  %7291 = vmatprep.subr.bf16.mxu0 %v9301_v37  ;;  %v9522_v10 = vld [vmem:[#allocation21_spill] sm:$0xff] }
 0x9f4   :  { %7264 = vmatpush1.bf16.msra.mxu1 %v7914_v19  ;;  %7293 = vmatpush3.bf16.msra.mxu0 %v7917_v21  ;;  %v9523_v19 = vld [vmem:[#allocation22_spill] sm:$0xff]  ;;  %v9524_v21 = vld [vmem:[#allocation23_spill] sm:$0xff] }
 0x9f5   :  { %7266 = vmatprep.subr.bf16.mxu1 %v7921_v25  ;;  %7294 = vmatprep.subr.bf16.mxu0 %v9301_v37  ;;  %v9525_v25 = vld [vmem:[#allocation24_spill] sm:$0xff] }
 0x9f8   :  { %7268 = vmatpush1.bf16.msra.mxu1 %v7926_v40  ;;  %7296 = vmatpush3.bf16.msra.mxu0 %v7929_v42  ;;  %v9526_v40 = vld [vmem:[#allocation25_spill] sm:$0xff]  ;;  %v9527_v42 = vld [vmem:[#allocation26_spill] sm:$0xff] }
 0x9f9   :  { %7270 = vmatprep.subr.bf16.mxu1 %v7933_v46  ;;  %7297 = vmatprep.subr.bf16.mxu0 %v9301_v37  ;;  %v9528_v46 = vld [vmem:[#allocation27_spill] sm:$0xff] }
 0x9fc   :  { %7272 = vmatpush1.bf16.msra.mxu1 %v9516_v31  ;;  %7299 = vmatpush3.bf16.msra.mxu0 %v9517_v52  ;;  %v9548_v31 = vld [vmem:[#allocation47_spill] sm:$0xff]  ;;  %v9549_v52 = vld [vmem:[#allocation48_spill] sm:$0xff] }
 0x9fd   :  { %7274 = vmatprep.subr.bf16.mxu1 %v9518_v54  ;;  %7300 = vmatprep.subr.bf16.mxu0 %v9301_v37  ;;  %v9550_v54 = vld [vmem:[#allocation49_spill] sm:$0xff] }
 0xa00   :  { %7276 = vmatpush1.bf16.msra.mxu1 %v9519_v58  ;;  %7302 = vmatpush3.bf16.msra.mxu0 %v9520_v4  ;;  %v9551_v58 = vld [vmem:[#allocation50_spill] sm:$0xff] }
 0xa01   :  { %7278 = vmatprep.subr.bf16.mxu1 %v9521_v6  ;;  %7303 = vmatprep.subr.bf16.mxu0 %v9301_v37 }
 0xa04   :  { %7280 = vmatpush1.bf16.msra.mxu1 %v9522_v10  ;;  %7305 = vmatpush3.bf16.msra.mxu0 %v9523_v19 }
 0xa05   :  { %7282 = vmatprep.subr.bf16.mxu1 %v9524_v21  ;;  %7306 = vmatprep.subr.bf16.mxu0 %v9301_v37 }
 0xa08   :  { %7284 = vmatpush1.bf16.msra.mxu1 %v9525_v25  ;;  %7308 = vmatpush3.bf16.msra.mxu0 %v9526_v40 }
 0xa09   :  { %7310 = vmatprep.subr.bf16.mxu0 %v9527_v42  ;;  %7341 = vmatprep.subr.bf16.mxu1 %v9301_v37 }
 0xa0b   :  { %4201 = vmatmul.mubr.f32.vlgmr.msra.gmra.mrb[14].mxu1 %v8938_v34  ;;  %5909 = vmatmul.mubr.f32.vlgmr.msra.gmra.mrb[60].mxu0 %v8938_v34 }
 0xa0c   :  { %7312 = vmatpush1.bf16.msra.mxu0 %v9528_v46  ;;  %7343 = vmatpush3.bf16.msra.mxu1 %v9529_v44 }
 0xa0d   :  { %7314 = vmatprep.subr.bf16.mxu0 %v9530_v26  ;;  %7344 = vmatprep.subr.bf16.mxu1 %v9301_v37 }
 0xa0e   :  { %4366 = vmatprep.mubr.f32.mxu0 %v9303_v30  ;;  %5943 = vmatprep.mubr.msk.f32.mxu1 %vm7727_vm2, %v9303_v30 }
 0xa10   :  { %7316 = vmatpush1.bf16.msra.mxu0 %v9531_v2  ;;  %7346 = vmatpush3.bf16.msra.mxu1 %v9532_v5 }
 0xa11   :  { %7318 = vmatprep.subr.bf16.mxu0 %v9533_v15  ;;  %7347 = vmatprep.subr.bf16.mxu1 %v9301_v37 }
 0xa14   :  { %7320 = vmatpush1.bf16.msra.mxu0 %v9534_v1  ;;  %7349 = vmatpush3.bf16.msra.mxu1 %v9535_v29  ;;  %v9552_v1 = vld [vmem:[#allocation57_spill] sm:$0xff] }
 0xa15   :  { %7322 = vmatprep.subr.bf16.mxu0 %v9536_v39  ;;  %7350 = vmatprep.subr.bf16.mxu1 %v9301_v37 }
 0xa18   :  { %7324 = vmatpush1.bf16.msra.mxu0 %v9537_v57  ;;  %7352 = vmatpush3.bf16.msra.mxu1 %v9538_v9 }
 0xa19   :  { %7326 = vmatprep.subr.bf16.mxu0 %v9539_v43  ;;  %7353 = vmatprep.subr.bf16.mxu1 %v9301_v37 }
 0xa1c   :  { %7328 = vmatpush1.bf16.msra.mxu0 %v9540_v13  ;;  %7355 = vmatpush3.bf16.msra.mxu1 %v9541_v55 }
 0xa1d   :  { %7330 = vmatprep.subr.bf16.mxu0 %v9542_v16  ;;  %7356 = vmatprep.subr.bf16.mxu1 %v9301_v37 }
 0xa20   :  { %7332 = vmatpush1.bf16.msra.mxu0 %v9543_v60  ;;  %7358 = vmatpush3.bf16.msra.mxu1 %v9544_v24 }
 0xa21   :  { %7334 = vmatprep.subr.bf16.mxu0 %v9545_v27  ;;  %7359 = vmatprep.subr.bf16.mxu1 %v9301_v37 }
 0xa24   :  { %7336 = vmatpush1.bf16.msra.mxu0 %v9546_v59  ;;  %7361 = vmatpush3.bf16.msra.mxu1 %v9547_v18 }
 0xa25   :  { %7338 = vmatprep.subr.bf16.mxu0 %v9548_v31  ;;  %7362 = vmatprep.subr.bf16.mxu1 %v9301_v37 }
 0xa28   :  { %7340 = vmatpush1.bf16.msra.mxu0 %v9549_v52  ;;  %7364 = vmatpush3.bf16.msra.mxu1 %v9550_v54 }
 0xa29   :  { %7366 = vmatprep.subr.bf16.mxu0 %v9551_v58  ;;  %7397 = vmatprep.subr.bf16.mxu1 %v9301_v37 }
 0xa9e   :  { %v3963_v4 = vpop.f32.mrb[40].mxu1 }
 0xa9f   :  { %v5840_v6 = vpop.f32.mrb[41].mxu1  ;;  %v4124_v57 = vadd.f32 %v8802_v50, %v3963_v4 }
 0xabe   :  { %v4033_v10 = vpop.f32.mrb[58].mxu0  ;;  %v4104_v19 = vpop.f32.mrb[42].mxu1 }
 0xabf   :  { %v4110_v21 = vadd.f32 %v4033_v10, %v9512_v20  ;;  %v4035_v25 = vpop.f32.mrb[59].mxu0  ;;  %v5875_v40 = vpop.f32.mrb[43].mxu1  ;;  %v4125_v29 = vadd.f32 %v9552_v1, %v4104_v19 }
 0xac0   :  { %v4111_v46 = vadd.f32 %v4035_v25, %v9513_v33 }
 0xac1   :  { %v4671_v42 = vmul.f32 -1.442695, %v4110_v21 }
 0xac2   :  { %v4672_v44 = vmul.f32 -1.442695, %v4111_v46  ;;  %v9553_v46 = vld [vmem:[#allocation58_spill] sm:$0xff] }
 0xac3   :  { %7592 = vpow2.f32 %v4671_v42 }
 0xac4   :  { %7594 = vpow2.f32 %v4672_v44 }
 0xacd   :  { %v7593_v26 = vpop.eup %7592 }
 0xace   :  { %v4118_v2 = vadd.f32 1.0, %v7593_v26  ;;  %v7595_v5 = vpop.eup %7594 }
 0xacf   :  { %v4119_v15 = vadd.f32 1.0, %v7595_v5 }
 0xad0   :  { %7596 = vrcp.f32 %v4118_v2 }
 0xad1   :  { %7598 = vrcp.f32 %v4119_v15 }
 0xada   :  { %v7597_v39 = vpop.eup %7596 }
 0xadb   :  { %v4126_v9 = vmul.f32 %v7597_v39, %v4125_v29  ;;  %v7599_v18 = vpop.eup %7598 }
 0xadc   :  { %v4129_v52 = vsub.f32 1.0, %v7599_v18  ;;  %v4131_v4 = vmul.f32 %v7599_v18, %v8933_v38 }
 0xadd   :  { %v4127_v43 = vadd.f32 %v4126_v9, %v4124_v57 }
 0xade   :  { %v4202_v13 = vpop.f32.mrb[14].mxu1  ;;  %v4273_v55 = vpop.f32.mrb[60].mxu0 }
 0xadf   :  { %7600 = vtanh.f32 %v4127_v43  ;;  %v4279_v16 = vadd.f32 %v4202_v13, %v9324_v51  ;;  %v4204_v60 = vpop.f32.mrb[15].mxu1  ;;  %v5910_v24 = vpop.f32.mrb[61].mxu0 }
 0xae0   :  { %v4280_v59 = vadd.f32 %v4204_v60, %v9363_v36  ;;  %v7625_v36 = vld [vmem:[%s9125_s8] ss:$0 sm:$0xff]  ;;  %s7728_s8 = smov [#allocation9]  }
 0xae1   :  { %v4673_v27 = vmul.f32 -1.442695, %v4279_v16  ;;  %v4294_v25 = vadd.f32 %v7625_v36, %v4273_v55  ;;  %s4617_s4 = sshll.u32 %s7728_s8, 4  ;;  %s4618_s4 = int_to_ptr.vmem [resolvable:$true] %s4617_s4 }
 0xae2   :  { %v4674_v31 = vmul.f32 -1.442695, %v4280_v59  ;;  %s7692_s10 = scalar_lea.vmem %s4618_s4, 128  ;;  %p7697_p11 = scmp.lt.s32.totalorder %s4618_s4, %s4618_s4 }
 0xae3   :  { %7602 = vpow2.f32 %v4673_v27  ;;  %p7693_p10 = scmp.ne.s32.totalorder %s4618_s4, %s7692_s10  ;;  %p7698_p12 = scmp.lt.s32.totalorder %s7692_s10, %s7692_s10 }
 0xae4   :  { %7604 = vpow2.f32 %v4674_v31 }
 0xae5   :  { %p7699_p13 = por %p7698_p12, %p7697_p11 }
 0xae7   :  { %p7700_p0 = pnand %p7699_p13, %p7693_p10 }
 0xae9   :  { %v7601_v54 = vpop.eup %7600 }
 0xaea   :  { %v4130_v58 = vmul.f32 %v7601_v54, %v4129_v52 }
 0xaec   :  { %v9058_v6 = vadd.f32 %v4131_v4, %v4130_v58 }
 0xaed   :  { %v7603_v10 = vpop.eup %7602 }
 0xaee   :  { %v4287_v19 = vadd.f32 1.0, %v7603_v10  ;;  %v7605_v51 = vpop.eup %7604 }
 0xaef   :  { %v4288_v21 = vadd.f32 1.0, %v7605_v51 }
 0xaf0   :  { %7606 = vrcp.f32 %v4287_v19 }
 0xaf1   :  { %7608 = vrcp.f32 %v4288_v21 }
 0xafa   :  { %v7607_v40 = vpop.eup %7606 }
 0xafb   :  { %v4295_v42 = vmul.f32 %v7607_v40, %v4294_v25  ;;  %v7609_v26 = vpop.eup %7608 }
 0xafc   :  { %v4298_v38 = vsub.f32 1.0, %v7609_v26  ;;  %v4300_v15 = vmul.f32 %v7609_v26, %v8938_v34 }
 0xafd   :  { %v4296_v44 = vadd.f32 %v4295_v42, %v9553_v46 }
 0xaff   :  { %7610 = vtanh.f32 %v4296_v44 }
 0xb09   :  { %v7611_v2 = vpop.eup %7610 }
 0xb0a   :  { %v4299_v5 = vmul.f32 %v7611_v2, %v4298_v38 }
 0xb0c   :  { %v4301_v29 = vadd.f32 %v4300_v15, %v4299_v5 }
 0xb0e   :  { %4367 = vmatmul.mubr.f32.vlgmr.msra.gmra.mrb[62].mxu0 %v4301_v29  ;;  %5944 = vmatmul.mubr.f32.vlgmr.msra.gmra.mrb[44].mxu1 %v4301_v29 }
 0xb0f   :  { %7368 = vmatpush1.bf16.msra.mxu0 %v9327_v8  ;;  %7399 = vmatpush3.bf16.msra.mxu1 %v9328_v62 }
 0xb10   :  { %7370 = vmatprep.subr.bf16.mxu0 %v9329_v32  ;;  %7400 = vmatprep.subr.bf16.mxu1 %v9301_v37 }
 0xb11   :  { %4507 = vmatprep.mubr.f32.mxu0 %v9303_v30  ;;  %5978 = vmatprep.mubr.msk.f32.mxu1 %vm7727_vm2, %v9303_v30 }
 0xb13   :  { %7372 = vmatpush1.bf16.msra.mxu0 %v9330_v45  ;;  %7402 = vmatpush3.bf16.msra.mxu1 %v9331_v14 }
 0xb14   :  { %7374 = vmatprep.subr.bf16.mxu0 %v9332_v11  ;;  %7403 = vmatprep.subr.bf16.mxu1 %v9301_v37 }
 0xb17   :  { %7376 = vmatpush1.bf16.msra.mxu0 %v9333_v7  ;;  %7405 = vmatpush3.bf16.msra.mxu1 %v9334_v49 }
 0xb18   :  { %7378 = vmatprep.subr.bf16.mxu0 %v9335_v53  ;;  %7406 = vmatprep.subr.bf16.mxu1 %v9301_v37 }
 0xb1b   :  { %7380 = vmatpush1.bf16.msra.mxu0 %v9336_v61  ;;  %7408 = vmatpush3.bf16.msra.mxu1 %v9337_v22 }
 0xb1c   :  { %7382 = vmatprep.subr.bf16.mxu0 %v9338_v35  ;;  %7409 = vmatprep.subr.bf16.mxu1 %v9301_v37 }
 0xb1f   :  { %7384 = vmatpush1.bf16.msra.mxu0 %v8154_v3  ;;  %7411 = vmatpush3.bf16.msra.mxu1 %v8156_v48 }
 0xb20   :  { %7386 = vmatprep.subr.bf16.mxu0 %v9339_v17  ;;  %7412 = vmatprep.subr.bf16.mxu1 %v9301_v37 }
 0xb23   :  { %7388 = vmatpush1.bf16.msra.mxu0 %v9340_v41  ;;  %7414 = vmatpush3.bf16.msra.mxu1 %v8166_v28 }
 0xb24   :  { %7390 = vmatprep.subr.bf16.mxu0 %v8170_v0  ;;  %7415 = vmatprep.subr.bf16.mxu1 %v9301_v37 }
 0xb27   :  { %7392 = vmatpush1.bf16.msra.mxu0 %v8174_v47  ;;  %7417 = vmatpush3.bf16.msra.mxu1 %v8176_v63 }
 0xb28   :  { %7394 = vmatprep.subr.bf16.mxu0 %v8180_v56  ;;  %7418 = vmatprep.subr.bf16.mxu1 %v9301_v37 }
 0xb2b   :  { %7396 = vmatpush1.bf16.msra.mxu0 %v8184_v12  ;;  %7420 = vmatpush3.bf16.msra.mxu1 %v8186_v23 }
 0xb2e   :  { %4508 = vmatmul.mubr.f32.vlgmr.msra.gmra.mrb[62].mxu0 %v9058_v6  ;;  %5979 = vmatmul.mubr.f32.vlgmr.msra.gmra.mrb[46].mxu1 %v9058_v6 }
 0xbe1   :  { %v4439_v30 = vpop.f32.mrb[44].mxu1 }
 0xbe2   :  { %v5945_v3 = vpop.f32.mrb[45].mxu1  ;;  %v4600_v11 = vadd.f32 %v8802_v50, %v4439_v30 }
 0xc01   :  { %v4509_v48 = vpop.f32.mrb[62].mxu0  ;;  %v4580_v28 = vpop.f32.mrb[46].mxu1 }
 0xc02   :  { %v4586_v0 = vadd.f32 %v4509_v48, %v9512_v20  ;;  %v4511_v47 = vpop.f32.mrb[63].mxu0  ;;  %v5980_v63 = vpop.f32.mrb[47].mxu1  ;;  %v4601_v45 = vadd.f32 %v9552_v1, %v4580_v28 }
 0xc03   :  { %v4587_v56 = vadd.f32 %v4511_v47, %v9513_v33 }
 0xc04   :  { %v4675_v8 = vmul.f32 -1.442695, %v4586_v0 }
 0xc05   :  { %v4676_v37 = vmul.f32 -1.442695, %v4587_v56 }
 0xc06   :  { %7612 = vpow2.f32 %v4675_v8 }
 0xc07   :  { %7614 = vpow2.f32 %v4676_v37 }
 0xc10   :  { %v7613_v12 = vpop.eup %7612 }
 0xc11   :  { %v4594_v23 = vadd.f32 1.0, %v7613_v12  ;;  %v7615_v62 = vpop.eup %7614 }
 0xc12   :  { %v4595_v32 = vadd.f32 1.0, %v7615_v62 }
 0xc13   :  { %7616 = vrcp.f32 %v4594_v23 }
 0xc14   :  { %7618 = vrcp.f32 %v4595_v32 }
 0xc1d   :  { %v7617_v14 = vpop.eup %7616 }
 0xc1e   :  { %v4602_v7 = vmul.f32 %v7617_v14, %v4601_v45  ;;  %v7619_v53 = vpop.eup %7618 }
 0xc1f   :  { %v4605_v61 = vsub.f32 1.0, %v7619_v53  ;;  %v4607_v17 = vmul.f32 %v7619_v53, %v9058_v6 }
 0xc20   :  { %v4603_v49 = vadd.f32 %v4602_v7, %v4600_v11 }
 0xc22   :  { %7620 = vtanh.f32 %v4603_v49 }
 0xc2c   :  { %v7621_v22 = vpop.eup %7620 }
 0xc2d   :  { %v4606_v35 = vmul.f32 %v7621_v22, %v4605_v61 }
 0xc2f   :  { %v4608_v41 = vadd.f32 %v4607_v17, %v4606_v35 }
 0xc31   :  { %4610 = vst.msk [vmem:[#allocation9] sm:$0xff] %vm4609_vm3, %v4608_v41 }
 0xc32   :  { %7703 = shalt.err (!%p7700_p0)
}
 0xc33   :  { %s7704_s16 = scalar_lea.hbm %s9126_s9, 128 }
 0xc34   :  { %p7705_p1 = scmp.ne.s32.totalorder %s9126_s9, %s7704_s16  ;;  %p7708_p2 = scmp.lt.u32.totalorder %s7704_s16, %s9126_s9 }
 0xc36   :  { %p7710_p3 = pnand %p7708_p2, %p7705_p1 }
 0xc38   :  { %7713 = shalt.err (!%p7710_p3)
}
 0xc39   :  { %4620 = dma.vmem_to_hbm [thread:$0]  %s4618_s4, 128, %s9126_s9, [#allocation5]  }
 0xc3a   :  { %7718 = dma.done.wait [#allocation5], 128  }
 0xc3b   :  { %7719 = vsyncadd [#allocation5], 4294967168 }
 0xc3c   :  { %4624 = vsyncpa [#allocation4], 1 }
 0xc3d   :  { %4625 = vsyncpa [#allocation7], 1 }
 0xc3e   :  { %4626 = vsyncpa [#allocation5], 1 }

</bundles_post_ra>
